<compile_context>
chip_gen: v6e
topology: v6e:2x2x1
jax: 0.10.0
libtpu: 0.0.40
codegen_flags: <defaults>
</compile_context>

<pallas_src>
import jax
import jax.numpy as jnp
from jax.experimental import pallas as pl
from jax.experimental.pallas import tpu as pltpu

H = W = 14
HW = H * W                       # 196
CIN = 192
COUT = 48
KH = KW = 3
LPAD = 16                        # zero lane padding each side of the flattened image
PADW = LPAD + HW + LPAD          # 228

CH_FIRST = 384                   # x140 channels
N_BRANCH = 11                    # x147 .. x217
CONV_OFF = CH_FIRST + N_BRANCH * COUT      # 912  <- slot of the conv output x224
CTOT = CONV_OFF + 2 * COUT                 # 1008 (x224 + x231)


def fused_concat_conv_kernel(
        x140_ref, x147_ref, x154_ref, x161_ref, x168_ref, x175_ref,
        x182_ref, x189_ref, x196_ref, x203_ref, x210_ref, x217_ref,
        x231_ref, x_ref, w_ref, out_ref, xp_ref):
    # x140_ref .. x231_ref : pass-through tensors, (C, HW), channels-major
    # x_ref  : (CIN, HW)            conv input, flattened spatial (q = h*W + w)
    # w_ref  : (KH*KW, COUT, CIN)   weights, tap-major (dy, dx)
    # out_ref: (CTOT, HW)           full concatenated result
    # xp_ref : (CIN, PADW)          scratch: lane-padded image

    # ---- pass-through concat copies (all channel offsets are multiples of 8) ----
    out_ref[0:CH_FIRST, :] = x140_ref[...]
    branch_refs = (x147_ref, x154_ref, x161_ref, x168_ref, x175_ref, x182_ref,
                   x189_ref, x196_ref, x203_ref, x210_ref, x217_ref)
    for i, br in enumerate(branch_refs):
        off = CH_FIRST + i * COUT
        out_ref[off:off + COUT, :] = br[...]
    out_ref[CONV_OFF + COUT:CONV_OFF + 2 * COUT, :] = x231_ref[...]

    # ---- 3x3 / stride 1 / pad 1 conv via lane-padded image + 9 per-tap MXU dots ----
    # Zero only the two pad strips (the middle is fully overwritten by the image).
    xp_ref[:, :LPAD] = jnp.zeros((CIN, LPAD), jnp.float32)
    xp_ref[:, LPAD + HW:] = jnp.zeros((CIN, LPAD), jnp.float32)
    xp_ref[:, LPAD:LPAD + HW] = x_ref[...].astype(jnp.float32)

    # w-coordinate (q % W) of every output position, built in-kernel (no extra DMA).
    col = jax.lax.broadcasted_iota(jnp.int32, (COUT, HW), 1) % W
    left_ok = col >= 1            # neighbour at w-1 exists (for dx == 0 taps)
    right_ok = col <= W - 2       # neighbour at w+1 exists (for dx == 2 taps)

    acc = jnp.zeros((COUT, HW), jnp.float32)
    for dy in range(KH):
        for dx in range(KW):
            j = dy * KW + dx
            # (48,192)@(192,228): channel contraction for this tap at every position.
            z = jnp.dot(w_ref[j], xp_ref[...],
                        preferred_element_type=jnp.float32)          # (COUT, PADW)
            off = W * (dy - 1) + (dx - 1)                             # flattened shift
            contrib = z[:, LPAD + off:LPAD + off + HW]                # static lane slice
            # dy overflow hits the zero lane padding automatically; dx overflow wraps
            # rows in the flattened layout, so mask the edge columns.
            if dx == 0:
                contrib = jnp.where(left_ok, contrib, 0.0)
            elif dx == KW - 1:
                contrib = jnp.where(right_ok, contrib, 0.0)
            acc = acc + contrib

    out_ref[CONV_OFF:CONV_OFF + COUT, :] = acc.astype(out_ref.dtype)


def preprocess_weights(w_oihw):
    """One-time re-layout: OIHW (48,192,3,3) -> (KH*KW, COUT, CIN), tap-major (dy,dx).
    Kept OUTSIDE the jitted forward so the transpose is not executed per call."""
    return jnp.transpose(w_oihw, (2, 3, 0, 1)).reshape(KH * KW, COUT, CIN)


@jax.jit
def forward(params, x223, x140, x147, x154, x161, x168, x175, x182,
            x189, x196, x203, x210, x217, x231):
    passthrough = (x140, x147, x154, x161, x168, x175, x182, x189,
                   x196, x203, x210, x217, x231)
    pass2d = [t.reshape(t.shape[1], HW) for t in passthrough]     # free reshapes (N=1)
    x2d = x223.reshape(CIN, HW)                                   # free reshape
    w_taps = params["w_taps"]                                     # pre-laid-out

    in_specs = (
        [pl.BlockSpec((t.shape[0], HW), lambda i: (0, 0)) for t in pass2d]
        + [pl.BlockSpec((CIN, HW), lambda i: (0, 0)),
           pl.BlockSpec((KH * KW, COUT, CIN), lambda i: (0, 0, 0))])

    n_in_elems = (CTOT - COUT) * HW + CIN * HW + KH * KW * COUT * CIN
    out2d = pl.pallas_call(
        fused_concat_conv_kernel,
        out_shape=jax.ShapeDtypeStruct((CTOT, HW), x140.dtype),
        grid=(1,),
        in_specs=in_specs,
        out_specs=pl.BlockSpec((CTOT, HW), lambda i: (0, 0)),
        scratch_shapes=[pltpu.VMEM((CIN, PADW), jnp.float32)],
        compiler_params=pltpu.CompilerParams(
            dimension_semantics=("arbitrary",)),
        cost_estimate=pl.CostEstimate(
            flops=2 * HW * CIN * COUT * KH * KW,
            transcendentals=0,
            bytes_accessed=4 * (n_in_elems + CTOT * HW)),
    )(*pass2d, x2d, w_taps)

    return out2d.reshape(1, CTOT, H, W)                           # free reshape to NCHW


if __name__ == "__main__":
    key = jax.random.PRNGKey(0)
    keys = jax.random.split(key, 16)

    # Deterministic parameter init (torch Conv2d weight shape: OIHW = (48, 192, 3, 3)).
    fan_in = CIN * KH * KW
    w_oihw = jax.random.normal(keys[0], (COUT, CIN, KH, KW), jnp.float32) / jnp.sqrt(fan_in)
    params = {"w_taps": preprocess_weights(w_oihw)}     # one-time re-layout, outside jit

    # Deterministic inputs with the shapes from the module's forward.
    x223 = jax.random.normal(keys[1], (1, CIN, H, W), jnp.float32)
    x140 = jax.random.normal(keys[2], (1, CH_FIRST, H, W), jnp.float32)
    bkeys = keys[3:15]
    (x147, x154, x161, x168, x175, x182,
     x189, x196, x203, x210, x217, x231) = [
        jax.random.normal(k, (1, COUT, H, W), jnp.float32) for k in bkeys]

    out = forward(params, x223, x140, x147, x154, x161, x168, x175, x182,
                  x189, x196, x203, x210, x217, x231)
    out = jax.block_until_ready(out)
    assert out.shape == (1, CTOT, H, W), out.shape

    # Reference conv via XLA.
    ref_conv = jax.lax.conv_general_dilated(
        x223, w_oihw, window_strides=(1, 1), padding=((1, 1), (1, 1)),
        dimension_numbers=("NCHW", "OIHW", "NCHW"))

    # x224 is the 13th of 14 concat operands -> channel offset 384 + 11*48 = 912.
    assert jnp.allclose(out[:, CONV_OFF:CONV_OFF + COUT], ref_conv, atol=1e-3, rtol=1e-3)

    # Full module semantics: concat of all 14 tensors in order.
    ref_cat = jnp.concatenate(
        [x140, x147, x154, x161, x168, x175, x182, x189,
         x196, x203, x210, x217, ref_conv, x231], axis=1)
    assert jnp.allclose(out, ref_cat, atol=1e-3, rtol=1e-3)

    print("KERNEL_OK")
</pallas_src>

<mosaic_0001>
module attributes {stable_mosaic.version = 11 : i64} {
  func.func @fused_concat_conv_kernel(%arg0: i32, %arg1: memref<384x196xf32, #tpu.memory_space<vmem>>, %arg2: memref<48x196xf32, #tpu.memory_space<vmem>>, %arg3: memref<48x196xf32, #tpu.memory_space<vmem>>, %arg4: memref<48x196xf32, #tpu.memory_space<vmem>>, %arg5: memref<48x196xf32, #tpu.memory_space<vmem>>, %arg6: memref<48x196xf32, #tpu.memory_space<vmem>>, %arg7: memref<48x196xf32, #tpu.memory_space<vmem>>, %arg8: memref<48x196xf32, #tpu.memory_space<vmem>>, %arg9: memref<48x196xf32, #tpu.memory_space<vmem>>, %arg10: memref<48x196xf32, #tpu.memory_space<vmem>>, %arg11: memref<48x196xf32, #tpu.memory_space<vmem>>, %arg12: memref<48x196xf32, #tpu.memory_space<vmem>>, %arg13: memref<48x196xf32, #tpu.memory_space<vmem>>, %arg14: memref<192x196xf32, #tpu.memory_space<vmem>>, %arg15: memref<9x48x192xf32, #tpu.memory_space<vmem>>, %arg16: memref<1008x196xf32, #tpu.memory_space<vmem>>, %arg17: memref<192x228xf32, #tpu.memory_space<vmem>>) attributes {dimension_semantics = [#tpu.dimension_semantics<arbitrary>], iteration_bounds = array<i64: 1>, scalar_prefetch = 0 : i64, scratch_operands = 1 : i64, tpu.core_type = #tpu.core_type<tc>, window_params = [{pipeline_mode = #tpu.pipeline_mode<synchronous>, transform_indices = @transform_0, window_bounds = array<i64: 384, 196>}, {pipeline_mode = #tpu.pipeline_mode<synchronous>, transform_indices = @transform_1, window_bounds = array<i64: 48, 196>}, {pipeline_mode = #tpu.pipeline_mode<synchronous>, transform_indices = @transform_2, window_bounds = array<i64: 48, 196>}, {pipeline_mode = #tpu.pipeline_mode<synchronous>, transform_indices = @transform_3, window_bounds = array<i64: 48, 196>}, {pipeline_mode = #tpu.pipeline_mode<synchronous>, transform_indices = @transform_4, window_bounds = array<i64: 48, 196>}, {pipeline_mode = #tpu.pipeline_mode<synchronous>, transform_indices = @transform_5, window_bounds = array<i64: 48, 196>}, {pipeline_mode = #tpu.pipeline_mode<synchronous>, transform_indices = @transform_6, window_bounds = array<i64: 48, 196>}, {pipeline_mode = #tpu.pipeline_mode<synchronous>, transform_indices = @transform_7, window_bounds = array<i64: 48, 196>}, {pipeline_mode = #tpu.pipeline_mode<synchronous>, transform_indices = @transform_8, window_bounds = array<i64: 48, 196>}, {pipeline_mode = #tpu.pipeline_mode<synchronous>, transform_indices = @transform_9, window_bounds = array<i64: 48, 196>}, {pipeline_mode = #tpu.pipeline_mode<synchronous>, transform_indices = @transform_10, window_bounds = array<i64: 48, 196>}, {pipeline_mode = #tpu.pipeline_mode<synchronous>, transform_indices = @transform_11, window_bounds = array<i64: 48, 196>}, {pipeline_mode = #tpu.pipeline_mode<synchronous>, transform_indices = @transform_12, window_bounds = array<i64: 48, 196>}, {pipeline_mode = #tpu.pipeline_mode<synchronous>, transform_indices = @transform_13, window_bounds = array<i64: 192, 196>}, {pipeline_mode = #tpu.pipeline_mode<synchronous>, transform_indices = @transform_14, window_bounds = array<i64: 9, 48, 192>}, {pipeline_mode = #tpu.pipeline_mode<synchronous>, transform_indices = @transform_15, window_bounds = array<i64: 1008, 196>}]} {
    %c0 = arith.constant 0 : index
    %c0_0 = arith.constant 0 : index
    %0 = vector.load %arg1[%c0, %c0_0] : memref<384x196xf32, #tpu.memory_space<vmem>>, vector<384x196xf32>
    %c0_1 = arith.constant 0 : index
    %c0_2 = arith.constant 0 : index
    %1 = vector.load %arg16[%c0_1, %c0_2] : memref<1008x196xf32, #tpu.memory_space<vmem>>, vector<384x196xf32>
    tpu.vector_store %arg16[%c0_1, %c0_2], %0 {strides = array<i32>} : memref<1008x196xf32, #tpu.memory_space<vmem>>, vector<384x196xf32>,
    %c0_3 = arith.constant 0 : index
    %c0_4 = arith.constant 0 : index
    %2 = vector.load %arg2[%c0_3, %c0_4] : memref<48x196xf32, #tpu.memory_space<vmem>>, vector<48x196xf32>
    %c384 = arith.constant 384 : index
    %c0_5 = arith.constant 0 : index
    %3 = vector.load %arg16[%c384, %c0_5] : memref<1008x196xf32, #tpu.memory_space<vmem>>, vector<48x196xf32>
    tpu.vector_store %arg16[%c384, %c0_5], %2 {strides = array<i32>} : memref<1008x196xf32, #tpu.memory_space<vmem>>, vector<48x196xf32>,
    %c0_6 = arith.constant 0 : index
    %c0_7 = arith.constant 0 : index
    %4 = vector.load %arg3[%c0_6, %c0_7] : memref<48x196xf32, #tpu.memory_space<vmem>>, vector<48x196xf32>
    %c432 = arith.constant 432 : index
    %c0_8 = arith.constant 0 : index
    %5 = vector.load %arg16[%c432, %c0_8] : memref<1008x196xf32, #tpu.memory_space<vmem>>, vector<48x196xf32>
    tpu.vector_store %arg16[%c432, %c0_8], %4 {strides = array<i32>} : memref<1008x196xf32, #tpu.memory_space<vmem>>, vector<48x196xf32>,
    %c0_9 = arith.constant 0 : index
    %c0_10 = arith.constant 0 : index
    %6 = vector.load %arg4[%c0_9, %c0_10] : memref<48x196xf32, #tpu.memory_space<vmem>>, vector<48x196xf32>
    %c480 = arith.constant 480 : index
    %c0_11 = arith.constant 0 : index
    %7 = vector.load %arg16[%c480, %c0_11] : memref<1008x196xf32, #tpu.memory_space<vmem>>, vector<48x196xf32>
    tpu.vector_store %arg16[%c480, %c0_11], %6 {strides = array<i32>} : memref<1008x196xf32, #tpu.memory_space<vmem>>, vector<48x196xf32>,
    %c0_12 = arith.constant 0 : index
    %c0_13 = arith.constant 0 : index
    %8 = vector.load %arg5[%c0_12, %c0_13] : memref<48x196xf32, #tpu.memory_space<vmem>>, vector<48x196xf32>
    %c528 = arith.constant 528 : index
    %c0_14 = arith.constant 0 : index
    %9 = vector.load %arg16[%c528, %c0_14] : memref<1008x196xf32, #tpu.memory_space<vmem>>, vector<48x196xf32>
    tpu.vector_store %arg16[%c528, %c0_14], %8 {strides = array<i32>} : memref<1008x196xf32, #tpu.memory_space<vmem>>, vector<48x196xf32>,
    %c0_15 = arith.constant 0 : index
    %c0_16 = arith.constant 0 : index
    %10 = vector.load %arg6[%c0_15, %c0_16] : memref<48x196xf32, #tpu.memory_space<vmem>>, vector<48x196xf32>
    %c576 = arith.constant 576 : index
    %c0_17 = arith.constant 0 : index
    %11 = vector.load %arg16[%c576, %c0_17] : memref<1008x196xf32, #tpu.memory_space<vmem>>, vector<48x196xf32>
    tpu.vector_store %arg16[%c576, %c0_17], %10 {strides = array<i32>} : memref<1008x196xf32, #tpu.memory_space<vmem>>, vector<48x196xf32>,
    %c0_18 = arith.constant 0 : index
    %c0_19 = arith.constant 0 : index
    %12 = vector.load %arg7[%c0_18, %c0_19] : memref<48x196xf32, #tpu.memory_space<vmem>>, vector<48x196xf32>
    %c624 = arith.constant 624 : index
    %c0_20 = arith.constant 0 : index
    %13 = vector.load %arg16[%c624, %c0_20] : memref<1008x196xf32, #tpu.memory_space<vmem>>, vector<48x196xf32>
    tpu.vector_store %arg16[%c624, %c0_20], %12 {strides = array<i32>} : memref<1008x196xf32, #tpu.memory_space<vmem>>, vector<48x196xf32>,
    %c0_21 = arith.constant 0 : index
    %c0_22 = arith.constant 0 : index
    %14 = vector.load %arg8[%c0_21, %c0_22] : memref<48x196xf32, #tpu.memory_space<vmem>>, vector<48x196xf32>
    %c672 = arith.constant 672 : index
    %c0_23 = arith.constant 0 : index
    %15 = vector.load %arg16[%c672, %c0_23] : memref<1008x196xf32, #tpu.memory_space<vmem>>, vector<48x196xf32>
    tpu.vector_store %arg16[%c672, %c0_23], %14 {strides = array<i32>} : memref<1008x196xf32, #tpu.memory_space<vmem>>, vector<48x196xf32>,
    %c0_24 = arith.constant 0 : index
    %c0_25 = arith.constant 0 : index
    %16 = vector.load %arg9[%c0_24, %c0_25] : memref<48x196xf32, #tpu.memory_space<vmem>>, vector<48x196xf32>
    %c720 = arith.constant 720 : index
    %c0_26 = arith.constant 0 : index
    %17 = vector.load %arg16[%c720, %c0_26] : memref<1008x196xf32, #tpu.memory_space<vmem>>, vector<48x196xf32>
    tpu.vector_store %arg16[%c720, %c0_26], %16 {strides = array<i32>} : memref<1008x196xf32, #tpu.memory_space<vmem>>, vector<48x196xf32>,
    %c0_27 = arith.constant 0 : index
    %c0_28 = arith.constant 0 : index
    %18 = vector.load %arg10[%c0_27, %c0_28] : memref<48x196xf32, #tpu.memory_space<vmem>>, vector<48x196xf32>
    %c768 = arith.constant 768 : index
    %c0_29 = arith.constant 0 : index
    %19 = vector.load %arg16[%c768, %c0_29] : memref<1008x196xf32, #tpu.memory_space<vmem>>, vector<48x196xf32>
    tpu.vector_store %arg16[%c768, %c0_29], %18 {strides = array<i32>} : memref<1008x196xf32, #tpu.memory_space<vmem>>, vector<48x196xf32>,
    %c0_30 = arith.constant 0 : index
    %c0_31 = arith.constant 0 : index
    %20 = vector.load %arg11[%c0_30, %c0_31] : memref<48x196xf32, #tpu.memory_space<vmem>>, vector<48x196xf32>
    %c816 = arith.constant 816 : index
    %c0_32 = arith.constant 0 : index
    %21 = vector.load %arg16[%c816, %c0_32] : memref<1008x196xf32, #tpu.memory_space<vmem>>, vector<48x196xf32>
    tpu.vector_store %arg16[%c816, %c0_32], %20 {strides = array<i32>} : memref<1008x196xf32, #tpu.memory_space<vmem>>, vector<48x196xf32>,
    %c0_33 = arith.constant 0 : index
    %c0_34 = arith.constant 0 : index
    %22 = vector.load %arg12[%c0_33, %c0_34] : memref<48x196xf32, #tpu.memory_space<vmem>>, vector<48x196xf32>
    %c864 = arith.constant 864 : index
    %c0_35 = arith.constant 0 : index
    %23 = vector.load %arg16[%c864, %c0_35] : memref<1008x196xf32, #tpu.memory_space<vmem>>, vector<48x196xf32>
    tpu.vector_store %arg16[%c864, %c0_35], %22 {strides = array<i32>} : memref<1008x196xf32, #tpu.memory_space<vmem>>, vector<48x196xf32>,
    %c0_36 = arith.constant 0 : index
    %c0_37 = arith.constant 0 : index
    %24 = vector.load %arg13[%c0_36, %c0_37] : memref<48x196xf32, #tpu.memory_space<vmem>>, vector<48x196xf32>
    %c960 = arith.constant 960 : index
    %c0_38 = arith.constant 0 : index
    %25 = vector.load %arg16[%c960, %c0_38] : memref<1008x196xf32, #tpu.memory_space<vmem>>, vector<48x196xf32>
    tpu.vector_store %arg16[%c960, %c0_38], %24 {strides = array<i32>} : memref<1008x196xf32, #tpu.memory_space<vmem>>, vector<48x196xf32>,
    %cst = arith.constant 0.000000e+00 : f32
    %26 = vector.broadcast %cst : f32 to vector<192x16xf32>
    %c0_39 = arith.constant 0 : index
    %c0_40 = arith.constant 0 : index
    %27 = vector.load %arg17[%c0_39, %c0_40] : memref<192x228xf32, #tpu.memory_space<vmem>>, vector<192x16xf32>
    tpu.vector_store %arg17[%c0_39, %c0_40], %26 {strides = array<i32>} : memref<192x228xf32, #tpu.memory_space<vmem>>, vector<192x16xf32>,
    %cst_41 = arith.constant 0.000000e+00 : f32
    %28 = vector.broadcast %cst_41 : f32 to vector<192x16xf32>
    %c0_42 = arith.constant 0 : index
    %c212 = arith.constant 212 : index
    %29 = vector.load %arg17[%c0_42, %c212] : memref<192x228xf32, #tpu.memory_space<vmem>>, vector<192x16xf32>
    tpu.vector_store %arg17[%c0_42, %c212], %28 {strides = array<i32>} : memref<192x228xf32, #tpu.memory_space<vmem>>, vector<192x16xf32>,
    %c0_43 = arith.constant 0 : index
    %c0_44 = arith.constant 0 : index
    %30 = vector.load %arg14[%c0_43, %c0_44] : memref<192x196xf32, #tpu.memory_space<vmem>>, vector<192x196xf32>
    %c0_45 = arith.constant 0 : index
    %c16 = arith.constant 16 : index
    %31 = vector.load %arg17[%c0_45, %c16] : memref<192x228xf32, #tpu.memory_space<vmem>>, vector<192x196xf32>
    tpu.vector_store %arg17[%c0_45, %c16], %30 {strides = array<i32>} : memref<192x228xf32, #tpu.memory_space<vmem>>, vector<192x196xf32>,
    %32 = tpu.iota {dimensions = array<i32: 1>} : vector<48x196xi32>
    %c14_i32 = arith.constant 14 : i32
    %c0_i32 = arith.constant 0 : i32
    %33 = arith.cmpi eq, %c14_i32, %c0_i32 : i32
    %c1_i32 = arith.constant 1 : i32
    %34 = arith.select %33, %c1_i32, %c14_i32 : i32
    %35 = vector.broadcast %34 : i32 to vector<48x196xi32>
    %36 = arith.remsi %32, %35 : vector<48x196xi32>
    %c0_i32_46 = arith.constant 0 : i32
    %37 = vector.broadcast %c0_i32_46 : i32 to vector<48x196xi32>
    %38 = arith.cmpi ne, %36, %37 : vector<48x196xi32>
    %c0_i32_47 = arith.constant 0 : i32
    %39 = vector.broadcast %c0_i32_47 : i32 to vector<48x196xi32>
    %40 = arith.cmpi slt, %36, %39 : vector<48x196xi32>
    %c0_i32_48 = arith.constant 0 : i32
    %41 = arith.cmpi slt, %34, %c0_i32_48 : i32
    %42 = vector.broadcast %41 : i1 to vector<48x196xi1>
    %43 = vector.broadcast %42 : vector<48x196xi1> to vector<48x196xi1>
    %44 = arith.xori %40, %43 : vector<48x196xi1>
    %45 = arith.andi %44, %38 : vector<48x196xi1>
    %46 = vector.broadcast %34 : i32 to vector<48x196xi32>
    %47 = arith.addi %36, %46 : vector<48x196xi32>
    %48 = arith.select %45, %47, %36 : vector<48x196xi1>, vector<48x196xi32>
    %c1_i32_49 = arith.constant 1 : i32
    %49 = vector.broadcast %c1_i32_49 : i32 to vector<48x196xi32>
    %50 = arith.cmpi sge, %48, %49 : vector<48x196xi32>
    %c12_i32 = arith.constant 12 : i32
    %51 = vector.broadcast %c12_i32 : i32 to vector<48x196xi32>
    %52 = arith.cmpi sle, %48, %51 : vector<48x196xi32>
    %cst_50 = arith.constant 0.000000e+00 : f32
    %53 = vector.broadcast %cst_50 : f32 to vector<48x196xf32>
    %c0_51 = arith.constant 0 : index
    %c0_52 = arith.constant 0 : index
    %c0_53 = arith.constant 0 : index
    %54 = vector.load %arg15[%c0_51, %c0_52, %c0_53] : memref<9x48x192xf32, #tpu.memory_space<vmem>>, vector<1x48x192xf32>
    %55 = vector.shape_cast %54 : vector<1x48x192xf32> to vector<48x192xf32>
    %c0_54 = arith.constant 0 : index
    %c0_55 = arith.constant 0 : index
    %56 = vector.load %arg17[%c0_54, %c0_55] : memref<192x228xf32, #tpu.memory_space<vmem>>, vector<192x228xf32>
    %cst_56 = arith.constant dense<0.000000e+00> : vector<48x228xf32>
    %57 = tpu.matmul %55, %56, %cst_56 {dimension_numbers = #tpu.dot_dimension_numbers<[1], [0], [0], [1], [0, 0, 1, 1], [], []>} : vector<48x192xf32>, vector<192x228xf32>, vector<48x228xf32> -> vector<48x228xf32>
    %58 = vector.extract_strided_slice %57 {offsets = [0, 1], sizes = [48, 196], strides = [1, 1]} : vector<48x228xf32> to vector<48x196xf32>
    %cst_57 = arith.constant 0.000000e+00 : f32
    %59 = vector.broadcast %cst_57 : f32 to vector<48x196xf32>
    %60 = arith.select %50, %58, %59 : vector<48x196xi1>, vector<48x196xf32>
    %61 = arith.addf %53, %60 : vector<48x196xf32>
    %c1 = arith.constant 1 : index
    %c0_58 = arith.constant 0 : index
    %c0_59 = arith.constant 0 : index
    %62 = vector.load %arg15[%c1, %c0_58, %c0_59] : memref<9x48x192xf32, #tpu.memory_space<vmem>>, vector<1x48x192xf32>
    %63 = vector.shape_cast %62 : vector<1x48x192xf32> to vector<48x192xf32>
    %c0_60 = arith.constant 0 : index
    %c0_61 = arith.constant 0 : index
    %64 = vector.load %arg17[%c0_60, %c0_61] : memref<192x228xf32, #tpu.memory_space<vmem>>, vector<192x228xf32>
    %cst_62 = arith.constant dense<0.000000e+00> : vector<48x228xf32>
    %65 = tpu.matmul %63, %64, %cst_62 {dimension_numbers = #tpu.dot_dimension_numbers<[1], [0], [0], [1], [0, 0, 1, 1], [], []>} : vector<48x192xf32>, vector<192x228xf32>, vector<48x228xf32> -> vector<48x228xf32>
    %66 = vector.extract_strided_slice %65 {offsets = [0, 2], sizes = [48, 196], strides = [1, 1]} : vector<48x228xf32> to vector<48x196xf32>
    %67 = arith.addf %61, %66 : vector<48x196xf32>
    %c2 = arith.constant 2 : index
    %c0_63 = arith.constant 0 : index
    %c0_64 = arith.constant 0 : index
    %68 = vector.load %arg15[%c2, %c0_63, %c0_64] : memref<9x48x192xf32, #tpu.memory_space<vmem>>, vector<1x48x192xf32>
    %69 = vector.shape_cast %68 : vector<1x48x192xf32> to vector<48x192xf32>
    %c0_65 = arith.constant 0 : index
    %c0_66 = arith.constant 0 : index
    %70 = vector.load %arg17[%c0_65, %c0_66] : memref<192x228xf32, #tpu.memory_space<vmem>>, vector<192x228xf32>
    %cst_67 = arith.constant dense<0.000000e+00> : vector<48x228xf32>
    %71 = tpu.matmul %69, %70, %cst_67 {dimension_numbers = #tpu.dot_dimension_numbers<[1], [0], [0], [1], [0, 0, 1, 1], [], []>} : vector<48x192xf32>, vector<192x228xf32>, vector<48x228xf32> -> vector<48x228xf32>
    %72 = vector.extract_strided_slice %71 {offsets = [0, 3], sizes = [48, 196], strides = [1, 1]} : vector<48x228xf32> to vector<48x196xf32>
    %cst_68 = arith.constant 0.000000e+00 : f32
    %73 = vector.broadcast %cst_68 : f32 to vector<48x196xf32>
    %74 = arith.select %52, %72, %73 : vector<48x196xi1>, vector<48x196xf32>
    %75 = arith.addf %67, %74 : vector<48x196xf32>
    %c3 = arith.constant 3 : index
    %c0_69 = arith.constant 0 : index
    %c0_70 = arith.constant 0 : index
    %76 = vector.load %arg15[%c3, %c0_69, %c0_70] : memref<9x48x192xf32, #tpu.memory_space<vmem>>, vector<1x48x192xf32>
    %77 = vector.shape_cast %76 : vector<1x48x192xf32> to vector<48x192xf32>
    %c0_71 = arith.constant 0 : index
    %c0_72 = arith.constant 0 : index
    %78 = vector.load %arg17[%c0_71, %c0_72] : memref<192x228xf32, #tpu.memory_space<vmem>>, vector<192x228xf32>
    %cst_73 = arith.constant dense<0.000000e+00> : vector<48x228xf32>
    %79 = tpu.matmul %77, %78, %cst_73 {dimension_numbers = #tpu.dot_dimension_numbers<[1], [0], [0], [1], [0, 0, 1, 1], [], []>} : vector<48x192xf32>, vector<192x228xf32>, vector<48x228xf32> -> vector<48x228xf32>
    %80 = vector.extract_strided_slice %79 {offsets = [0, 15], sizes = [48, 196], strides = [1, 1]} : vector<48x228xf32> to vector<48x196xf32>
    %cst_74 = arith.constant 0.000000e+00 : f32
    %81 = vector.broadcast %cst_74 : f32 to vector<48x196xf32>
    %82 = arith.select %50, %80, %81 : vector<48x196xi1>, vector<48x196xf32>
    %83 = arith.addf %75, %82 : vector<48x196xf32>
    %c4 = arith.constant 4 : index
    %c0_75 = arith.constant 0 : index
    %c0_76 = arith.constant 0 : index
    %84 = vector.load %arg15[%c4, %c0_75, %c0_76] : memref<9x48x192xf32, #tpu.memory_space<vmem>>, vector<1x48x192xf32>
    %85 = vector.shape_cast %84 : vector<1x48x192xf32> to vector<48x192xf32>
    %c0_77 = arith.constant 0 : index
    %c0_78 = arith.constant 0 : index
    %86 = vector.load %arg17[%c0_77, %c0_78] : memref<192x228xf32, #tpu.memory_space<vmem>>, vector<192x228xf32>
    %cst_79 = arith.constant dense<0.000000e+00> : vector<48x228xf32>
    %87 = tpu.matmul %85, %86, %cst_79 {dimension_numbers = #tpu.dot_dimension_numbers<[1], [0], [0], [1], [0, 0, 1, 1], [], []>} : vector<48x192xf32>, vector<192x228xf32>, vector<48x228xf32> -> vector<48x228xf32>
    %88 = vector.extract_strided_slice %87 {offsets = [0, 16], sizes = [48, 196], strides = [1, 1]} : vector<48x228xf32> to vector<48x196xf32>
    %89 = arith.addf %83, %88 : vector<48x196xf32>
    %c5 = arith.constant 5 : index
    %c0_80 = arith.constant 0 : index
    %c0_81 = arith.constant 0 : index
    %90 = vector.load %arg15[%c5, %c0_80, %c0_81] : memref<9x48x192xf32, #tpu.memory_space<vmem>>, vector<1x48x192xf32>
    %91 = vector.shape_cast %90 : vector<1x48x192xf32> to vector<48x192xf32>
    %c0_82 = arith.constant 0 : index
    %c0_83 = arith.constant 0 : index
    %92 = vector.load %arg17[%c0_82, %c0_83] : memref<192x228xf32, #tpu.memory_space<vmem>>, vector<192x228xf32>
    %cst_84 = arith.constant dense<0.000000e+00> : vector<48x228xf32>
    %93 = tpu.matmul %91, %92, %cst_84 {dimension_numbers = #tpu.dot_dimension_numbers<[1], [0], [0], [1], [0, 0, 1, 1], [], []>} : vector<48x192xf32>, vector<192x228xf32>, vector<48x228xf32> -> vector<48x228xf32>
    %94 = vector.extract_strided_slice %93 {offsets = [0, 17], sizes = [48, 196], strides = [1, 1]} : vector<48x228xf32> to vector<48x196xf32>
    %cst_85 = arith.constant 0.000000e+00 : f32
    %95 = vector.broadcast %cst_85 : f32 to vector<48x196xf32>
    %96 = arith.select %52, %94, %95 : vector<48x196xi1>, vector<48x196xf32>
    %97 = arith.addf %89, %96 : vector<48x196xf32>
    %c6 = arith.constant 6 : index
    %c0_86 = arith.constant 0 : index
    %c0_87 = arith.constant 0 : index
    %98 = vector.load %arg15[%c6, %c0_86, %c0_87] : memref<9x48x192xf32, #tpu.memory_space<vmem>>, vector<1x48x192xf32>
    %99 = vector.shape_cast %98 : vector<1x48x192xf32> to vector<48x192xf32>
    %c0_88 = arith.constant 0 : index
    %c0_89 = arith.constant 0 : index
    %100 = vector.load %arg17[%c0_88, %c0_89] : memref<192x228xf32, #tpu.memory_space<vmem>>, vector<192x228xf32>
    %cst_90 = arith.constant dense<0.000000e+00> : vector<48x228xf32>
    %101 = tpu.matmul %99, %100, %cst_90 {dimension_numbers = #tpu.dot_dimension_numbers<[1], [0], [0], [1], [0, 0, 1, 1], [], []>} : vector<48x192xf32>, vector<192x228xf32>, vector<48x228xf32> -> vector<48x228xf32>
    %102 = vector.extract_strided_slice %101 {offsets = [0, 29], sizes = [48, 196], strides = [1, 1]} : vector<48x228xf32> to vector<48x196xf32>
    %cst_91 = arith.constant 0.000000e+00 : f32
    %103 = vector.broadcast %cst_91 : f32 to vector<48x196xf32>
    %104 = arith.select %50, %102, %103 : vector<48x196xi1>, vector<48x196xf32>
    %105 = arith.addf %97, %104 : vector<48x196xf32>
    %c7 = arith.constant 7 : index
    %c0_92 = arith.constant 0 : index
    %c0_93 = arith.constant 0 : index
    %106 = vector.load %arg15[%c7, %c0_92, %c0_93] : memref<9x48x192xf32, #tpu.memory_space<vmem>>, vector<1x48x192xf32>
    %107 = vector.shape_cast %106 : vector<1x48x192xf32> to vector<48x192xf32>
    %c0_94 = arith.constant 0 : index
    %c0_95 = arith.constant 0 : index
    %108 = vector.load %arg17[%c0_94, %c0_95] : memref<192x228xf32, #tpu.memory_space<vmem>>, vector<192x228xf32>
    %cst_96 = arith.constant dense<0.000000e+00> : vector<48x228xf32>
    %109 = tpu.matmul %107, %108, %cst_96 {dimension_numbers = #tpu.dot_dimension_numbers<[1], [0], [0], [1], [0, 0, 1, 1], [], []>} : vector<48x192xf32>, vector<192x228xf32>, vector<48x228xf32> -> vector<48x228xf32>
    %110 = vector.extract_strided_slice %109 {offsets = [0, 30], sizes = [48, 196], strides = [1, 1]} : vector<48x228xf32> to vector<48x196xf32>
    %111 = arith.addf %105, %110 : vector<48x196xf32>
    %c8 = arith.constant 8 : index
    %c0_97 = arith.constant 0 : index
    %c0_98 = arith.constant 0 : index
    %112 = vector.load %arg15[%c8, %c0_97, %c0_98] : memref<9x48x192xf32, #tpu.memory_space<vmem>>, vector<1x48x192xf32>
    %113 = vector.shape_cast %112 : vector<1x48x192xf32> to vector<48x192xf32>
    %c0_99 = arith.constant 0 : index
    %c0_100 = arith.constant 0 : index
    %114 = vector.load %arg17[%c0_99, %c0_100] : memref<192x228xf32, #tpu.memory_space<vmem>>, vector<192x228xf32>
    %cst_101 = arith.constant dense<0.000000e+00> : vector<48x228xf32>
    %115 = tpu.matmul %113, %114, %cst_101 {dimension_numbers = #tpu.dot_dimension_numbers<[1], [0], [0], [1], [0, 0, 1, 1], [], []>} : vector<48x192xf32>, vector<192x228xf32>, vector<48x228xf32> -> vector<48x228xf32>
    %116 = vector.extract_strided_slice %115 {offsets = [0, 31], sizes = [48, 196], strides = [1, 1]} : vector<48x228xf32> to vector<48x196xf32>
    %cst_102 = arith.constant 0.000000e+00 : f32
    %117 = vector.broadcast %cst_102 : f32 to vector<48x196xf32>
    %118 = arith.select %52, %116, %117 : vector<48x196xi1>, vector<48x196xf32>
    %119 = arith.addf %111, %118 : vector<48x196xf32>
    %c912 = arith.constant 912 : index
    %c0_103 = arith.constant 0 : index
    %120 = vector.load %arg16[%c912, %c0_103] : memref<1008x196xf32, #tpu.memory_space<vmem>>, vector<48x196xf32>
    tpu.vector_store %arg16[%c912, %c0_103], %119 {strides = array<i32>} : memref<1008x196xf32, #tpu.memory_space<vmem>>, vector<48x196xf32>,
    return
  }
  func.func @transform_0(%arg0: i32) -> (i32, i32) {
    %c0_i32 = arith.constant 0 : i32
    %c0_i32_0 = arith.constant 0 : i32
    %c0_i32_1 = arith.constant 0 : i32
    return %c0_i32, %c0_i32_0 : i32, i32
  }
  func.func @transform_1(%arg0: i32) -> (i32, i32) {
    %c0_i32 = arith.constant 0 : i32
    %c0_i32_0 = arith.constant 0 : i32
    %c0_i32_1 = arith.constant 0 : i32
    return %c0_i32, %c0_i32_0 : i32, i32
  }
  func.func @transform_2(%arg0: i32) -> (i32, i32) {
    %c0_i32 = arith.constant 0 : i32
    %c0_i32_0 = arith.constant 0 : i32
    %c0_i32_1 = arith.constant 0 : i32
    return %c0_i32, %c0_i32_0 : i32, i32
  }
  func.func @transform_3(%arg0: i32) -> (i32, i32) {
    %c0_i32 = arith.constant 0 : i32
    %c0_i32_0 = arith.constant 0 : i32
    %c0_i32_1 = arith.constant 0 : i32
    return %c0_i32, %c0_i32_0 : i32, i32
  }
  func.func @transform_4(%arg0: i32) -> (i32, i32) {
    %c0_i32 = arith.constant 0 : i32
    %c0_i32_0 = arith.constant 0 : i32
    %c0_i32_1 = arith.constant 0 : i32
    return %c0_i32, %c0_i32_0 : i32, i32
  }
  func.func @transform_5(%arg0: i32) -> (i32, i32) {
    %c0_i32 = arith.constant 0 : i32
    %c0_i32_0 = arith.constant 0 : i32
    %c0_i32_1 = arith.constant 0 : i32
    return %c0_i32, %c0_i32_0 : i32, i32
  }
  func.func @transform_6(%arg0: i32) -> (i32, i32) {
    %c0_i32 = arith.constant 0 : i32
    %c0_i32_0 = arith.constant 0 : i32
    %c0_i32_1 = arith.constant 0 : i32
    return %c0_i32, %c0_i32_0 : i32, i32
  }
  func.func @transform_7(%arg0: i32) -> (i32, i32) {
    %c0_i32 = arith.constant 0 : i32
    %c0_i32_0 = arith.constant 0 : i32
    %c0_i32_1 = arith.constant 0 : i32
    return %c0_i32, %c0_i32_0 : i32, i32
  }
  func.func @transform_8(%arg0: i32) -> (i32, i32) {
    %c0_i32 = arith.constant 0 : i32
    %c0_i32_0 = arith.constant 0 : i32
    %c0_i32_1 = arith.constant 0 : i32
    return %c0_i32, %c0_i32_0 : i32, i32
  }
  func.func @transform_9(%arg0: i32) -> (i32, i32) {
    %c0_i32 = arith.constant 0 : i32
    %c0_i32_0 = arith.constant 0 : i32
    %c0_i32_1 = arith.constant 0 : i32
    return %c0_i32, %c0_i32_0 : i32, i32
  }
  func.func @transform_10(%arg0: i32) -> (i32, i32) {
    %c0_i32 = arith.constant 0 : i32
    %c0_i32_0 = arith.constant 0 : i32
    %c0_i32_1 = arith.constant 0 : i32
    return %c0_i32, %c0_i32_0 : i32, i32
  }
  func.func @transform_11(%arg0: i32) -> (i32, i32) {
    %c0_i32 = arith.constant 0 : i32
    %c0_i32_0 = arith.constant 0 : i32
    %c0_i32_1 = arith.constant 0 : i32
    return %c0_i32, %c0_i32_0 : i32, i32
  }
  func.func @transform_12(%arg0: i32) -> (i32, i32) {
    %c0_i32 = arith.constant 0 : i32
    %c0_i32_0 = arith.constant 0 : i32
    %c0_i32_1 = arith.constant 0 : i32
    return %c0_i32, %c0_i32_0 : i32, i32
  }
  func.func @transform_13(%arg0: i32) -> (i32, i32) {
    %c0_i32 = arith.constant 0 : i32
    %c0_i32_0 = arith.constant 0 : i32
    %c0_i32_1 = arith.constant 0 : i32
    return %c0_i32, %c0_i32_0 : i32, i32
  }
  func.func @transform_14(%arg0: i32) -> (i32, i32, i32) {
    %c0_i32 = arith.constant 0 : i32
    %c0_i32_0 = arith.constant 0 : i32
    %c0_i32_1 = arith.constant 0 : i32
    %c0_i32_2 = arith.constant 0 : i32
    return %c0_i32, %c0_i32_0, %c0_i32_1 : i32, i32, i32
  }
  func.func @transform_15(%arg0: i32) -> (i32, i32) {
    %c0_i32 = arith.constant 0 : i32
    %c0_i32_0 = arith.constant 0 : i32
    %c0_i32_1 = arith.constant 0 : i32
    return %c0_i32, %c0_i32_0 : i32, i32
  }
}

</mosaic_0001>

<bundles_post_ra>
// kernel: forward.1
= control target key start
LH: loop header
LB: loop body
LE: loop exit
PB: predicated region body
PF: predicated region fallthrough
CT: control target
= control target key end

     0   :  { %vm531_vm0 = vcmask 130048   ;;  %vm556_vm1 = vcmask 818848   ;;  %v3129_v2 = vmov 0.0   ;;  %s3130_s22 = smov 16   ;;  %vm1000_vm2 = vcmask 523264   ;;  %s3131_s27 = smov 127   ;;  %s6531_s13 = inlined_call_operand.vmem [shape: f32[192,196], index: 13, kind: input, shape index: {}]   ;;  %s6532_s14 = inlined_call_operand.vmem [shape: f32[9,48,192], index: 14, kind: input, shape index: {}]   ;;  %s6533_s0 = inlined_call_operand.vmem [shape: f32[384,196], index: 0, kind: input, shape index: {}]   ;;  %s6534_s15 = inlined_call_operand.vmem [shape: f32[1008,196], index: 15, kind: output, shape index: {}]   ;;  %s6535_s1 = inlined_call_operand.vmem [shape: f32[48,196], index: 1, kind: input, shape index: {}]   ;;  %s6536_s2 = inlined_call_operand.vmem [shape: f32[48,196], index: 2, kind: input, shape index: {}]   ;;  %s6537_s3 = inlined_call_operand.vmem [shape: f32[48,196], index: 3, kind: input, shape index: {}]   ;;  %s6538_s4 = inlined_call_operand.vmem [shape: f32[48,196], index: 4, kind: input, shape index: {}]   ;;  %s6539_s5 = inlined_call_operand.vmem [shape: f32[48,196], index: 5, kind: input, shape index: {}]   ;;  %s6540_s6 = inlined_call_operand.vmem [shape: f32[48,196], index: 6, kind: input, shape index: {}]   ;;  %s6541_s7 = inlined_call_operand.vmem [shape: f32[48,196], index: 7, kind: input, shape index: {}]   ;;  %s6542_s8 = inlined_call_operand.vmem [shape: f32[48,196], index: 8, kind: input, shape index: {}]   ;;  %s6543_s9 = inlined_call_operand.vmem [shape: f32[48,196], index: 9, kind: input, shape index: {}]   ;;  %s6544_s10 = inlined_call_operand.vmem [shape: f32[48,196], index: 10, kind: input, shape index: {}]   ;;  %s6545_s11 = inlined_call_operand.vmem [shape: f32[48,196], index: 11, kind: input, shape index: {}]   ;;  %s6546_s12 = inlined_call_operand.vmem [shape: f32[48,196], index: 12, kind: input, shape index: {}]  }
   0x1   :  { %v611_v0 = vld [vmem:[%s6531_s13 + $0xf0] sm:$0xff]  ;;  %v609_v1 = vld [vmem:[%s6531_s13 + $0xe0] sm:$0xff]  ;;  %547 = vst.msk [vmem:[#allocation2 + $0xf0] sm:$0xff] %vm531_vm0, %v3129_v2  ;;  %532 = vst.msk [vmem:[#allocation2] sm:$0xff] %vm531_vm0, %v3129_v2  ;;  %vm845_vm3 = vcmask 1047680   ;;  %vm847_vm4 = vcmask 687104  }
   0x2   :  { %533 = vst.msk [vmem:[#allocation2 + $0x10] sm:$0xff] %vm531_vm0, %v3129_v2  ;;  %534 = vst.msk [vmem:[#allocation2 + $0x20] sm:$0xff] %vm531_vm0, %v3129_v2  ;;  %737 = vrot.lane.b32.xlu0 %v611_v0, %s3130_s22  ;;  %733 = vrot.lane.b32.xlu1 %v609_v1, %s3130_s22  ;;  %v612_v3 = vld [vmem:[%s6531_s13 + $0xf8] sm:$0xff]  ;;  %v610_v4 = vld [vmem:[%s6531_s13 + $0xe8] sm:$0xff]  ;;  %s3134_s25 = smov 113   ;;  %s3135_s26 = smov 112  }
   0x3   :  { %535 = vst.msk [vmem:[#allocation2 + $0x30] sm:$0xff] %vm531_vm0, %v3129_v2  ;;  %536 = vst.msk [vmem:[#allocation2 + $0x40] sm:$0xff] %vm531_vm0, %v3129_v2  ;;  %v608_v5 = vld [vmem:[%s6531_s13 + $0xd8] sm:$0xff]  ;;  %v607_v6 = vld [vmem:[%s6531_s13 + $0xd0] sm:$0xff]  ;;  %vm1367_vm11 = vcmask 1031168   ;;  %vm1156_vm14 = vcmask 1039360  }
   0x4   :  { %537 = vst.msk [vmem:[#allocation2 + $0x50] sm:$0xff] %vm531_vm0, %v3129_v2  ;;  %538 = vst.msk [vmem:[#allocation2 + $0x60] sm:$0xff] %vm531_vm0, %v3129_v2  ;;  %v606_v7 = vld [vmem:[%s6531_s13 + $0xc8] sm:$0xff]  ;;  %v605_v8 = vld [vmem:[%s6531_s13 + $0xc0] sm:$0xff]  ;;  %s3138_s28 = smov 99   ;;  %s3139_s29 = smov 98  }
   0x5   :  { %539 = vst.msk [vmem:[#allocation2 + $0x70] sm:$0xff] %vm531_vm0, %v3129_v2  ;;  %540 = vst.msk [vmem:[#allocation2 + $0x80] sm:$0xff] %vm531_vm0, %v3129_v2  ;;  %v604_v9 = vld [vmem:[%s6531_s13 + $0xb8] sm:$0xff]  ;;  %v603_v10 = vld [vmem:[%s6531_s13 + $0xb0] sm:$0xff] }
   0x6   :  { %541 = vst.msk [vmem:[#allocation2 + $0x90] sm:$0xff] %vm531_vm0, %v3129_v2  ;;  %542 = vst.msk [vmem:[#allocation2 + $0xa0] sm:$0xff] %vm531_vm0, %v3129_v2  ;;  %739 = vrot.lane.b32.xlu0 %v612_v3, %s3130_s22  ;;  %735 = vrot.lane.b32.xlu1 %v610_v4, %s3130_s22  ;;  %v602_v11 = vld [vmem:[%s6531_s13 + $0xa8] sm:$0xff]  ;;  %v601_v12 = vld [vmem:[%s6531_s13 + $0xa0] sm:$0xff] }
   0x7   :  { %543 = vst.msk [vmem:[#allocation2 + $0xb0] sm:$0xff] %vm531_vm0, %v3129_v2  ;;  %544 = vst.msk [vmem:[#allocation2 + $0xc0] sm:$0xff] %vm531_vm0, %v3129_v2  ;;  %v600_v13 = vld [vmem:[%s6531_s13 + $0x98] sm:$0xff]  ;;  %v599_v14 = vld [vmem:[%s6531_s13 + $0x90] sm:$0xff] }
   0x8   :  { %545 = vst.msk [vmem:[#allocation2 + $0xd0] sm:$0xff] %vm531_vm0, %v3129_v2  ;;  %546 = vst.msk [vmem:[#allocation2 + $0xe0] sm:$0xff] %vm531_vm0, %v3129_v2  ;;  %v598_v15 = vld [vmem:[%s6531_s13 + $0x88] sm:$0xff]  ;;  %v597_v16 = vld [vmem:[%s6531_s13 + $0x80] sm:$0xff] }
   0x9   :  { %548 = vst.msk [vmem:[#allocation2 + $0x100] sm:$0xff] %vm531_vm0, %v3129_v2  ;;  %549 = vst.msk [vmem:[#allocation2 + $0x110] sm:$0xff] %vm531_vm0, %v3129_v2  ;;  %v596_v17 = vld [vmem:[%s6531_s13 + $0x78] sm:$0xff]  ;;  %v595_v18 = vld [vmem:[%s6531_s13 + $0x70] sm:$0xff] }
   0xa   :  { %550 = vst.msk [vmem:[#allocation2 + $0x120] sm:$0xff] %vm531_vm0, %v3129_v2  ;;  %551 = vst.msk [vmem:[#allocation2 + $0x130] sm:$0xff] %vm531_vm0, %v3129_v2  ;;  %731 = vrot.lane.b32.xlu1 %v608_v5, %s3130_s22  ;;  %729 = vrot.lane.b32.xlu0 %v607_v6, %s3130_s22  ;;  %v594_v19 = vld [vmem:[%s6531_s13 + $0x68] sm:$0xff]  ;;  %v593_v20 = vld [vmem:[%s6531_s13 + $0x60] sm:$0xff] }
   0xb   :  { %552 = vst.msk [vmem:[#allocation2 + $0x140] sm:$0xff] %vm531_vm0, %v3129_v2  ;;  %553 = vst.msk [vmem:[#allocation2 + $0x150] sm:$0xff] %vm531_vm0, %v3129_v2  ;;  %v592_v21 = vld [vmem:[%s6531_s13 + $0x58] sm:$0xff]  ;;  %v591_v22 = vld [vmem:[%s6531_s13 + $0x50] sm:$0xff] }
   0xc   :  { %554 = vst.msk [vmem:[#allocation2 + $0x160] sm:$0xff] %vm531_vm0, %v3129_v2  ;;  %555 = vst.msk [vmem:[#allocation2 + $0x170] sm:$0xff] %vm531_vm0, %v3129_v2  ;;  %v590_v23 = vld [vmem:[%s6531_s13 + $0x48] sm:$0xff]  ;;  %v589_v24 = vld [vmem:[%s6531_s13 + $0x40] sm:$0xff] }
   0xd   :  { %572 = vst.msk [vmem:[#allocation2 + $0xf8] sm:$0xff] %vm556_vm1, %v3129_v2  ;;  %557 = vst.msk [vmem:[#allocation2 + $0x8] sm:$0xff] %vm556_vm1, %v3129_v2  ;;  %v588_v25 = vld [vmem:[%s6531_s13 + $0x38] sm:$0xff]  ;;  %v587_v26 = vld [vmem:[%s6531_s13 + $0x30] sm:$0xff] }
   0xe   :  { %558 = vst.msk [vmem:[#allocation2 + $0x18] sm:$0xff] %vm556_vm1, %v3129_v2  ;;  %559 = vst.msk [vmem:[#allocation2 + $0x28] sm:$0xff] %vm556_vm1, %v3129_v2  ;;  %727 = vrot.lane.b32.xlu1 %v606_v7, %s3130_s22  ;;  %725 = vrot.lane.b32.xlu0 %v605_v8, %s3130_s22  ;;  %v586_v27 = vld [vmem:[%s6531_s13 + $0x28] sm:$0xff]  ;;  %v585_v28 = vld [vmem:[%s6531_s13 + $0x20] sm:$0xff] }
   0xf   :  { %560 = vst.msk [vmem:[#allocation2 + $0x38] sm:$0xff] %vm556_vm1, %v3129_v2  ;;  %561 = vst.msk [vmem:[#allocation2 + $0x48] sm:$0xff] %vm556_vm1, %v3129_v2  ;;  %v584_v29 = vld [vmem:[%s6531_s13 + $0x18] sm:$0xff]  ;;  %v583_v30 = vld [vmem:[%s6531_s13 + $0x10] sm:$0xff] }
  0x10   :  { %562 = vst.msk [vmem:[#allocation2 + $0x58] sm:$0xff] %vm556_vm1, %v3129_v2  ;;  %563 = vst.msk [vmem:[#allocation2 + $0x68] sm:$0xff] %vm556_vm1, %v3129_v2  ;;  %v582_v31 = vld [vmem:[%s6531_s13 + $0x8] sm:$0xff]  ;;  %v581_v32 = vld [vmem:[%s6531_s13] sm:$0xff] }
  0x11   :  { %564 = vst.msk [vmem:[#allocation2 + $0x78] sm:$0xff] %vm556_vm1, %v3129_v2  ;;  %565 = vst.msk [vmem:[#allocation2 + $0x88] sm:$0xff] %vm556_vm1, %v3129_v2  ;;  %v628_v33 = vld [vmem:[%s6531_s13 + $0x178] sm:$0xff]  ;;  %v627_v34 = vld [vmem:[%s6531_s13 + $0x170] sm:$0xff] }
  0x12   :  { %566 = vst.msk [vmem:[#allocation2 + $0x98] sm:$0xff] %vm556_vm1, %v3129_v2  ;;  %567 = vst.msk [vmem:[#allocation2 + $0xa8] sm:$0xff] %vm556_vm1, %v3129_v2  ;;  %723 = vrot.lane.b32.xlu1 %v604_v9, %s3130_s22  ;;  %721 = vrot.lane.b32.xlu0 %v603_v10, %s3130_s22  ;;  %v626_v35 = vld [vmem:[%s6531_s13 + $0x168] sm:$0xff]  ;;  %v625_v36 = vld [vmem:[%s6531_s13 + $0x160] sm:$0xff] }
  0x13   :  { %568 = vst.msk [vmem:[#allocation2 + $0xb8] sm:$0xff] %vm556_vm1, %v3129_v2  ;;  %569 = vst.msk [vmem:[#allocation2 + $0xc8] sm:$0xff] %vm556_vm1, %v3129_v2  ;;  %v624_v37 = vld [vmem:[%s6531_s13 + $0x158] sm:$0xff]  ;;  %v623_v38 = vld [vmem:[%s6531_s13 + $0x150] sm:$0xff] }
  0x14   :  { %570 = vst.msk [vmem:[#allocation2 + $0xd8] sm:$0xff] %vm556_vm1, %v3129_v2  ;;  %571 = vst.msk [vmem:[#allocation2 + $0xe8] sm:$0xff] %vm556_vm1, %v3129_v2  ;;  %v622_v39 = vld [vmem:[%s6531_s13 + $0x148] sm:$0xff]  ;;  %v621_v40 = vld [vmem:[%s6531_s13 + $0x140] sm:$0xff] }
  0x15   :  { %573 = vst.msk [vmem:[#allocation2 + $0x108] sm:$0xff] %vm556_vm1, %v3129_v2  ;;  %574 = vst.msk [vmem:[#allocation2 + $0x118] sm:$0xff] %vm556_vm1, %v3129_v2  ;;  %v620_v41 = vld [vmem:[%s6531_s13 + $0x138] sm:$0xff]  ;;  %v619_v42 = vld [vmem:[%s6531_s13 + $0x130] sm:$0xff] }
  0x16   :  { %575 = vst.msk [vmem:[#allocation2 + $0x128] sm:$0xff] %vm556_vm1, %v3129_v2  ;;  %576 = vst.msk [vmem:[#allocation2 + $0x138] sm:$0xff] %vm556_vm1, %v3129_v2  ;;  %719 = vrot.lane.b32.xlu1 %v602_v11, %s3130_s22  ;;  %717 = vrot.lane.b32.xlu0 %v601_v12, %s3130_s22  ;;  %v618_v43 = vld [vmem:[%s6531_s13 + $0x128] sm:$0xff]  ;;  %v617_v44 = vld [vmem:[%s6531_s13 + $0x120] sm:$0xff] }
  0x17   :  { %577 = vst.msk [vmem:[#allocation2 + $0x148] sm:$0xff] %vm556_vm1, %v3129_v2  ;;  %578 = vst.msk [vmem:[#allocation2 + $0x158] sm:$0xff] %vm556_vm1, %v3129_v2  ;;  %v616_v45 = vld [vmem:[%s6531_s13 + $0x118] sm:$0xff]  ;;  %v615_v46 = vld [vmem:[%s6531_s13 + $0x110] sm:$0xff] }
  0x18   :  { %579 = vst.msk [vmem:[#allocation2 + $0x168] sm:$0xff] %vm556_vm1, %v3129_v2  ;;  %580 = vst.msk [vmem:[#allocation2 + $0x178] sm:$0xff] %vm556_vm1, %v3129_v2  ;;  %v941_v47 = vld [vmem:[%s6532_s14 + $0x8] sm:$0xff]  ;;  %v613_v49 = vld [vmem:[%s6531_s13 + $0x100] sm:$0xff] }
  0x19   :  { %v614_v48 = vld [vmem:[%s6531_s13 + $0x108] sm:$0xff]  ;;  %2867 = vmatprep.mubr.msk.f32.mxu0 %vm1000_vm2, %v941_v47 }
  0x1a   :  { %715 = vrot.lane.b32.xlu1 %v600_v13, %s3130_s22  ;;  %713 = vrot.lane.b32.xlu0 %v599_v14, %s3130_s22  ;;  %v2874_v50 = vld [vmem:[%s6532_s14 + $0x68] sm:$0xff] }
  0x1b   :  { %2885 = vmatprep.mubr.msk.f32.mxu1 %vm1000_vm2, %v2874_v50 }
  0x1e   :  { %711 = vrot.lane.b32.xlu1 %v598_v15, %s3130_s22  ;;  %709 = vrot.lane.b32.xlu0 %v597_v16, %s3130_s22 }
  0x22   :  { %707 = vrot.lane.b32.xlu1 %v596_v17, %s3130_s22  ;;  %705 = vrot.lane.b32.xlu0 %v595_v18, %s3130_s22 }
  0x26   :  { %703 = vrot.lane.b32.xlu1 %v594_v19, %s3130_s22  ;;  %701 = vrot.lane.b32.xlu0 %v593_v20, %s3130_s22 }
  0x2a   :  { %699 = vrot.lane.b32.xlu1 %v592_v21, %s3130_s22  ;;  %697 = vrot.lane.b32.xlu0 %v591_v22, %s3130_s22 }
  0x2e   :  { %695 = vrot.lane.b32.xlu1 %v590_v23, %s3130_s22  ;;  %693 = vrot.lane.b32.xlu0 %v589_v24, %s3130_s22 }
  0x32   :  { %691 = vrot.lane.b32.xlu1 %v588_v25, %s3130_s22  ;;  %689 = vrot.lane.b32.xlu0 %v587_v26, %s3130_s22 }
  0x36   :  { %687 = vrot.lane.b32.xlu1 %v586_v27, %s3130_s22  ;;  %685 = vrot.lane.b32.xlu0 %v585_v28, %s3130_s22 }
  0x3a   :  { %683 = vrot.lane.b32.xlu1 %v584_v29, %s3130_s22  ;;  %681 = vrot.lane.b32.xlu0 %v583_v30, %s3130_s22 }
  0x3e   :  { %679 = vrot.lane.b32.xlu1 %v582_v31, %s3130_s22  ;;  %677 = vrot.lane.b32.xlu0 %v581_v32, %s3130_s22 }
  0x42   :  { %771 = vrot.lane.b32.xlu1 %v628_v33, %s3130_s22  ;;  %769 = vrot.lane.b32.xlu0 %v627_v34, %s3130_s22 }
  0x46   :  { %767 = vrot.lane.b32.xlu1 %v626_v35, %s3130_s22  ;;  %765 = vrot.lane.b32.xlu0 %v625_v36, %s3130_s22 }
  0x4a   :  { %763 = vrot.lane.b32.xlu1 %v624_v37, %s3130_s22  ;;  %761 = vrot.lane.b32.xlu0 %v623_v38, %s3130_s22 }
  0x4e   :  { %759 = vrot.lane.b32.xlu1 %v622_v39, %s3130_s22  ;;  %757 = vrot.lane.b32.xlu0 %v621_v40, %s3130_s22 }
  0x52   :  { %755 = vrot.lane.b32.xlu1 %v620_v41, %s3130_s22  ;;  %753 = vrot.lane.b32.xlu0 %v619_v42, %s3130_s22 }
  0x56   :  { %751 = vrot.lane.b32.xlu1 %v618_v43, %s3130_s22  ;;  %749 = vrot.lane.b32.xlu0 %v617_v44, %s3130_s22 }
  0x5a   :  { %747 = vrot.lane.b32.xlu1 %v616_v45, %s3130_s22  ;;  %745 = vrot.lane.b32.xlu0 %v615_v46, %s3130_s22 }
  0x5e   :  { %743 = vrot.lane.b32.xlu1 %v614_v48, %s3130_s22  ;;  %741 = vrot.lane.b32.xlu0 %v613_v49, %s3130_s22  ;;  %s3132_s22 = smov 126  }
  0x74   :  { %v738_v51 = vpop.permute.xlu0 %737  ;;  %v734_v52 = vpop.permute.xlu1 %733 }
  0x75   :  { %877 = vst.msk [vmem:[#allocation2 + $0xf0] sm:$0xff] %vm845_vm3, %v738_v51  ;;  %875 = vst.msk [vmem:[#allocation2 + $0xe0] sm:$0xff] %vm845_vm3, %v734_v52 }
  0x78   :  { %v740_v53 = vpop.permute.xlu0 %739  ;;  %v736_v54 = vpop.permute.xlu1 %735 }
  0x79   :  { %v788_v55 = vsel %vm531_vm0, %v738_v51, %v740_v53  ;;  %v787_v56 = vsel %vm531_vm0, %v734_v52, %v736_v54 }
  0x7a   :  { %878 = vst.msk [vmem:[#allocation2 + $0xf8] sm:$0xff] %vm847_vm4, %v788_v55  ;;  %876 = vst.msk [vmem:[#allocation2 + $0xe8] sm:$0xff] %vm847_vm4, %v787_v56 }
  0x7c   :  { %v732_v57 = vpop.permute.xlu1 %731  ;;  %v730_v58 = vpop.permute.xlu0 %729  ;;  %v3485_v0 = vld [vmem:[#allocation2 + $0xf0] sm:$0xff]  ;;  %v3493_v4 = vld [vmem:[#allocation2 + $0xe0] sm:$0xff] }
  0x7d   :  { %v786_v59 = vsel %vm531_vm0, %v730_v58, %v732_v57  ;;  %873 = vst.msk [vmem:[#allocation2 + $0xd0] sm:$0xff] %vm845_vm3, %v730_v58 }
  0x7e   :  { %874 = vst.msk [vmem:[#allocation2 + $0xd8] sm:$0xff] %vm847_vm4, %v786_v59 }
  0x80   :  { %v728_v60 = vpop.permute.xlu1 %727  ;;  %v726_v61 = vpop.permute.xlu0 %725 }
  0x81   :  { %v785_v62 = vsel %vm531_vm0, %v726_v61, %v728_v60  ;;  %871 = vst.msk [vmem:[#allocation2 + $0xc0] sm:$0xff] %vm845_vm3, %v726_v61  ;;  %v3480_v63 = vld [vmem:[#allocation2 + $0xf8] sm:$0xff]  ;;  %v3489_v1 = vld [vmem:[#allocation2 + $0xe8] sm:$0xff] }
  0x82   :  { %872 = vst.msk [vmem:[#allocation2 + $0xc8] sm:$0xff] %vm847_vm4, %v785_v62  ;;  %1019 = vmatprep.subr.mxu0 %v3480_v63  ;;  %1230 = vmatprep.subr.mxu1 %v3480_v63 }
  0x83   :  { %1020 = vmatpush1.msra.mxu0 %v3485_v0  ;;  %1231 = vmatpush1.msra.mxu1 %v3485_v0 }
  0x84   :  { %1021 = vmatprep.subr.mxu0 %v3489_v1  ;;  %1232 = vmatprep.subr.mxu1 %v3489_v1  ;;  %v724_v2 = vpop.permute.xlu1 %723  ;;  %v722_v3 = vpop.permute.xlu0 %721  ;;  %v3504_v7 = vld [vmem:[#allocation2 + $0xd0] sm:$0xff] }
  0x85   :  { %v784_v5 = vsel %vm531_vm0, %v722_v3, %v724_v2  ;;  %869 = vst.msk [vmem:[#allocation2 + $0xb0] sm:$0xff] %vm845_vm3, %v722_v3  ;;  %1022 = vmatpush1.msra.mxu0 %v3493_v4  ;;  %1233 = vmatpush1.msra.mxu1 %v3493_v4  ;;  %v3499_v6 = vld [vmem:[#allocation2 + $0xd8] sm:$0xff] }
  0x86   :  { %870 = vst.msk [vmem:[#allocation2 + $0xb8] sm:$0xff] %vm847_vm4, %v784_v5  ;;  %1023 = vmatprep.subr.mxu0 %v3499_v6  ;;  %1234 = vmatprep.subr.mxu1 %v3499_v6 }
  0x87   :  { %1024 = vmatpush1.msra.mxu0 %v3504_v7  ;;  %1235 = vmatpush1.msra.mxu1 %v3504_v7 }
  0x88   :  { %v720_v8 = vpop.permute.xlu1 %719  ;;  %v718_v9 = vpop.permute.xlu0 %717  ;;  %v3515_v12 = vld [vmem:[#allocation2 + $0xc0] sm:$0xff] }
  0x89   :  { %v783_v10 = vsel %vm531_vm0, %v718_v9, %v720_v8  ;;  %867 = vst.msk [vmem:[#allocation2 + $0xa0] sm:$0xff] %vm845_vm3, %v718_v9  ;;  %v3510_v11 = vld [vmem:[#allocation2 + $0xc8] sm:$0xff] }
  0x8a   :  { %868 = vst.msk [vmem:[#allocation2 + $0xa8] sm:$0xff] %vm847_vm4, %v783_v10  ;;  %1025 = vmatprep.subr.mxu0 %v3510_v11  ;;  %1236 = vmatprep.subr.mxu1 %v3510_v11 }
  0x8b   :  { %1026 = vmatpush1.msra.mxu0 %v3515_v12  ;;  %1237 = vmatpush1.msra.mxu1 %v3515_v12 }
  0x8c   :  { %v716_v13 = vpop.permute.xlu1 %715  ;;  %v714_v14 = vpop.permute.xlu0 %713  ;;  %v3526_v17 = vld [vmem:[#allocation2 + $0xb0] sm:$0xff] }
  0x8d   :  { %v782_v15 = vsel %vm531_vm0, %v714_v14, %v716_v13  ;;  %865 = vst.msk [vmem:[#allocation2 + $0x90] sm:$0xff] %vm845_vm3, %v714_v14  ;;  %v3521_v16 = vld [vmem:[#allocation2 + $0xb8] sm:$0xff] }
  0x8e   :  { %866 = vst.msk [vmem:[#allocation2 + $0x98] sm:$0xff] %vm847_vm4, %v782_v15  ;;  %1027 = vmatprep.subr.mxu0 %v3521_v16  ;;  %1238 = vmatprep.subr.mxu1 %v3521_v16 }
  0x8f   :  { %1028 = vmatpush1.msra.mxu0 %v3526_v17  ;;  %1239 = vmatpush1.msra.mxu1 %v3526_v17 }
  0x90   :  { %v712_v18 = vpop.permute.xlu1 %711  ;;  %v710_v19 = vpop.permute.xlu0 %709  ;;  %v3537_v22 = vld [vmem:[#allocation2 + $0xa0] sm:$0xff] }
  0x91   :  { %v781_v20 = vsel %vm531_vm0, %v710_v19, %v712_v18  ;;  %863 = vst.msk [vmem:[#allocation2 + $0x80] sm:$0xff] %vm845_vm3, %v710_v19  ;;  %v3532_v21 = vld [vmem:[#allocation2 + $0xa8] sm:$0xff] }
  0x92   :  { %864 = vst.msk [vmem:[#allocation2 + $0x88] sm:$0xff] %vm847_vm4, %v781_v20  ;;  %1029 = vmatprep.subr.mxu0 %v3532_v21  ;;  %1240 = vmatprep.subr.mxu1 %v3532_v21 }
  0x93   :  { %1030 = vmatpush1.msra.mxu0 %v3537_v22  ;;  %1241 = vmatpush1.msra.mxu1 %v3537_v22 }
  0x94   :  { %v708_v23 = vpop.permute.xlu1 %707  ;;  %v706_v24 = vpop.permute.xlu0 %705  ;;  %v3548_v27 = vld [vmem:[#allocation2 + $0x90] sm:$0xff] }
  0x95   :  { %v780_v25 = vsel %vm531_vm0, %v706_v24, %v708_v23  ;;  %861 = vst.msk [vmem:[#allocation2 + $0x70] sm:$0xff] %vm845_vm3, %v706_v24  ;;  %v3543_v26 = vld [vmem:[#allocation2 + $0x98] sm:$0xff] }
  0x96   :  { %862 = vst.msk [vmem:[#allocation2 + $0x78] sm:$0xff] %vm847_vm4, %v780_v25  ;;  %1031 = vmatprep.subr.mxu0 %v3543_v26  ;;  %1242 = vmatprep.subr.mxu1 %v3543_v26 }
  0x97   :  { %1032 = vmatpush1.msra.mxu0 %v3548_v27  ;;  %1243 = vmatpush1.msra.mxu1 %v3548_v27 }
  0x98   :  { %v704_v28 = vpop.permute.xlu1 %703  ;;  %v702_v29 = vpop.permute.xlu0 %701  ;;  %v3559_v32 = vld [vmem:[#allocation2 + $0x80] sm:$0xff] }
  0x99   :  { %v779_v30 = vsel %vm531_vm0, %v702_v29, %v704_v28  ;;  %859 = vst.msk [vmem:[#allocation2 + $0x60] sm:$0xff] %vm845_vm3, %v702_v29  ;;  %v3554_v31 = vld [vmem:[#allocation2 + $0x88] sm:$0xff] }
  0x9a   :  { %860 = vst.msk [vmem:[#allocation2 + $0x68] sm:$0xff] %vm847_vm4, %v779_v30  ;;  %1033 = vmatprep.subr.mxu0 %v3554_v31  ;;  %1244 = vmatprep.subr.mxu1 %v3554_v31 }
  0x9b   :  { %1034 = vmatpush1.msra.mxu0 %v3559_v32  ;;  %1245 = vmatpush1.msra.mxu1 %v3559_v32 }
  0x9c   :  { %v700_v33 = vpop.permute.xlu1 %699  ;;  %v698_v34 = vpop.permute.xlu0 %697  ;;  %v3570_v37 = vld [vmem:[#allocation2 + $0x70] sm:$0xff] }
  0x9d   :  { %v778_v35 = vsel %vm531_vm0, %v698_v34, %v700_v33  ;;  %857 = vst.msk [vmem:[#allocation2 + $0x50] sm:$0xff] %vm845_vm3, %v698_v34  ;;  %v3565_v36 = vld [vmem:[#allocation2 + $0x78] sm:$0xff] }
  0x9e   :  { %858 = vst.msk [vmem:[#allocation2 + $0x58] sm:$0xff] %vm847_vm4, %v778_v35  ;;  %1035 = vmatprep.subr.mxu0 %v3565_v36  ;;  %1246 = vmatprep.subr.mxu1 %v3565_v36 }
  0x9f   :  { %1036 = vmatpush1.msra.mxu0 %v3570_v37  ;;  %1247 = vmatpush1.msra.mxu1 %v3570_v37 }
  0xa0   :  { %v696_v38 = vpop.permute.xlu1 %695  ;;  %v694_v39 = vpop.permute.xlu0 %693  ;;  %v3581_v42 = vld [vmem:[#allocation2 + $0x60] sm:$0xff] }
  0xa1   :  { %v777_v40 = vsel %vm531_vm0, %v694_v39, %v696_v38  ;;  %855 = vst.msk [vmem:[#allocation2 + $0x40] sm:$0xff] %vm845_vm3, %v694_v39  ;;  %v3576_v41 = vld [vmem:[#allocation2 + $0x68] sm:$0xff] }
  0xa2   :  { %856 = vst.msk [vmem:[#allocation2 + $0x48] sm:$0xff] %vm847_vm4, %v777_v40  ;;  %1037 = vmatprep.subr.mxu0 %v3576_v41  ;;  %1248 = vmatprep.subr.mxu1 %v3576_v41 }
  0xa3   :  { %1038 = vmatpush1.msra.mxu0 %v3581_v42  ;;  %1249 = vmatpush1.msra.mxu1 %v3581_v42 }
  0xa4   :  { %v692_v43 = vpop.permute.xlu1 %691  ;;  %v690_v44 = vpop.permute.xlu0 %689  ;;  %v3592_v47 = vld [vmem:[#allocation2 + $0x50] sm:$0xff] }
  0xa5   :  { %v776_v45 = vsel %vm531_vm0, %v690_v44, %v692_v43  ;;  %853 = vst.msk [vmem:[#allocation2 + $0x30] sm:$0xff] %vm845_vm3, %v690_v44  ;;  %v3587_v46 = vld [vmem:[#allocation2 + $0x58] sm:$0xff] }
  0xa6   :  { %854 = vst.msk [vmem:[#allocation2 + $0x38] sm:$0xff] %vm847_vm4, %v776_v45  ;;  %1039 = vmatprep.subr.mxu0 %v3587_v46  ;;  %1250 = vmatprep.subr.mxu1 %v3587_v46 }
  0xa7   :  { %1040 = vmatpush1.msra.mxu0 %v3592_v47  ;;  %1251 = vmatpush1.msra.mxu1 %v3592_v47 }
  0xa8   :  { %v688_v48 = vpop.permute.xlu1 %687  ;;  %v686_v49 = vpop.permute.xlu0 %685  ;;  %v3603_v52 = vld [vmem:[#allocation2 + $0x40] sm:$0xff] }
  0xa9   :  { %v775_v50 = vsel %vm531_vm0, %v686_v49, %v688_v48  ;;  %851 = vst.msk [vmem:[#allocation2 + $0x20] sm:$0xff] %vm845_vm3, %v686_v49  ;;  %v3598_v51 = vld [vmem:[#allocation2 + $0x48] sm:$0xff] }
  0xaa   :  { %852 = vst.msk [vmem:[#allocation2 + $0x28] sm:$0xff] %vm847_vm4, %v775_v50  ;;  %1041 = vmatprep.subr.mxu0 %v3598_v51  ;;  %1252 = vmatprep.subr.mxu1 %v3598_v51 }
  0xab   :  { %1042 = vmatpush1.msra.mxu0 %v3603_v52  ;;  %1253 = vmatpush1.msra.mxu1 %v3603_v52 }
  0xac   :  { %v684_v53 = vpop.permute.xlu1 %683  ;;  %v682_v54 = vpop.permute.xlu0 %681  ;;  %v3614_v57 = vld [vmem:[#allocation2 + $0x30] sm:$0xff] }
  0xad   :  { %v774_v55 = vsel %vm531_vm0, %v682_v54, %v684_v53  ;;  %849 = vst.msk [vmem:[#allocation2 + $0x10] sm:$0xff] %vm845_vm3, %v682_v54  ;;  %v3609_v56 = vld [vmem:[#allocation2 + $0x38] sm:$0xff] }
  0xae   :  { %850 = vst.msk [vmem:[#allocation2 + $0x18] sm:$0xff] %vm847_vm4, %v774_v55  ;;  %1043 = vmatprep.subr.mxu0 %v3609_v56  ;;  %1254 = vmatprep.subr.mxu1 %v3609_v56 }
  0xaf   :  { %1044 = vmatpush1.msra.mxu0 %v3614_v57  ;;  %1255 = vmatpush1.msra.mxu1 %v3614_v57 }
  0xb0   :  { %v680_v58 = vpop.permute.xlu1 %679  ;;  %v678_v59 = vpop.permute.xlu0 %677  ;;  %v3625_v62 = vld [vmem:[#allocation2 + $0x20] sm:$0xff] }
  0xb1   :  { %v773_v60 = vsel %vm531_vm0, %v678_v59, %v680_v58  ;;  %846 = vst.msk [vmem:[#allocation2] sm:$0xff] %vm845_vm3, %v678_v59  ;;  %v3620_v61 = vld [vmem:[#allocation2 + $0x28] sm:$0xff] }
  0xb2   :  { %848 = vst.msk [vmem:[#allocation2 + $0x8] sm:$0xff] %vm847_vm4, %v773_v60  ;;  %1045 = vmatprep.subr.mxu0 %v3620_v61  ;;  %1256 = vmatprep.subr.mxu1 %v3620_v61 }
  0xb3   :  { %1046 = vmatpush1.msra.mxu0 %v3625_v62  ;;  %1257 = vmatpush1.msra.mxu1 %v3625_v62 }
  0xb4   :  { %v772_v2 = vpop.permute.xlu1 %771  ;;  %v770_v3 = vpop.permute.xlu0 %769  ;;  %v3636_v9 = vld [vmem:[#allocation2 + $0x10] sm:$0xff] }
  0xb5   :  { %v796_v5 = vsel %vm531_vm0, %v770_v3, %v772_v2  ;;  %893 = vst.msk [vmem:[#allocation2 + $0x170] sm:$0xff] %vm845_vm3, %v770_v3  ;;  %v3631_v8 = vld [vmem:[#allocation2 + $0x18] sm:$0xff] }
  0xb6   :  { %894 = vst.msk [vmem:[#allocation2 + $0x178] sm:$0xff] %vm847_vm4, %v796_v5  ;;  %1047 = vmatprep.subr.mxu0 %v3631_v8  ;;  %1258 = vmatprep.subr.mxu1 %v3631_v8 }
  0xb7   :  { %1048 = vmatpush1.msra.mxu0 %v3636_v9  ;;  %1259 = vmatpush1.msra.mxu1 %v3636_v9 }
  0xb8   :  { %v768_v10 = vpop.permute.xlu1 %767  ;;  %v766_v13 = vpop.permute.xlu0 %765  ;;  %v3647_v18 = vld [vmem:[#allocation2] sm:$0xff] }
  0xb9   :  { %v795_v14 = vsel %vm531_vm0, %v766_v13, %v768_v10  ;;  %891 = vst.msk [vmem:[#allocation2 + $0x160] sm:$0xff] %vm845_vm3, %v766_v13  ;;  %v3642_v15 = vld [vmem:[#allocation2 + $0x8] sm:$0xff] }
  0xba   :  { %892 = vst.msk [vmem:[#allocation2 + $0x168] sm:$0xff] %vm847_vm4, %v795_v14  ;;  %1049 = vmatprep.subr.mxu0 %v3642_v15  ;;  %1260 = vmatprep.subr.mxu1 %v3642_v15 }
  0xbb   :  { %1050 = vmatpush1.msra.mxu0 %v3647_v18  ;;  %1261 = vmatpush1.msra.mxu1 %v3647_v18 }
  0xbc   :  { %v764_v19 = vpop.permute.xlu1 %763  ;;  %v762_v20 = vpop.permute.xlu0 %761  ;;  %v3658_v25 = vld [vmem:[#allocation2 + $0x170] sm:$0xff] }
  0xbd   :  { %v794_v23 = vsel %vm531_vm0, %v762_v20, %v764_v19  ;;  %889 = vst.msk [vmem:[#allocation2 + $0x150] sm:$0xff] %vm845_vm3, %v762_v20  ;;  %v3653_v24 = vld [vmem:[#allocation2 + $0x178] sm:$0xff]  ;;  %v940_v20 = vld [vmem:[%s6532_s14] sm:$0xff] }
  0xbe   :  { %890 = vst.msk [vmem:[#allocation2 + $0x158] sm:$0xff] %vm847_vm4, %v794_v23  ;;  %1067 = vmatprep.subr.mxu0 %v3653_v24  ;;  %1278 = vmatprep.subr.mxu1 %v3653_v24 }
  0xbf   :  { %1068 = vmatpush2.msra.mxu0 %v3658_v25  ;;  %1279 = vmatpush2.msra.mxu1 %v3658_v25 }
  0xc0   :  { %v760_v28 = vpop.permute.xlu1 %759  ;;  %v758_v29 = vpop.permute.xlu0 %757  ;;  %v3669_v34 = vld [vmem:[#allocation2 + $0x160] sm:$0xff] }
  0xc1   :  { %v793_v30 = vsel %vm531_vm0, %v758_v29, %v760_v28  ;;  %887 = vst.msk [vmem:[#allocation2 + $0x140] sm:$0xff] %vm845_vm3, %v758_v29  ;;  %v3664_v33 = vld [vmem:[#allocation2 + $0x168] sm:$0xff]  ;;  %v2873_v28 = vld [vmem:[%s6532_s14 + $0x60] sm:$0xff]  ;;  %v943_v29 = vld [vmem:[%s6532_s14 + $0x18] sm:$0xff] }
  0xc2   :  { %888 = vst.msk [vmem:[#allocation2 + $0x148] sm:$0xff] %vm847_vm4, %v793_v30  ;;  %1069 = vmatprep.subr.mxu0 %v3664_v33  ;;  %1280 = vmatprep.subr.mxu1 %v3664_v33  ;;  %v942_v30 = vld [vmem:[%s6532_s14 + $0x10] sm:$0xff] }
  0xc3   :  { %1070 = vmatpush2.msra.mxu0 %v3669_v34  ;;  %1281 = vmatpush2.msra.mxu1 %v3669_v34 }
  0xc4   :  { %v756_v35 = vpop.permute.xlu1 %755  ;;  %v754_v38 = vpop.permute.xlu0 %753  ;;  %v3680_v43 = vld [vmem:[#allocation2 + $0x150] sm:$0xff] }
  0xc5   :  { %v792_v39 = vsel %vm531_vm0, %v754_v38, %v756_v35  ;;  %885 = vst.msk [vmem:[#allocation2 + $0x130] sm:$0xff] %vm845_vm3, %v754_v38  ;;  %v3675_v40 = vld [vmem:[#allocation2 + $0x158] sm:$0xff]  ;;  %v2875_v38 = vld [vmem:[%s6532_s14 + $0x70] sm:$0xff] }
  0xc6   :  { %886 = vst.msk [vmem:[#allocation2 + $0x138] sm:$0xff] %vm847_vm4, %v792_v39  ;;  %1071 = vmatprep.subr.mxu0 %v3675_v40  ;;  %1282 = vmatprep.subr.mxu1 %v3675_v40  ;;  %v2876_v35 = vld [vmem:[%s6532_s14 + $0x78] sm:$0xff]  ;;  %v945_v39 = vld [vmem:[%s6532_s14 + $0x28] sm:$0xff] }
  0xc7   :  { %1072 = vmatpush2.msra.mxu0 %v3680_v43  ;;  %1283 = vmatpush2.msra.mxu1 %v3680_v43 }
  0xc8   :  { %v752_v44 = vpop.permute.xlu1 %751  ;;  %v750_v45 = vpop.permute.xlu0 %749  ;;  %v3691_v50 = vld [vmem:[#allocation2 + $0x140] sm:$0xff] }
  0xc9   :  { %v791_v48 = vsel %vm531_vm0, %v750_v45, %v752_v44  ;;  %883 = vst.msk [vmem:[#allocation2 + $0x120] sm:$0xff] %vm845_vm3, %v750_v45  ;;  %v3686_v49 = vld [vmem:[#allocation2 + $0x148] sm:$0xff]  ;;  %v944_v44 = vld [vmem:[%s6532_s14 + $0x20] sm:$0xff] }
  0xca   :  { %884 = vst.msk [vmem:[#allocation2 + $0x128] sm:$0xff] %vm847_vm4, %v791_v48  ;;  %1073 = vmatprep.subr.mxu0 %v3686_v49  ;;  %1284 = vmatprep.subr.mxu1 %v3686_v49  ;;  %v2878_v45 = vld [vmem:[%s6532_s14 + $0x88] sm:$0xff]  ;;  %v2877_v48 = vld [vmem:[%s6532_s14 + $0x80] sm:$0xff] }
  0xcb   :  { %1074 = vmatpush2.msra.mxu0 %v3691_v50  ;;  %1285 = vmatpush2.msra.mxu1 %v3691_v50 }
  0xcc   :  { %v748_v53 = vpop.permute.xlu1 %747  ;;  %v746_v54 = vpop.permute.xlu0 %745  ;;  %v3702_v59 = vld [vmem:[#allocation2 + $0x130] sm:$0xff] }
  0xcd   :  { %v790_v55 = vsel %vm531_vm0, %v746_v54, %v748_v53  ;;  %881 = vst.msk [vmem:[#allocation2 + $0x110] sm:$0xff] %vm845_vm3, %v746_v54  ;;  %v3697_v58 = vld [vmem:[#allocation2 + $0x138] sm:$0xff]  ;;  %v946_v54 = vld [vmem:[%s6532_s14 + $0x30] sm:$0xff] }
  0xce   :  { %882 = vst.msk [vmem:[#allocation2 + $0x118] sm:$0xff] %vm847_vm4, %v790_v55  ;;  %1075 = vmatprep.subr.mxu0 %v3697_v58  ;;  %1286 = vmatprep.subr.mxu1 %v3697_v58  ;;  %v947_v53 = vld [vmem:[%s6532_s14 + $0x38] sm:$0xff] }
  0xcf   :  { %1076 = vmatpush2.msra.mxu0 %v3702_v59  ;;  %1287 = vmatpush2.msra.mxu1 %v3702_v59  ;;  %v2880_v55 = vld [vmem:[%s6532_s14 + $0x98] sm:$0xff] }
  0xd0   :  { %v744_v60 = vpop.permute.xlu1 %743  ;;  %v742_v2 = vpop.permute.xlu0 %741  ;;  %v3713_v10 = vld [vmem:[#allocation2 + $0x120] sm:$0xff] }
  0xd1   :  { %v789_v3 = vsel %vm531_vm0, %v742_v2, %v744_v60  ;;  %879 = vst.msk [vmem:[#allocation2 + $0x100] sm:$0xff] %vm845_vm3, %v742_v2  ;;  %v3708_v5 = vld [vmem:[#allocation2 + $0x128] sm:$0xff]  ;;  %v2879_v60 = vld [vmem:[%s6532_s14 + $0x90] sm:$0xff] }
  0xd2   :  { %880 = vst.msk [vmem:[#allocation2 + $0x108] sm:$0xff] %vm847_vm4, %v789_v3  ;;  %1077 = vmatprep.subr.mxu0 %v3708_v5  ;;  %1288 = vmatprep.subr.mxu1 %v3708_v5  ;;  %v949_v2 = vld [vmem:[%s6532_s14 + $0x48] sm:$0xff]  ;;  %v948_v3 = vld [vmem:[%s6532_s14 + $0x40] sm:$0xff]  ;;  %vm1777_vm4 = vcmask 924672  }
  0xd3   :  { %1078 = vmatpush2.msra.mxu0 %v3713_v10  ;;  %1289 = vmatpush2.msra.mxu1 %v3713_v10 }
  0xd4   :  { %v3721_v14 = vld [vmem:[#allocation2 + $0x110] sm:$0xff] }
  0xd5   :  { %v3717_v13 = vld [vmem:[#allocation2 + $0x118] sm:$0xff] }
  0xd6   :  { %1079 = vmatprep.subr.mxu0 %v3717_v13  ;;  %1290 = vmatprep.subr.mxu1 %v3717_v13 }
  0xd7   :  { %1080 = vmatpush2.msra.mxu0 %v3721_v14  ;;  %1291 = vmatpush2.msra.mxu1 %v3721_v14 }
  0xd8   :  { %v3732_v23 = vld [vmem:[#allocation2 + $0x100] sm:$0xff] }
  0xd9   :  { %v3725_v19 = vld [vmem:[#allocation2 + $0x108] sm:$0xff] }
  0xda   :  { %1081 = vmatprep.subr.mxu0 %v3725_v19  ;;  %1292 = vmatprep.subr.mxu1 %v3725_v19 }
  0xdb   :  { %1082 = vmatpush2.msra.mxu0 %v3732_v23  ;;  %1293 = vmatpush2.msra.mxu1 %v3732_v23 }
  0xdc   :  { %1084 = vmatmul.mubr.f32.vlgmr.msra.gmra.mxu0 %v940_v20  ;;  %1429 = vmatprep.subr.mxu0 %v3480_v63  ;;  %v2882_v20 = vld [vmem:[%s6532_s14 + $0xa8] sm:$0xff] }
  0xdd   :  { %1640 = vmatprep.subr.mxu1 %v3480_v63  ;;  %1295 = vmatmul.mubr.f32.vlgmr.msra.gmra.mxu1 %v2873_v28  ;;  %v2881_v28 = vld [vmem:[%s6532_s14 + $0xa0] sm:$0xff] }
  0xde   :  { %1430 = vmatpush1.msra.mxu0 %v3485_v0  ;;  %1641 = vmatpush1.msra.mxu1 %v3485_v0 }
  0xdf   :  { %1431 = vmatprep.subr.mxu0 %v3489_v1  ;;  %1642 = vmatprep.subr.mxu1 %v3489_v1 }
  0xe0   :  { %1432 = vmatpush1.msra.mxu0 %v3493_v4  ;;  %1643 = vmatpush1.msra.mxu1 %v3493_v4 }
  0xe1   :  { %1433 = vmatprep.subr.mxu0 %v3499_v6  ;;  %1644 = vmatprep.subr.mxu1 %v3499_v6 }
  0xe2   :  { %2868 = vmatprep.mubr.msk.f32.mxu0 %vm1000_vm2, %v943_v29  ;;  %1434 = vmatpush1.msra.mxu0 %v3504_v7  ;;  %v951_v29 = vld [vmem:[%s6532_s14 + $0x58] sm:$0xff] }
  0xe3   :  { %1645 = vmatpush1.msra.mxu1 %v3504_v7  ;;  %1090 = vmatmul.mubr.f32.gmra.mxu0 %v942_v30  ;;  %v950_v30 = vld [vmem:[%s6532_s14 + $0x50] sm:$0xff] }
  0xe4   :  { %1435 = vmatprep.subr.mxu0 %v3510_v11  ;;  %1646 = vmatprep.subr.mxu1 %v3510_v11 }
  0xe5   :  { %1436 = vmatpush1.msra.mxu0 %v3515_v12  ;;  %1647 = vmatpush1.msra.mxu1 %v3515_v12 }
  0xe6   :  { %1437 = vmatprep.subr.mxu0 %v3521_v16  ;;  %1648 = vmatprep.subr.mxu1 %v3521_v16 }
  0xe7   :  { %2886 = vmatprep.mubr.msk.f32.mxu1 %vm1000_vm2, %v2876_v35  ;;  %1438 = vmatpush1.msra.mxu0 %v3526_v17  ;;  %v2884_v35 = vld [vmem:[%s6532_s14 + $0xb8] sm:$0xff] }
  0xe8   :  { %1649 = vmatpush1.msra.mxu1 %v3526_v17  ;;  %1439 = vmatprep.subr.mxu0 %v3532_v21 }
  0xe9   :  { %1301 = vmatmul.mubr.f32.gmra.mxu1 %v2875_v38  ;;  %1650 = vmatprep.subr.mxu1 %v3532_v21  ;;  %v2883_v38 = vld [vmem:[%s6532_s14 + $0xb0] sm:$0xff] }
  0xea   :  { %1440 = vmatpush1.msra.mxu0 %v3537_v22  ;;  %1651 = vmatpush1.msra.mxu1 %v3537_v22 }
  0xeb   :  { %1441 = vmatprep.subr.mxu0 %v3543_v26  ;;  %1652 = vmatprep.subr.mxu1 %v3543_v26 }
  0xec   :  { %2869 = vmatprep.mubr.msk.f32.mxu0 %vm1000_vm2, %v945_v39  ;;  %1442 = vmatpush1.msra.mxu0 %v3548_v27  ;;  %v2892_v39 = vld [vmem:[%s6532_s14 + $0xc8] sm:$0xff] }
  0xed   :  { %1653 = vmatpush1.msra.mxu1 %v3548_v27  ;;  %1096 = vmatmul.mubr.f32.gmra.mxu0 %v944_v44  ;;  %v2891_v44 = vld [vmem:[%s6532_s14 + $0xc0] sm:$0xff] }
  0xee   :  { %1443 = vmatprep.subr.mxu0 %v3554_v31  ;;  %1654 = vmatprep.subr.mxu1 %v3554_v31 }
  0xef   :  { %1444 = vmatpush1.msra.mxu0 %v3559_v32  ;;  %1655 = vmatpush1.msra.mxu1 %v3559_v32 }
  0xf0   :  { %1445 = vmatprep.subr.mxu0 %v3565_v36  ;;  %1656 = vmatprep.subr.mxu1 %v3565_v36 }
  0xf1   :  { %2887 = vmatprep.mubr.msk.f32.mxu1 %vm1000_vm2, %v2878_v45  ;;  %1446 = vmatpush1.msra.mxu0 %v3570_v37  ;;  %v2910_v45 = vld [vmem:[%s6532_s14 + $0x128] sm:$0xff] }
  0xf2   :  { %1657 = vmatpush1.msra.mxu1 %v3570_v37  ;;  %1447 = vmatprep.subr.mxu0 %v3576_v41 }
  0xf3   :  { %1307 = vmatmul.mubr.f32.gmra.mxu1 %v2877_v48  ;;  %1658 = vmatprep.subr.mxu1 %v3576_v41  ;;  %v2909_v48 = vld [vmem:[%s6532_s14 + $0x120] sm:$0xff] }
  0xf4   :  { %1448 = vmatpush1.msra.mxu0 %v3581_v42  ;;  %1659 = vmatpush1.msra.mxu1 %v3581_v42 }
  0xf5   :  { %1449 = vmatprep.subr.mxu0 %v3587_v46  ;;  %1660 = vmatprep.subr.mxu1 %v3587_v46 }
  0xf6   :  { %2870 = vmatprep.mubr.msk.f32.mxu0 %vm1000_vm2, %v947_v53  ;;  %1450 = vmatpush1.msra.mxu0 %v3592_v47  ;;  %v2894_v53 = vld [vmem:[%s6532_s14 + $0xd8] sm:$0xff] }
  0xf7   :  { %1661 = vmatpush1.msra.mxu1 %v3592_v47  ;;  %1102 = vmatmul.mubr.f32.gmra.mxu0 %v946_v54  ;;  %v2899_v54 = vld [vmem:[%s6532_s14 + $0x100] sm:$0xff] }
  0xf8   :  { %1451 = vmatprep.subr.mxu0 %v3598_v51  ;;  %1662 = vmatprep.subr.mxu1 %v3598_v51 }
  0xf9   :  { %1452 = vmatpush1.msra.mxu0 %v3603_v52  ;;  %1663 = vmatpush1.msra.mxu1 %v3603_v52 }
  0xfa   :  { %1453 = vmatprep.subr.mxu0 %v3609_v56  ;;  %1664 = vmatprep.subr.mxu1 %v3609_v56 }
  0xfb   :  { %2888 = vmatprep.mubr.msk.f32.mxu1 %vm1000_vm2, %v2880_v55  ;;  %1454 = vmatpush1.msra.mxu0 %v3614_v57  ;;  %v2918_v55 = vld [vmem:[%s6532_s14 + $0x168] sm:$0xff] }
  0xfc   :  { %1665 = vmatpush1.msra.mxu1 %v3614_v57  ;;  %1455 = vmatprep.subr.mxu0 %v3620_v61 }
  0xfd   :  { %1313 = vmatmul.mubr.f32.gmra.mxu1 %v2879_v60  ;;  %1666 = vmatprep.subr.mxu1 %v3620_v61  ;;  %v2917_v60 = vld [vmem:[%s6532_s14 + $0x160] sm:$0xff] }
  0xfe   :  { %1456 = vmatpush1.msra.mxu0 %v3625_v62  ;;  %1667 = vmatpush1.msra.mxu1 %v3625_v62 }
  0xff   :  { %1457 = vmatprep.subr.mxu0 %v3631_v8  ;;  %1668 = vmatprep.subr.mxu1 %v3631_v8 }
 0x100   :  { %2871 = vmatprep.mubr.msk.f32.mxu0 %vm1000_vm2, %v949_v2  ;;  %1458 = vmatpush1.msra.mxu0 %v3636_v9  ;;  %v2902_v2 = vld [vmem:[%s6532_s14 + $0x118] sm:$0xff] }
 0x101   :  { %1669 = vmatpush1.msra.mxu1 %v3636_v9  ;;  %1108 = vmatmul.mubr.f32.gmra.mxu0 %v948_v3  ;;  %v2901_v3 = vld [vmem:[%s6532_s14 + $0x110] sm:$0xff] }
 0x102   :  { %1459 = vmatprep.subr.mxu0 %v3642_v15  ;;  %1670 = vmatprep.subr.mxu1 %v3642_v15 }
 0x103   :  { %1460 = vmatpush1.msra.mxu0 %v3647_v18  ;;  %1671 = vmatpush1.msra.mxu1 %v3647_v18 }
 0x104   :  { %1477 = vmatprep.subr.mxu0 %v3653_v24  ;;  %1688 = vmatprep.subr.mxu1 %v3653_v24 }
 0x105   :  { %2889 = vmatprep.mubr.msk.f32.mxu1 %vm1000_vm2, %v2882_v20  ;;  %1478 = vmatpush2.msra.mxu0 %v3658_v25  ;;  %v2920_v20 = vld [vmem:[%s6532_s14 + $0x178] sm:$0xff] }
 0x106   :  { %1689 = vmatpush2.msra.mxu1 %v3658_v25  ;;  %1479 = vmatprep.subr.mxu0 %v3664_v33 }
 0x107   :  { %1319 = vmatmul.mubr.f32.gmra.mxu1 %v2881_v28  ;;  %1690 = vmatprep.subr.mxu1 %v3664_v33  ;;  %v2919_v28 = vld [vmem:[%s6532_s14 + $0x170] sm:$0xff] }
 0x108   :  { %1480 = vmatpush2.msra.mxu0 %v3669_v34  ;;  %1691 = vmatpush2.msra.mxu1 %v3669_v34 }
 0x109   :  { %1481 = vmatprep.subr.mxu0 %v3675_v40  ;;  %1692 = vmatprep.subr.mxu1 %v3675_v40 }
 0x10a   :  { %2872 = vmatprep.mubr.msk.f32.mxu0 %vm1000_vm2, %v951_v29  ;;  %1482 = vmatpush2.msra.mxu0 %v3680_v43  ;;  %v2928_v29 = vld [vmem:[%s6532_s14 + $0x188] sm:$0xff] }
 0x10b   :  { %1693 = vmatpush2.msra.mxu1 %v3680_v43  ;;  %1114 = vmatmul.mubr.f32.gmra.mxu0 %v950_v30  ;;  %v2927_v30 = vld [vmem:[%s6532_s14 + $0x180] sm:$0xff] }
 0x10c   :  { %1483 = vmatprep.subr.mxu0 %v3686_v49  ;;  %1694 = vmatprep.subr.mxu1 %v3686_v49 }
 0x10d   :  { %1484 = vmatpush2.msra.mxu0 %v3691_v50  ;;  %1695 = vmatpush2.msra.mxu1 %v3691_v50 }
 0x10e   :  { %1485 = vmatprep.subr.mxu0 %v3697_v58  ;;  %1696 = vmatprep.subr.mxu1 %v3697_v58 }
 0x10f   :  { %2890 = vmatprep.mubr.msk.f32.mxu1 %vm1000_vm2, %v2884_v35  ;;  %1486 = vmatpush2.msra.mxu0 %v3702_v59  ;;  %v2946_v35 = vld [vmem:[%s6532_s14 + $0x1e8] sm:$0xff] }
 0x110   :  { %1697 = vmatpush2.msra.mxu1 %v3702_v59  ;;  %1487 = vmatprep.subr.mxu0 %v3708_v5 }
 0x111   :  { %1325 = vmatmul.mubr.f32.gmra.mxu1 %v2883_v38  ;;  %1698 = vmatprep.subr.mxu1 %v3708_v5  ;;  %v2945_v38 = vld [vmem:[%s6532_s14 + $0x1e0] sm:$0xff] }
 0x112   :  { %1488 = vmatpush2.msra.mxu0 %v3713_v10  ;;  %1699 = vmatpush2.msra.mxu1 %v3713_v10 }
 0x113   :  { %1489 = vmatprep.subr.mxu0 %v3717_v13  ;;  %1700 = vmatprep.subr.mxu1 %v3717_v13 }
 0x114   :  { %1490 = vmatpush2.msra.mxu0 %v3721_v14  ;;  %1701 = vmatpush2.msra.mxu1 %v3721_v14 }
 0x115   :  { %1491 = vmatprep.subr.mxu0 %v3725_v19  ;;  %1702 = vmatprep.subr.mxu1 %v3725_v19 }
 0x116   :  { %1492 = vmatpush2.msra.mxu0 %v3732_v23  ;;  %2903 = vmatprep.mubr.msk.f32.mxu0 %vm1000_vm2, %v2892_v39  ;;  %v4099_v39 = vld [vmem:[#allocation2 + $0xf8] sm:$0xff] }
 0x117   :  { %1703 = vmatpush2.msra.mxu1 %v3732_v23  ;;  %1494 = vmatmul.mubr.f32.vlgmr.msra.gmra.mxu0 %v2891_v44  ;;  %v4103_v44 = vld [vmem:[#allocation2 + $0xf0] sm:$0xff] }
 0x118   :  { %2921 = vmatprep.mubr.msk.f32.mxu1 %vm1000_vm2, %v2910_v45  ;;  %1851 = vmatprep.subr.mxu0 %v3480_v63  ;;  %v4107_v45 = vld [vmem:[#allocation2 + $0xe8] sm:$0xff] }
 0x119   :  { %2050 = vmatprep.subr.mxu1 %v3480_v63  ;;  %1705 = vmatmul.mubr.f32.vlgmr.msra.gmra.mxu1 %v2909_v48  ;;  %v2893_v63 = vld [vmem:[%s6532_s14 + $0xd0] sm:$0xff]  ;;  %v2930_v48 = vld [vmem:[%s6532_s14 + $0x198] sm:$0xff] }
 0x11a   :  { %1852 = vmatpush1.msra.mxu0 %v3485_v0  ;;  %2051 = vmatpush1.msra.mxu1 %v3485_v0  ;;  %v2912_v0 = vld [vmem:[%s6532_s14 + $0x138] sm:$0xff] }
 0x11b   :  { %1853 = vmatprep.subr.mxu0 %v3489_v1  ;;  %2052 = vmatprep.subr.mxu1 %v3489_v1  ;;  %v2911_v1 = vld [vmem:[%s6532_s14 + $0x130] sm:$0xff] }
 0x11c   :  { %1854 = vmatpush1.msra.mxu0 %v3493_v4  ;;  %2053 = vmatpush1.msra.mxu1 %v3493_v4  ;;  %v2896_v4 = vld [vmem:[%s6532_s14 + $0xe8] sm:$0xff] }
 0x11d   :  { %1855 = vmatprep.subr.mxu0 %v3499_v6  ;;  %2054 = vmatprep.subr.mxu1 %v3499_v6  ;;  %v2895_v6 = vld [vmem:[%s6532_s14 + $0xe0] sm:$0xff] }
 0x11e   :  { %2904 = vmatprep.mubr.msk.f32.mxu0 %vm1000_vm2, %v2894_v53  ;;  %1856 = vmatpush1.msra.mxu0 %v3504_v7  ;;  %v4114_v53 = vld [vmem:[#allocation2 + $0xe0] sm:$0xff] }
 0x11f   :  { %2055 = vmatpush1.msra.mxu1 %v3504_v7  ;;  %1500 = vmatmul.mubr.f32.gmra.mxu0 %v2893_v63  ;;  %v2914_v7 = vld [vmem:[%s6532_s14 + $0x148] sm:$0xff]  ;;  %v2929_v63 = vld [vmem:[%s6532_s14 + $0x190] sm:$0xff] }
 0x120   :  { %1857 = vmatprep.subr.mxu0 %v3510_v11  ;;  %2056 = vmatprep.subr.mxu1 %v3510_v11  ;;  %v2913_v11 = vld [vmem:[%s6532_s14 + $0x140] sm:$0xff] }
 0x121   :  { %1858 = vmatpush1.msra.mxu0 %v3515_v12  ;;  %2057 = vmatpush1.msra.mxu1 %v3515_v12  ;;  %v2898_v12 = vld [vmem:[%s6532_s14 + $0xf8] sm:$0xff] }
 0x122   :  { %1859 = vmatprep.subr.mxu0 %v3521_v16  ;;  %2058 = vmatprep.subr.mxu1 %v3521_v16  ;;  %v2897_v16 = vld [vmem:[%s6532_s14 + $0xf0] sm:$0xff] }
 0x123   :  { %2922 = vmatprep.mubr.msk.f32.mxu1 %vm1000_vm2, %v2912_v0  ;;  %1860 = vmatpush1.msra.mxu0 %v3526_v17  ;;  %v4121_v0 = vld [vmem:[#allocation2 + $0xd8] sm:$0xff] }
 0x124   :  { %2059 = vmatpush1.msra.mxu1 %v3526_v17  ;;  %1861 = vmatprep.subr.mxu0 %v3532_v21  ;;  %v2916_v17 = vld [vmem:[%s6532_s14 + $0x158] sm:$0xff] }
 0x125   :  { %1711 = vmatmul.mubr.f32.gmra.mxu1 %v2911_v1  ;;  %2060 = vmatprep.subr.mxu1 %v3532_v21  ;;  %v2915_v21 = vld [vmem:[%s6532_s14 + $0x150] sm:$0xff] }
 0x126   :  { %1862 = vmatpush1.msra.mxu0 %v3537_v22  ;;  %2061 = vmatpush1.msra.mxu1 %v3537_v22  ;;  %v2900_v22 = vld [vmem:[%s6532_s14 + $0x108] sm:$0xff]  ;;  %v4126_v1 = vld [vmem:[#allocation2 + $0xd0] sm:$0xff] }
 0x127   :  { %1863 = vmatprep.subr.mxu0 %v3543_v26  ;;  %2062 = vmatprep.subr.mxu1 %v3543_v26 }
 0x128   :  { %2905 = vmatprep.mubr.msk.f32.mxu0 %vm1000_vm2, %v2896_v4  ;;  %1864 = vmatpush1.msra.mxu0 %v3548_v27  ;;  %v4130_v4 = vld [vmem:[#allocation2 + $0xc8] sm:$0xff] }
 0x129   :  { %2063 = vmatpush1.msra.mxu1 %v3548_v27  ;;  %1506 = vmatmul.mubr.f32.gmra.mxu0 %v2895_v6  ;;  %v2948_v6 = vld [vmem:[%s6532_s14 + $0x1f8] sm:$0xff] }
 0x12a   :  { %1865 = vmatprep.subr.mxu0 %v3554_v31  ;;  %2064 = vmatprep.subr.mxu1 %v3554_v31 }
 0x12b   :  { %1866 = vmatpush1.msra.mxu0 %v3559_v32  ;;  %2065 = vmatpush1.msra.mxu1 %v3559_v32 }
 0x12c   :  { %1867 = vmatprep.subr.mxu0 %v3565_v36  ;;  %2066 = vmatprep.subr.mxu1 %v3565_v36 }
 0x12d   :  { %2923 = vmatprep.mubr.msk.f32.mxu1 %vm1000_vm2, %v2914_v7  ;;  %1868 = vmatpush1.msra.mxu0 %v3570_v37  ;;  %v4137_v7 = vld [vmem:[#allocation2 + $0xc0] sm:$0xff] }
 0x12e   :  { %2067 = vmatpush1.msra.mxu1 %v3570_v37  ;;  %1869 = vmatprep.subr.mxu0 %v3576_v41 }
 0x12f   :  { %1717 = vmatmul.mubr.f32.gmra.mxu1 %v2913_v11  ;;  %2068 = vmatprep.subr.mxu1 %v3576_v41  ;;  %v4141_v11 = vld [vmem:[#allocation2 + $0xb8] sm:$0xff] }
 0x130   :  { %1870 = vmatpush1.msra.mxu0 %v3581_v42  ;;  %2069 = vmatpush1.msra.mxu1 %v3581_v42 }
 0x131   :  { %1871 = vmatprep.subr.mxu0 %v3587_v46  ;;  %2070 = vmatprep.subr.mxu1 %v3587_v46 }
 0x132   :  { %2906 = vmatprep.mubr.msk.f32.mxu0 %vm1000_vm2, %v2898_v12  ;;  %1872 = vmatpush1.msra.mxu0 %v3592_v47  ;;  %v2947_v12 = vld [vmem:[%s6532_s14 + $0x1f0] sm:$0xff] }
 0x133   :  { %2071 = vmatpush1.msra.mxu1 %v3592_v47  ;;  %1512 = vmatmul.mubr.f32.gmra.mxu0 %v2897_v16  ;;  %v4149_v16 = vld [vmem:[#allocation2 + $0xb0] sm:$0xff] }
 0x134   :  { %1873 = vmatprep.subr.mxu0 %v3598_v51  ;;  %2072 = vmatprep.subr.mxu1 %v3598_v51 }
 0x135   :  { %1874 = vmatpush1.msra.mxu0 %v3603_v52  ;;  %2073 = vmatpush1.msra.mxu1 %v3603_v52 }
 0x136   :  { %1875 = vmatprep.subr.mxu0 %v3609_v56  ;;  %2074 = vmatprep.subr.mxu1 %v3609_v56 }
 0x137   :  { %2924 = vmatprep.mubr.msk.f32.mxu1 %vm1000_vm2, %v2916_v17  ;;  %1876 = vmatpush1.msra.mxu0 %v3614_v57  ;;  %v4153_v17 = vld [vmem:[#allocation2 + $0xa8] sm:$0xff] }
 0x138   :  { %2075 = vmatpush1.msra.mxu1 %v3614_v57  ;;  %1877 = vmatprep.subr.mxu0 %v3620_v61 }
 0x139   :  { %1723 = vmatmul.mubr.f32.gmra.mxu1 %v2915_v21  ;;  %2076 = vmatprep.subr.mxu1 %v3620_v61  ;;  %v2932_v21 = vld [vmem:[%s6532_s14 + $0x1a8] sm:$0xff] }
 0x13a   :  { %1878 = vmatpush1.msra.mxu0 %v3625_v62  ;;  %2077 = vmatpush1.msra.mxu1 %v3625_v62 }
 0x13b   :  { %1879 = vmatprep.subr.mxu0 %v3631_v8  ;;  %2078 = vmatprep.subr.mxu1 %v3631_v8 }
 0x13c   :  { %2907 = vmatprep.mubr.msk.f32.mxu0 %vm1000_vm2, %v2900_v22  ;;  %1880 = vmatpush1.msra.mxu0 %v3636_v9  ;;  %v4160_v22 = vld [vmem:[#allocation2 + $0xa0] sm:$0xff] }
 0x13d   :  { %2079 = vmatpush1.msra.mxu1 %v3636_v9  ;;  %1518 = vmatmul.mubr.f32.gmra.mxu0 %v2899_v54  ;;  %v2931_v54 = vld [vmem:[%s6532_s14 + $0x1a0] sm:$0xff] }
 0x13e   :  { %1881 = vmatprep.subr.mxu0 %v3642_v15  ;;  %2080 = vmatprep.subr.mxu1 %v3642_v15 }
 0x13f   :  { %1882 = vmatpush1.msra.mxu0 %v3647_v18  ;;  %2081 = vmatpush1.msra.mxu1 %v3647_v18 }
 0x140   :  { %1899 = vmatprep.subr.mxu0 %v3653_v24  ;;  %2098 = vmatprep.subr.mxu1 %v3653_v24 }
 0x141   :  { %2925 = vmatprep.mubr.msk.f32.mxu1 %vm1000_vm2, %v2918_v55  ;;  %1900 = vmatpush2.msra.mxu0 %v3658_v25  ;;  %v2950_v55 = vld [vmem:[%s6532_s14 + $0x208] sm:$0xff] }
 0x142   :  { %2099 = vmatpush2.msra.mxu1 %v3658_v25  ;;  %1901 = vmatprep.subr.mxu0 %v3664_v33 }
 0x143   :  { %1729 = vmatmul.mubr.f32.gmra.mxu1 %v2917_v60  ;;  %2100 = vmatprep.subr.mxu1 %v3664_v33  ;;  %v3102_v60 = vld [vmem:[#allocation2 + $0x50] sm:$0xff] }
 0x144   :  { %1902 = vmatpush2.msra.mxu0 %v3669_v34  ;;  %2101 = vmatpush2.msra.mxu1 %v3669_v34 }
 0x145   :  { %1903 = vmatprep.subr.mxu0 %v3675_v40  ;;  %2102 = vmatprep.subr.mxu1 %v3675_v40 }
 0x146   :  { %2908 = vmatprep.mubr.msk.f32.mxu0 %vm1000_vm2, %v2902_v2  ;;  %1904 = vmatpush2.msra.mxu0 %v3680_v43  ;;  %v3103_v2 = vld [vmem:[#allocation2 + $0x48] sm:$0xff] }
 0x147   :  { %2103 = vmatpush2.msra.mxu1 %v3680_v43  ;;  %1524 = vmatmul.mubr.f32.gmra.mxu0 %v2901_v3  ;;  %v2988_v3 = vld [vmem:[%s6532_s14 + $0x2d8] sm:$0xff] }
 0x148   :  { %1905 = vmatprep.subr.mxu0 %v3686_v49  ;;  %2104 = vmatprep.subr.mxu1 %v3686_v49 }
 0x149   :  { %1906 = vmatpush2.msra.mxu0 %v3691_v50  ;;  %2105 = vmatpush2.msra.mxu1 %v3691_v50 }
 0x14a   :  { %1907 = vmatprep.subr.mxu0 %v3697_v58  ;;  %2106 = vmatprep.subr.mxu1 %v3697_v58 }
 0x14b   :  { %2926 = vmatprep.mubr.msk.f32.mxu1 %vm1000_vm2, %v2920_v20  ;;  %1908 = vmatpush2.msra.mxu0 %v3702_v59  ;;  %v3104_v20 = vld [vmem:[#allocation2 + $0x40] sm:$0xff] }
 0x14c   :  { %2107 = vmatpush2.msra.mxu1 %v3702_v59  ;;  %1909 = vmatprep.subr.mxu0 %v3708_v5 }
 0x14d   :  { %1735 = vmatmul.mubr.f32.gmra.mxu1 %v2919_v28  ;;  %2108 = vmatprep.subr.mxu1 %v3708_v5  ;;  %v3105_v28 = vld [vmem:[#allocation2 + $0x38] sm:$0xff] }
 0x14e   :  { %1910 = vmatpush2.msra.mxu0 %v3713_v10  ;;  %2109 = vmatpush2.msra.mxu1 %v3713_v10 }
 0x14f   :  { %1911 = vmatprep.subr.mxu0 %v3717_v13  ;;  %2110 = vmatprep.subr.mxu1 %v3717_v13 }
 0x150   :  { %1912 = vmatpush2.msra.mxu0 %v3721_v14  ;;  %2111 = vmatpush2.msra.mxu1 %v3721_v14 }
 0x151   :  { %1913 = vmatprep.subr.mxu0 %v3725_v19  ;;  %2112 = vmatprep.subr.mxu1 %v3725_v19 }
 0x152   :  { %1914 = vmatpush2.msra.mxu0 %v3732_v23  ;;  %2939 = vmatprep.mubr.msk.f32.mxu0 %vm1000_vm2, %v2928_v29  ;;  %v2987_v29 = vld [vmem:[%s6532_s14 + $0x2d0] sm:$0xff] }
 0x153   :  { %2113 = vmatpush2.msra.mxu1 %v3732_v23  ;;  %1916 = vmatmul.mubr.f32.vlgmr.msra.gmra.mxu0 %v2927_v30  ;;  %v3106_v30 = vld [vmem:[#allocation2 + $0x30] sm:$0xff] }
 0x154   :  { %2957 = vmatprep.mubr.msk.f32.mxu1 %vm1000_vm2, %v2946_v35  ;;  %2261 = vmatprep.subr.mxu0 %v4099_v39  ;;  %v3107_v35 = vld [vmem:[#allocation2 + $0x28] sm:$0xff] }
 0x155   :  { %2472 = vmatprep.subr.mxu1 %v4099_v39  ;;  %2115 = vmatmul.mubr.f32.vlgmr.msra.gmra.mxu1 %v2945_v38  ;;  %v2972_v38 = vld [vmem:[%s6532_s14 + $0x288] sm:$0xff] }
 0x156   :  { %2262 = vmatpush1.msra.mxu0 %v4103_v44  ;;  %2473 = vmatpush1.msra.mxu1 %v4103_v44 }
 0x157   :  { %2263 = vmatprep.subr.mxu0 %v4107_v45  ;;  %2474 = vmatprep.subr.mxu1 %v4107_v45 }
 0x158   :  { %2264 = vmatpush1.msra.mxu0 %v4114_v53  ;;  %2475 = vmatpush1.msra.mxu1 %v4114_v53 }
 0x159   :  { %2265 = vmatprep.subr.mxu0 %v4121_v0  ;;  %2476 = vmatprep.subr.mxu1 %v4121_v0 }
 0x15a   :  { %2940 = vmatprep.mubr.msk.f32.mxu0 %vm1000_vm2, %v2930_v48  ;;  %2266 = vmatpush1.msra.mxu0 %v4126_v1  ;;  %v3110_v48 = vld [vmem:[#allocation2 + $0x10] sm:$0xff] }
 0x15b   :  { %2477 = vmatpush1.msra.mxu1 %v4126_v1  ;;  %1922 = vmatmul.mubr.f32.gmra.mxu0 %v2929_v63  ;;  %v2990_v63 = vld [vmem:[%s6532_s14 + $0x2e8] sm:$0xff] }
 0x15c   :  { %2267 = vmatprep.subr.mxu0 %v4130_v4  ;;  %2478 = vmatprep.subr.mxu1 %v4130_v4 }
 0x15d   :  { %2268 = vmatpush1.msra.mxu0 %v4137_v7  ;;  %2479 = vmatpush1.msra.mxu1 %v4137_v7 }
 0x15e   :  { %2269 = vmatprep.subr.mxu0 %v4141_v11  ;;  %2480 = vmatprep.subr.mxu1 %v4141_v11 }
 0x15f   :  { %2958 = vmatprep.mubr.msk.f32.mxu1 %vm1000_vm2, %v2948_v6  ;;  %2270 = vmatpush1.msra.mxu0 %v4149_v16  ;;  %v3114_v6 = vld [vmem:[#allocation2 + $0x170] sm:$0xff] }
 0x160   :  { %2481 = vmatpush1.msra.mxu1 %v4149_v16  ;;  %2271 = vmatprep.subr.mxu0 %v4153_v17 }
 0x161   :  { %2121 = vmatmul.mubr.f32.gmra.mxu1 %v2947_v12  ;;  %2482 = vmatprep.subr.mxu1 %v4153_v17  ;;  %v3116_v12 = vld [vmem:[#allocation2 + $0x160] sm:$0xff] }
 0x162   :  { %2272 = vmatpush1.msra.mxu0 %v4160_v22  ;;  %2483 = vmatpush1.msra.mxu1 %v4160_v22 }
 0x163   :  { %2273 = vmatprep.subr.mxu0 %v3543_v26  ;;  %2484 = vmatprep.subr.mxu1 %v3543_v26  ;;  %v2949_v26 = vld [vmem:[%s6532_s14 + $0x200] sm:$0xff] }
 0x164   :  { %2941 = vmatprep.mubr.msk.f32.mxu0 %vm1000_vm2, %v2932_v21  ;;  %2274 = vmatpush1.msra.mxu0 %v3548_v27  ;;  %v3118_v21 = vld [vmem:[#allocation2 + $0x150] sm:$0xff] }
 0x165   :  { %2485 = vmatpush1.msra.mxu1 %v3548_v27  ;;  %1928 = vmatmul.mubr.f32.gmra.mxu0 %v2931_v54  ;;  %v2934_v27 = vld [vmem:[%s6532_s14 + $0x1b8] sm:$0xff] }
 0x166   :  { %2275 = vmatprep.subr.mxu0 %v3554_v31  ;;  %2486 = vmatprep.subr.mxu1 %v3554_v31  ;;  %v2933_v31 = vld [vmem:[%s6532_s14 + $0x1b0] sm:$0xff]  ;;  %v2992_v54 = vld [vmem:[%s6532_s14 + $0x2f8] sm:$0xff] }
 0x167   :  { %2276 = vmatpush1.msra.mxu0 %v3559_v32  ;;  %2487 = vmatpush1.msra.mxu1 %v3559_v32  ;;  %v2952_v32 = vld [vmem:[%s6532_s14 + $0x218] sm:$0xff] }
 0x168   :  { %2277 = vmatprep.subr.mxu0 %v3565_v36  ;;  %2488 = vmatprep.subr.mxu1 %v3565_v36  ;;  %v2951_v36 = vld [vmem:[%s6532_s14 + $0x210] sm:$0xff] }
 0x169   :  { %2959 = vmatprep.mubr.msk.f32.mxu1 %vm1000_vm2, %v2950_v55  ;;  %2278 = vmatpush1.msra.mxu0 %v3570_v37  ;;  %v3120_v55 = vld [vmem:[#allocation2 + $0x140] sm:$0xff] }
 0x16a   :  { %2489 = vmatpush1.msra.mxu1 %v3570_v37  ;;  %2279 = vmatprep.subr.mxu0 %v3576_v41  ;;  %v2936_v37 = vld [vmem:[%s6532_s14 + $0x1c8] sm:$0xff] }
 0x16b   :  { %2127 = vmatmul.mubr.f32.gmra.mxu1 %v2949_v26  ;;  %2490 = vmatprep.subr.mxu1 %v3576_v41  ;;  %v2935_v41 = vld [vmem:[%s6532_s14 + $0x1c0] sm:$0xff]  ;;  %v3121_v26 = vld [vmem:[#allocation2 + $0x138] sm:$0xff] }
 0x16c   :  { %2280 = vmatpush1.msra.mxu0 %v3581_v42  ;;  %2491 = vmatpush1.msra.mxu1 %v3581_v42  ;;  %v2954_v42 = vld [vmem:[%s6532_s14 + $0x228] sm:$0xff] }
 0x16d   :  { %2281 = vmatprep.subr.mxu0 %v3587_v46  ;;  %2492 = vmatprep.subr.mxu1 %v3587_v46  ;;  %v2953_v46 = vld [vmem:[%s6532_s14 + $0x220] sm:$0xff] }
 0x16e   :  { %2942 = vmatprep.mubr.msk.f32.mxu0 %vm1000_vm2, %v2934_v27  ;;  %2282 = vmatpush1.msra.mxu0 %v3592_v47  ;;  %v2991_v27 = vld [vmem:[%s6532_s14 + $0x2f0] sm:$0xff] }
 0x16f   :  { %2493 = vmatpush1.msra.mxu1 %v3592_v47  ;;  %1934 = vmatmul.mubr.f32.gmra.mxu0 %v2933_v31  ;;  %v2938_v47 = vld [vmem:[%s6532_s14 + $0x1d8] sm:$0xff]  ;;  %v3122_v31 = vld [vmem:[#allocation2 + $0x130] sm:$0xff] }
 0x170   :  { %2283 = vmatprep.subr.mxu0 %v3598_v51  ;;  %2494 = vmatprep.subr.mxu1 %v3598_v51  ;;  %v2937_v51 = vld [vmem:[%s6532_s14 + $0x1d0] sm:$0xff] }
 0x171   :  { %2284 = vmatpush1.msra.mxu0 %v3603_v52  ;;  %2495 = vmatpush1.msra.mxu1 %v3603_v52  ;;  %v2956_v52 = vld [vmem:[%s6532_s14 + $0x238] sm:$0xff] }
 0x172   :  { %2285 = vmatprep.subr.mxu0 %v3609_v56  ;;  %2496 = vmatprep.subr.mxu1 %v3609_v56  ;;  %v2955_v56 = vld [vmem:[%s6532_s14 + $0x230] sm:$0xff] }
 0x173   :  { %2960 = vmatprep.mubr.msk.f32.mxu1 %vm1000_vm2, %v2952_v32  ;;  %2286 = vmatpush1.msra.mxu0 %v3614_v57  ;;  %v3123_v32 = vld [vmem:[#allocation2 + $0x128] sm:$0xff] }
 0x174   :  { %2497 = vmatpush1.msra.mxu1 %v3614_v57  ;;  %2287 = vmatprep.subr.mxu0 %v3620_v61  ;;  %v2964_v57 = vld [vmem:[%s6532_s14 + $0x248] sm:$0xff] }
 0x175   :  { %2133 = vmatmul.mubr.f32.gmra.mxu1 %v2951_v36  ;;  %2498 = vmatprep.subr.mxu1 %v3620_v61  ;;  %v2963_v61 = vld [vmem:[%s6532_s14 + $0x240] sm:$0xff] }
 0x176   :  { %2288 = vmatpush1.msra.mxu0 %v3625_v62  ;;  %2499 = vmatpush1.msra.mxu1 %v3625_v62  ;;  %v2982_v62 = vld [vmem:[%s6532_s14 + $0x2a8] sm:$0xff]  ;;  %v3124_v36 = vld [vmem:[#allocation2 + $0x120] sm:$0xff] }
 0x177   :  { %2289 = vmatprep.subr.mxu0 %v3631_v8  ;;  %2500 = vmatprep.subr.mxu1 %v3631_v8  ;;  %v2981_v8 = vld [vmem:[%s6532_s14 + $0x2a0] sm:$0xff] }
 0x178   :  { %2943 = vmatprep.mubr.msk.f32.mxu0 %vm1000_vm2, %v2936_v37  ;;  %2290 = vmatpush1.msra.mxu0 %v3636_v9 }
 0x179   :  { %2501 = vmatpush1.msra.mxu1 %v3636_v9  ;;  %1940 = vmatmul.mubr.f32.gmra.mxu0 %v2935_v41  ;;  %v2966_v9 = vld [vmem:[%s6532_s14 + $0x258] sm:$0xff] }
 0x17a   :  { %2291 = vmatprep.subr.mxu0 %v3642_v15  ;;  %2502 = vmatprep.subr.mxu1 %v3642_v15  ;;  %v2965_v15 = vld [vmem:[%s6532_s14 + $0x250] sm:$0xff]  ;;  %v3125_v41 = vld [vmem:[#allocation2 + $0x118] sm:$0xff] }
 0x17b   :  { %2292 = vmatpush1.msra.mxu0 %v3647_v18  ;;  %2503 = vmatpush1.msra.mxu1 %v3647_v18  ;;  %v2984_v18 = vld [vmem:[%s6532_s14 + $0x2b8] sm:$0xff] }
 0x17c   :  { %2309 = vmatprep.subr.mxu0 %v3653_v24  ;;  %2520 = vmatprep.subr.mxu1 %v3653_v24  ;;  %v2983_v24 = vld [vmem:[%s6532_s14 + $0x2b0] sm:$0xff] }
 0x17d   :  { %2961 = vmatprep.mubr.msk.f32.mxu1 %vm1000_vm2, %v2954_v42  ;;  %2310 = vmatpush2.msra.mxu0 %v3658_v25  ;;  %v3126_v42 = vld [vmem:[#allocation2 + $0x110] sm:$0xff] }
 0x17e   :  { %2521 = vmatpush2.msra.mxu1 %v3658_v25  ;;  %2311 = vmatprep.subr.mxu0 %v3664_v33  ;;  %v2968_v25 = vld [vmem:[%s6532_s14 + $0x268] sm:$0xff] }
 0x17f   :  { %2139 = vmatmul.mubr.f32.gmra.mxu1 %v2953_v46  ;;  %2522 = vmatprep.subr.mxu1 %v3664_v33  ;;  %v2967_v33 = vld [vmem:[%s6532_s14 + $0x260] sm:$0xff]  ;;  %v3000_v46 = vld [vmem:[%s6532_s14 + $0x308] sm:$0xff] }
 0x180   :  { %2312 = vmatpush2.msra.mxu0 %v3669_v34  ;;  %2523 = vmatpush2.msra.mxu1 %v3669_v34  ;;  %v3093_v34 = vld [vmem:[#allocation2 + $0x98] sm:$0xff] }
 0x181   :  { %2313 = vmatprep.subr.mxu0 %v3675_v40  ;;  %2524 = vmatprep.subr.mxu1 %v3675_v40  ;;  %v3094_v40 = vld [vmem:[#allocation2 + $0x90] sm:$0xff] }
 0x182   :  { %2944 = vmatprep.mubr.msk.f32.mxu0 %vm1000_vm2, %v2938_v47  ;;  %2314 = vmatpush2.msra.mxu0 %v3680_v43  ;;  %v3006_v47 = vld [vmem:[%s6532_s14 + $0x338] sm:$0xff] }
 0x183   :  { %2525 = vmatpush2.msra.mxu1 %v3680_v43  ;;  %1946 = vmatmul.mubr.f32.gmra.mxu0 %v2937_v51  ;;  %v3095_v43 = vld [vmem:[#allocation2 + $0x88] sm:$0xff] }
 0x184   :  { %2315 = vmatprep.subr.mxu0 %v3686_v49  ;;  %2526 = vmatprep.subr.mxu1 %v3686_v49  ;;  %v2986_v49 = vld [vmem:[%s6532_s14 + $0x2c8] sm:$0xff] }
 0x185   :  { %2316 = vmatpush2.msra.mxu0 %v3691_v50  ;;  %2527 = vmatpush2.msra.mxu1 %v3691_v50  ;;  %v3096_v50 = vld [vmem:[#allocation2 + $0x80] sm:$0xff]  ;;  %v3127_v51 = vld [vmem:[#allocation2 + $0x108] sm:$0xff] }
 0x186   :  { %2317 = vmatprep.subr.mxu0 %v3697_v58  ;;  %2528 = vmatprep.subr.mxu1 %v3697_v58  ;;  %v3097_v58 = vld [vmem:[#allocation2 + $0x78] sm:$0xff] }
 0x187   :  { %2962 = vmatprep.mubr.msk.f32.mxu1 %vm1000_vm2, %v2956_v52  ;;  %2318 = vmatpush2.msra.mxu0 %v3702_v59  ;;  %v2999_v52 = vld [vmem:[%s6532_s14 + $0x300] sm:$0xff] }
 0x188   :  { %2529 = vmatpush2.msra.mxu1 %v3702_v59  ;;  %2319 = vmatprep.subr.mxu0 %v3708_v5  ;;  %v2985_v59 = vld [vmem:[%s6532_s14 + $0x2c0] sm:$0xff] }
 0x189   :  { %2145 = vmatmul.mubr.f32.gmra.mxu1 %v2955_v56  ;;  %2530 = vmatprep.subr.mxu1 %v3708_v5  ;;  %v3098_v5 = vld [vmem:[#allocation2 + $0x70] sm:$0xff]  ;;  %v3128_v56 = vld [vmem:[#allocation2 + $0x100] sm:$0xff] }
 0x18a   :  { %2320 = vmatpush2.msra.mxu0 %v3713_v10  ;;  %2531 = vmatpush2.msra.mxu1 %v3713_v10  ;;  %v3099_v10 = vld [vmem:[#allocation2 + $0x68] sm:$0xff] }
 0x18b   :  { %2321 = vmatprep.subr.mxu0 %v3717_v13  ;;  %2532 = vmatprep.subr.mxu1 %v3717_v13  ;;  %v2970_v13 = vld [vmem:[%s6532_s14 + $0x278] sm:$0xff] }
 0x18c   :  { %2322 = vmatpush2.msra.mxu0 %v3721_v14  ;;  %2533 = vmatpush2.msra.mxu1 %v3721_v14  ;;  %v3100_v14 = vld [vmem:[#allocation2 + $0x60] sm:$0xff] }
 0x18d   :  { %2323 = vmatprep.subr.mxu0 %v3725_v19  ;;  %2534 = vmatprep.subr.mxu1 %v3725_v19  ;;  %v2969_v19 = vld [vmem:[%s6532_s14 + $0x270] sm:$0xff] }
 0x18e   :  { %2324 = vmatpush2.msra.mxu0 %v3732_v23  ;;  %2975 = vmatprep.mubr.msk.f32.mxu0 %vm1000_vm2, %v2964_v57 }
 0x18f   :  { %2535 = vmatpush2.msra.mxu1 %v3732_v23  ;;  %2326 = vmatmul.mubr.f32.vlgmr.msra.gmra.mxu0 %v2963_v61  ;;  %v3101_v23 = vld [vmem:[#allocation2 + $0x58] sm:$0xff]  ;;  %v3005_v61 = vld [vmem:[%s6532_s14 + $0x330] sm:$0xff] }
 0x190   :  { %2993 = vmatprep.mubr.msk.f32.mxu1 %vm1000_vm2, %v2982_v62  ;;  %2671 = vmatprep.subr.mxu0 %v4099_v39  ;;  %v3002_v62 = vld [vmem:[%s6532_s14 + $0x318] sm:$0xff] }
 0x191   :  { %3017 = vmatprep.subr.mxu1 %v4099_v39  ;;  %2537 = vmatmul.mubr.f32.vlgmr.msra.gmra.mxu1 %v2981_v8  ;;  %v3108_v39 = vld [vmem:[#allocation2 + $0x20] sm:$0xff]  ;;  %v3008_v8 = vld [vmem:[%s6532_s14 + $0x348] sm:$0xff] }
 0x192   :  { %2672 = vmatpush1.msra.mxu0 %v4103_v44  ;;  %3041 = vmatpush1.msra.mxu1 %v4103_v44  ;;  %v2971_v44 = vld [vmem:[%s6532_s14 + $0x280] sm:$0xff] }
 0x193   :  { %2673 = vmatprep.subr.mxu0 %v4107_v45  ;;  %3018 = vmatprep.subr.mxu1 %v4107_v45  ;;  %v3109_v45 = vld [vmem:[#allocation2 + $0x18] sm:$0xff] }
 0x194   :  { %2674 = vmatpush1.msra.mxu0 %v4114_v53  ;;  %3042 = vmatpush1.msra.mxu1 %v4114_v53  ;;  %v3111_v53 = vld [vmem:[#allocation2 + $0x8] sm:$0xff] }
 0x195   :  { %2675 = vmatprep.subr.mxu0 %v4121_v0  ;;  %3019 = vmatprep.subr.mxu1 %v4121_v0  ;;  %v3112_v0 = vld [vmem:[#allocation2] sm:$0xff] }
 0x196   :  { %2976 = vmatprep.mubr.msk.f32.mxu0 %vm1000_vm2, %v2966_v9  ;;  %2676 = vmatpush1.msra.mxu0 %v4126_v1 }
 0x197   :  { %3043 = vmatpush1.msra.mxu1 %v4126_v1  ;;  %2332 = vmatmul.mubr.f32.gmra.mxu0 %v2965_v15  ;;  %v3113_v1 = vld [vmem:[#allocation2 + $0x178] sm:$0xff]  ;;  %v3001_v15 = vld [vmem:[%s6532_s14 + $0x310] sm:$0xff] }
 0x198   :  { %2677 = vmatprep.subr.mxu0 %v4130_v4  ;;  %3020 = vmatprep.subr.mxu1 %v4130_v4  ;;  %v2989_v4 = vld [vmem:[%s6532_s14 + $0x2e0] sm:$0xff] }
 0x199   :  { %2678 = vmatpush1.msra.mxu0 %v4137_v7  ;;  %3044 = vmatpush1.msra.mxu1 %v4137_v7  ;;  %v3115_v7 = vld [vmem:[#allocation2 + $0x168] sm:$0xff] }
 0x19a   :  { %2679 = vmatprep.subr.mxu0 %v4141_v11  ;;  %3021 = vmatprep.subr.mxu1 %v4141_v11  ;;  %v2974_v11 = vld [vmem:[%s6532_s14 + $0x298] sm:$0xff] }
 0x19b   :  { %2994 = vmatprep.mubr.msk.f32.mxu1 %vm1000_vm2, %v2984_v18  ;;  %2680 = vmatpush1.msra.mxu0 %v4149_v16  ;;  %v3007_v18 = vld [vmem:[%s6532_s14 + $0x340] sm:$0xff] }
 0x19c   :  { %3045 = vmatpush1.msra.mxu1 %v4149_v16  ;;  %2681 = vmatprep.subr.mxu0 %v4153_v17  ;;  %v2973_v16 = vld [vmem:[%s6532_s14 + $0x290] sm:$0xff]  ;;  %v1085_v37 = vpop.f32.mrf.mxu0 }
 0x19d   :  { %2543 = vmatmul.mubr.f32.gmra.mxu1 %v2983_v24  ;;  %3022 = vmatprep.subr.mxu1 %v4153_v17  ;;  %v3117_v17 = vld [vmem:[#allocation2 + $0x158] sm:$0xff]  ;;  %v1296_v9 = vpop.f32.mrf.mxu1  ;;  %v3004_v24 = vld [vmem:[%s6532_s14 + $0x328] sm:$0xff] }
 0x19e   :  { %2682 = vmatpush1.msra.mxu0 %v4160_v22  ;;  %3046 = vmatpush1.msra.mxu1 %v4160_v22  ;;  %v3119_v22 = vld [vmem:[#allocation2 + $0x148] sm:$0xff]  ;;  %v1087_v57 = vpop.f32.mrf.mxu0 }
 0x19f   :  { %2683 = vmatprep.subr.mxu0 %v3093_v34  ;;  %3023 = vmatprep.subr.mxu1 %v3093_v34 }
 0x1a0   :  { %2977 = vmatprep.mubr.msk.f32.mxu0 %vm1000_vm2, %v2968_v25  ;;  %2684 = vmatpush1.msra.mxu0 %v3094_v40  ;;  %v3010_v25 = vld [vmem:[%s6532_s14 + $0x358] sm:$0xff] }
 0x1a1   :  { %3047 = vmatpush1.msra.mxu1 %v3094_v40  ;;  %2338 = vmatmul.mubr.f32.gmra.mxu0 %v2967_v33  ;;  %v1298_v33 = vpop.f32.mrf.mxu1  ;;  %v3003_v40 = vld [vmem:[%s6532_s14 + $0x320] sm:$0xff] }
 0x1a2   :  { %2685 = vmatprep.subr.mxu0 %v3095_v43  ;;  %3024 = vmatprep.subr.mxu1 %v3095_v43  ;;  %v3009_v43 = vld [vmem:[%s6532_s14 + $0x350] sm:$0xff]  ;;  %s3133_s14 = smov 125  }
 0x1a3   :  { %2686 = vmatpush1.msra.mxu0 %v3096_v50  ;;  %3048 = vmatpush1.msra.mxu1 %v3096_v50  ;;  %v1091_v34 = vpop.f32.mrf.mxu0 }
 0x1a4   :  { %2687 = vmatprep.subr.mxu0 %v3097_v58  ;;  %3025 = vmatprep.subr.mxu1 %v3097_v58 }
 0x1a5   :  { %2995 = vmatprep.mubr.msk.f32.mxu1 %vm1000_vm2, %v2986_v49  ;;  %2688 = vmatpush1.msra.mxu0 %v3098_v5  ;;  %v1093_v49 = vpop.f32.mrf.mxu0 }
 0x1a6   :  { %3049 = vmatpush1.msra.mxu1 %v3098_v5  ;;  %2689 = vmatprep.subr.mxu0 %v3099_v10 }
 0x1a7   :  { %2549 = vmatmul.mubr.f32.gmra.mxu1 %v2985_v59  ;;  %3026 = vmatprep.subr.mxu1 %v3099_v10 }
 0x1a8   :  { %2690 = vmatpush1.msra.mxu0 %v3100_v14  ;;  %3050 = vmatpush1.msra.mxu1 %v3100_v14 }
 0x1a9   :  { %2691 = vmatprep.subr.mxu0 %v3101_v23  ;;  %3027 = vmatprep.subr.mxu1 %v3101_v23  ;;  %v1302_v50 = vpop.f32.mrf.mxu1 }
 0x1aa   :  { %2978 = vmatprep.mubr.msk.f32.mxu0 %vm1000_vm2, %v2970_v13  ;;  %2692 = vmatpush1.msra.mxu0 %v3102_v60 }
 0x1ab   :  { %3051 = vmatpush1.msra.mxu1 %v3102_v60  ;;  %2344 = vmatmul.mubr.f32.gmra.mxu0 %v2969_v19  ;;  %v1304_v58 = vpop.f32.mrf.mxu1 }
 0x1ac   :  { %2693 = vmatprep.subr.mxu0 %v3103_v2  ;;  %3028 = vmatprep.subr.mxu1 %v3103_v2 }
 0x1ad   :  { %2694 = vmatpush1.msra.mxu0 %v3104_v20  ;;  %3052 = vmatpush1.msra.mxu1 %v3104_v20  ;;  %v1097_v59 = vpop.f32.mrf.mxu0 }
 0x1ae   :  { %2695 = vmatprep.subr.mxu0 %v3105_v28  ;;  %3029 = vmatprep.subr.mxu1 %v3105_v28 }
 0x1af   :  { %2996 = vmatprep.mubr.msk.f32.mxu1 %vm1000_vm2, %v2988_v3  ;;  %2696 = vmatpush1.msra.mxu0 %v3106_v30  ;;  %v1099_v5 = vpop.f32.mrf.mxu0 }
 0x1b0   :  { %3053 = vmatpush1.msra.mxu1 %v3106_v30  ;;  %2697 = vmatprep.subr.mxu0 %v3107_v35 }
 0x1b1   :  { %2555 = vmatmul.mubr.f32.gmra.mxu1 %v2987_v29  ;;  %3030 = vmatprep.subr.mxu1 %v3107_v35 }
 0x1b2   :  { %2698 = vmatpush1.msra.mxu0 %v3108_v39  ;;  %3054 = vmatpush1.msra.mxu1 %v3108_v39 }
 0x1b3   :  { %2699 = vmatprep.subr.mxu0 %v3109_v45  ;;  %3031 = vmatprep.subr.mxu1 %v3109_v45  ;;  %v1308_v10 = vpop.f32.mrf.mxu1 }
 0x1b4   :  { %2979 = vmatprep.mubr.msk.f32.mxu0 %vm1000_vm2, %v2972_v38  ;;  %2700 = vmatpush1.msra.mxu0 %v3110_v48 }
 0x1b5   :  { %3055 = vmatpush1.msra.mxu1 %v3110_v48  ;;  %2350 = vmatmul.mubr.f32.gmra.mxu0 %v2971_v44  ;;  %v1310_v13 = vpop.f32.mrf.mxu1 }
 0x1b6   :  { %2701 = vmatprep.subr.mxu0 %v3111_v53  ;;  %3032 = vmatprep.subr.mxu1 %v3111_v53 }
 0x1b7   :  { %2702 = vmatpush1.msra.mxu0 %v3112_v0  ;;  %3056 = vmatpush1.msra.mxu1 %v3112_v0  ;;  %v1103_v14 = vpop.f32.mrf.mxu0 }
 0x1b8   :  { %2719 = vmatprep.subr.mxu0 %v3113_v1  ;;  %3033 = vmatprep.subr.mxu1 %v3113_v1 }
 0x1b9   :  { %2997 = vmatprep.mubr.msk.f32.mxu1 %vm1000_vm2, %v2990_v63  ;;  %2720 = vmatpush2.msra.mxu0 %v3114_v6  ;;  %v1105_v19 = vpop.f32.mrf.mxu0 }
 0x1ba   :  { %3057 = vmatpush2.msra.mxu1 %v3114_v6  ;;  %2721 = vmatprep.subr.mxu0 %v3115_v7 }
 0x1bb   :  { %2561 = vmatmul.mubr.f32.gmra.mxu1 %v2989_v4  ;;  %3034 = vmatprep.subr.mxu1 %v3115_v7 }
 0x1bc   :  { %2722 = vmatpush2.msra.mxu0 %v3116_v12  ;;  %3058 = vmatpush2.msra.mxu1 %v3116_v12 }
 0x1bd   :  { %2723 = vmatprep.subr.mxu0 %v3117_v17  ;;  %3035 = vmatprep.subr.mxu1 %v3117_v17  ;;  %v1314_v23 = vpop.f32.mrf.mxu1 }
 0x1be   :  { %2980 = vmatprep.mubr.msk.f32.mxu0 %vm1000_vm2, %v2974_v11  ;;  %2724 = vmatpush2.msra.mxu0 %v3118_v21 }
 0x1bf   :  { %3059 = vmatpush2.msra.mxu1 %v3118_v21  ;;  %2356 = vmatmul.mubr.f32.gmra.mxu0 %v2973_v16  ;;  %v1316_v60 = vpop.f32.mrf.mxu1 }
 0x1c0   :  { %2725 = vmatprep.subr.mxu0 %v3119_v22  ;;  %3036 = vmatprep.subr.mxu1 %v3119_v22 }
 0x1c1   :  { %2726 = vmatpush2.msra.mxu0 %v3120_v55  ;;  %3060 = vmatpush2.msra.mxu1 %v3120_v55  ;;  %v1109_v2 = vpop.f32.mrf.mxu0 }
 0x1c2   :  { %2727 = vmatprep.subr.mxu0 %v3121_v26  ;;  %3037 = vmatprep.subr.mxu1 %v3121_v26 }
 0x1c3   :  { %2998 = vmatprep.mubr.msk.f32.mxu1 %vm1000_vm2, %v2992_v54  ;;  %2728 = vmatpush2.msra.mxu0 %v3122_v31  ;;  %v1111_v3 = vpop.f32.mrf.mxu0 }
 0x1c4   :  { %3061 = vmatpush2.msra.mxu1 %v3122_v31  ;;  %2729 = vmatprep.subr.mxu0 %v3123_v32 }
 0x1c5   :  { %2567 = vmatmul.mubr.f32.gmra.mxu1 %v2991_v27  ;;  %3038 = vmatprep.subr.mxu1 %v3123_v32 }
 0x1c6   :  { %2730 = vmatpush2.msra.mxu0 %v3124_v36  ;;  %3062 = vmatpush2.msra.mxu1 %v3124_v36 }
 0x1c7   :  { %2731 = vmatprep.subr.mxu0 %v3125_v41  ;;  %3039 = vmatprep.subr.mxu1 %v3125_v41  ;;  %v1320_v20 = vpop.f32.mrf.mxu1 }
 0x1c8   :  { %2732 = vmatpush2.msra.mxu0 %v3126_v42  ;;  %3063 = vmatpush2.msra.mxu1 %v3126_v42  ;;  %v895_v42 = vlaneseq }
 0x1c9   :  { %2733 = vmatprep.subr.mxu0 %v3127_v51  ;;  %3040 = vmatprep.subr.mxu1 %v3127_v51  ;;  %v1322_v28 = vpop.f32.mrf.mxu1 }
 0x1ca   :  { %2734 = vmatpush2.msra.mxu0 %v3128_v56  ;;  %3064 = vmatpush2.msra.mxu1 %v3128_v56 }
 0x1cb   :  { %3011 = vmatprep.mubr.msk.f32.mxu0 %vm1000_vm2, %v3000_v46  ;;  %3014 = vmatprep.mubr.msk.f32.mxu1 %vm1000_vm2, %v3006_v47  ;;  %v1115_v29 = vpop.f32.mrf.mxu0  ;;  %v896_v47 = vand.u32 127, %v895_v42 }
 0x1cc   :  { %2736 = vmatmul.mubr.f32.vlgmr.msra.gmra.mxu0 %v2999_v52  ;;  %1132 = vrot.lane.b32.xlu0 %v1085_v37, %s3131_s27 }
 0x1cd   :  { %2754 = vmatmul.mubr.f32.vlgmr.msra.gmra.mxu1 %v3005_v61  ;;  %1134 = vrot.lane.b32.xlu1 %v1087_v57, %s3131_s27  ;;  %v1117_v30 = vpop.f32.mrf.mxu0  ;;  %v897_v56 = vadd.s32 128, %v896_v47 }
 0x1ce   :  { %3012 = vmatprep.mubr.msk.f32.mxu0 %vm1000_vm2, %v3002_v62  ;;  %3015 = vmatprep.mubr.msk.f32.mxu1 %vm1000_vm2, %v3008_v8 }
 0x1cf   :  { %v4493_v62 = vmul.u32.u64.low 2454267026, %v897_v56  ;;  %v4494_v8 = vmul.u32.u64.high 2454267026, %v897_v56, %v4493_v62 }
 0x1d0   :  { %1343 = vrot.lane.b32.xlu0 %v1296_v9, %s3132_s22  ;;  %2742 = vmatmul.mubr.f32.gmra.mxu0 %v3001_v15 }
 0x1d1   :  { %1345 = vrot.lane.b32.xlu1 %v1298_v33, %s3132_s22  ;;  %2760 = vmatmul.mubr.f32.gmra.mxu1 %v3007_v18  ;;  %v1326_v35 = vpop.f32.mrf.mxu1  ;;  %vm918_vm5 = vc.u32 %v4493_v62, 2454267026 }
 0x1d2   :  { %3013 = vmatprep.mubr.msk.f32.mxu0 %vm1000_vm2, %v3004_v24  ;;  %3016 = vmatprep.mubr.msk.f32.mxu1 %vm1000_vm2, %v3010_v25  ;;  %v4497_v18 = vmul.u32.u64.low 2454267026, %v896_v47  ;;  %v4498_v24 = vmul.u32.u64.high 2454267026, %v896_v47, %v4497_v18  ;;  %vm1566_vm2 = vcmask 1022976  }
 0x1d3   :  { %v1328_v39 = vpop.f32.mrf.mxu1 }
 0x1d4   :  { %1136 = vrot.lane.b32.xlu0 %v1091_v34, %s3131_s27  ;;  %2748 = vmatmul.mubr.f32.gmra.mxu0 %v3003_v40  ;;  %vm904_vm6 = vc.u32 %v4497_v18, 2454267026  ;;  %v3137_v40 = vmov 0  }
 0x1d5   :  { %1138 = vrot.lane.b32.xlu1 %v1093_v49, %s3131_s27  ;;  %2766 = vmatmul.mubr.f32.gmra.mxu1 %v3009_v43  ;;  %v919_v43 = vsel %vm918_vm5, 1, %v3137_v40  ;;  %v905_v49 = vsel %vm904_vm6, 1, %v3137_v40  ;;  %vm147_vm5 = vcmask 556032   ;;  %vm1988_vm6 = vcmask 916480  }
 0x1d7   :  { %v1495_v38 = vpop.f32.mrf.mxu0 }
 0x1d8   :  { %1347 = vrot.lane.b32.xlu0 %v1302_v50, %s3132_s22 }
 0x1d9   :  { %1349 = vrot.lane.b32.xlu1 %v1304_v58, %s3132_s22  ;;  %v1497_v44 = vpop.f32.mrf.mxu0  ;;  %v1706_v45 = vpop.f32.mrf.mxu1 }
 0x1db   :  { %v1708_v48 = vpop.f32.mrf.mxu1 }
 0x1dc   :  { %1140 = vrot.lane.b32.xlu0 %v1097_v59, %s3131_s27 }
 0x1dd   :  { %1142 = vrot.lane.b32.xlu1 %v1099_v5, %s3131_s27  ;;  %v920_v5 = vadd.s32 %v4494_v8, %v919_v43 }
 0x1df   :  { %v1501_v53 = vpop.f32.mrf.mxu0 }
 0x1e0   :  { %1351 = vrot.lane.b32.xlu0 %v1308_v10, %s3132_s22  ;;  %v906_v10 = vadd.s32 %v4498_v24, %v905_v49 }
 0x1e1   :  { %1353 = vrot.lane.b32.xlu1 %v1310_v13, %s3132_s22  ;;  %v1503_v63 = vpop.f32.mrf.mxu0 }
 0x1e4   :  { %1144 = vrot.lane.b32.xlu0 %v1103_v14, %s3131_s27 }
 0x1e5   :  { %1146 = vrot.lane.b32.xlu1 %v1105_v19, %s3131_s27  ;;  %v1712_v0 = vpop.f32.mrf.mxu1 }
 0x1e7   :  { %v1714_v1 = vpop.f32.mrf.mxu1 }
 0x1e8   :  { %1355 = vrot.lane.b32.xlu0 %v1314_v23, %s3132_s22 }
 0x1e9   :  { %1357 = vrot.lane.b32.xlu1 %v1316_v60, %s3132_s22  ;;  %v1507_v4 = vpop.f32.mrf.mxu0  ;;  %v921_v60 = vshrl.u32 %v920_v5, 3 }
 0x1eb   :  { %v1509_v6 = vpop.f32.mrf.mxu0 }
 0x1ec   :  { %1148 = vrot.lane.b32.xlu0 %v1109_v2, %s3131_s27  ;;  %v907_v2 = vshrl.u32 %v906_v10, 3 }
 0x1ed   :  { %1150 = vrot.lane.b32.xlu1 %v1111_v3, %s3131_s27 }
 0x1ef   :  { %v1718_v7 = vpop.f32.mrf.mxu1 }
 0x1f0   :  { %1359 = vrot.lane.b32.xlu0 %v1320_v20, %s3132_s22 }
 0x1f1   :  { %1361 = vrot.lane.b32.xlu1 %v1322_v28, %s3132_s22  ;;  %v1720_v11 = vpop.f32.mrf.mxu1 }
 0x1f3   :  { %v1513_v12 = vpop.f32.mrf.mxu0 }
 0x1f4   :  { %1152 = vrot.lane.b32.xlu0 %v1115_v29, %s3131_s27 }
 0x1f5   :  { %1154 = vrot.lane.b32.xlu1 %v1117_v30, %s3131_s27  ;;  %v1515_v16 = vpop.f32.mrf.mxu0  ;;  %s3136_s27 = smov 111   ;;  %v922_v30 = vmul.u32 14, %v921_v60 }
 0x1f8   :  { %1363 = vrot.lane.b32.xlu0 %v1326_v35, %s3132_s22  ;;  %v908_v35 = vmul.u32 14, %v907_v2 }
 0x1f9   :  { %1365 = vrot.lane.b32.xlu1 %v1328_v39, %s3132_s22  ;;  %v1724_v17 = vpop.f32.mrf.mxu1 }
 0x1fb   :  { %v1726_v21 = vpop.f32.mrf.mxu1 }
 0x1fc   :  { %1542 = vrot.lane.b32.xlu0 %v1495_v38, %s3133_s14 }
 0x1fd   :  { %1544 = vrot.lane.b32.xlu1 %v1497_v44, %s3133_s14  ;;  %v1519_v22 = vpop.f32.mrf.mxu0 }
 0x1ff   :  { %v1521_v54 = vpop.f32.mrf.mxu0 }
 0x200   :  { %1753 = vrot.lane.b32.xlu0 %v1706_v45, %s3134_s25 }
 0x201   :  { %1755 = vrot.lane.b32.xlu1 %v1708_v48, %s3134_s25  ;;  %v923_v48 = vsub.s32 %v897_v56, %v922_v30 }
 0x203   :  { %v1730_v55 = vpop.f32.mrf.mxu1  ;;  %vm927_vm7 = vcmp.ne.s32.totalorder %v923_v48, 0  ;;  %vm929_vm8 = vcmp.lt.s32.totalorder %v923_v48, 0 }
 0x204   :  { %1546 = vrot.lane.b32.xlu0 %v1501_v53, %s3133_s14  ;;  %v909_v53 = vsub.s32 %v896_v47, %v908_v35  ;;  %vm931_vm12 = vmand %vm929_vm8, %vm927_vm7  ;;  %vm2187_vm7 = vcmask 908288   ;;  %vm2398_vm8 = vcmask 809984  }
 0x205   :  { %1548 = vrot.lane.b32.xlu1 %v1503_v63, %s3133_s14  ;;  %v1732_v26 = vpop.f32.mrf.mxu1 }
 0x206   :  { %vm926_vm9 = vcmp.ne.s32.totalorder %v909_v53, 0  ;;  %vm928_vm10 = vcmp.lt.s32.totalorder %v909_v53, 0 }
 0x207   :  { %v1525_v27 = vpop.f32.mrf.mxu0  ;;  %vm930_vm13 = vmand %vm928_vm10, %vm926_vm9  ;;  %vm2609_vm9 = vcmask 801792   ;;  %vm2808_vm10 = vcmask 793600  }
 0x208   :  { %1757 = vrot.lane.b32.xlu0 %v1712_v0, %s3134_s25 }
 0x209   :  { %1759 = vrot.lane.b32.xlu1 %v1714_v1, %s3134_s25  ;;  %v1527_v31 = vpop.f32.mrf.mxu0 }
 0x20c   :  { %1550 = vrot.lane.b32.xlu0 %v1507_v4, %s3133_s14 }
 0x20d   :  { %1552 = vrot.lane.b32.xlu1 %v1509_v6, %s3133_s14  ;;  %v1736_v32 = vpop.f32.mrf.mxu1 }
 0x20f   :  { %v1738_v37 = vpop.f32.mrf.mxu1 }
 0x210   :  { %1761 = vrot.lane.b32.xlu0 %v1718_v7, %s3134_s25  ;;  %v933_v7 = vadd.s32 14, %v923_v48 }
 0x211   :  { %1763 = vrot.lane.b32.xlu1 %v1720_v11, %s3134_s25 }
 0x213   :  { %v1917_v36 = vpop.f32.mrf.mxu0 }
 0x214   :  { %1554 = vrot.lane.b32.xlu0 %v1513_v12, %s3133_s14  ;;  %v932_v12 = vadd.s32 14, %v909_v53 }
 0x215   :  { %1556 = vrot.lane.b32.xlu1 %v1515_v16, %s3133_s14  ;;  %v1919_v41 = vpop.f32.mrf.mxu0  ;;  %v2116_v46 = vpop.f32.mrf.mxu1 }
 0x217   :  { %v2118_v51 = vpop.f32.mrf.mxu1 }
 0x218   :  { %1765 = vrot.lane.b32.xlu0 %v1724_v17, %s3134_s25 }
 0x219   :  { %1767 = vrot.lane.b32.xlu1 %v1726_v21, %s3134_s25 }
 0x21b   :  { %v1923_v52 = vpop.f32.mrf.mxu0 }
 0x21c   :  { %1558 = vrot.lane.b32.xlu0 %v1519_v22, %s3133_s14 }
 0x21d   :  { %1560 = vrot.lane.b32.xlu1 %v1521_v54, %s3133_s14  ;;  %v1925_v57 = vpop.f32.mrf.mxu0 }
 0x220   :  { %1769 = vrot.lane.b32.xlu0 %v1730_v55, %s3134_s25  ;;  %v4543_v55 = vsel %vm931_vm12, %v933_v7, %v923_v48 }
 0x221   :  { %1771 = vrot.lane.b32.xlu1 %v1732_v26, %s3134_s25  ;;  %v2122_v61 = vpop.f32.mrf.mxu1  ;;  %vm937_vm15 = vcmp.ge.s32.totalorder %v4543_v55, 1  ;;  %vm939_vm1 = vcmp.le.s32.totalorder %v4543_v55, 12 }
 0x223   :  { %v2124_v9 = vpop.f32.mrf.mxu1 }
 0x224   :  { %1562 = vrot.lane.b32.xlu0 %v1525_v27, %s3133_s14  ;;  %v4545_v27 = vsel %vm930_vm13, %v932_v12, %v909_v53 }
 0x225   :  { %1564 = vrot.lane.b32.xlu1 %v1527_v31, %s3133_s14  ;;  %v1929_v15 = vpop.f32.mrf.mxu0  ;;  %vm936_vm0 = vcmp.ge.s32.totalorder %v4545_v27, 1  ;;  %vm938_vm3 = vcmp.le.s32.totalorder %v4545_v27, 12 }
 0x227   :  { %v1931_v25 = vpop.f32.mrf.mxu0 }
 0x228   :  { %1773 = vrot.lane.b32.xlu0 %v1736_v32, %s3134_s25 }
 0x229   :  { %1775 = vrot.lane.b32.xlu1 %v1738_v37, %s3134_s25  ;;  %s3140_s25 = smov 97  }
 0x22b   :  { %v2128_v33 = vpop.f32.mrf.mxu1 }
 0x22c   :  { %1964 = vrot.lane.b32.xlu0 %v1917_v36, %s3135_s26 }
 0x22d   :  { %1966 = vrot.lane.b32.xlu1 %v1919_v41, %s3135_s26  ;;  %v2130_v58 = vpop.f32.mrf.mxu1 }
 0x22f   :  { %v1935_v59 = vpop.f32.mrf.mxu0 }
 0x230   :  { %2163 = vrot.lane.b32.xlu0 %v2116_v46, %s3136_s27 }
 0x231   :  { %2165 = vrot.lane.b32.xlu1 %v2118_v51, %s3136_s27  ;;  %v1937_v19 = vpop.f32.mrf.mxu0 }
 0x234   :  { %1968 = vrot.lane.b32.xlu0 %v1923_v52, %s3135_s26 }
 0x235   :  { %1970 = vrot.lane.b32.xlu1 %v1925_v57, %s3135_s26  ;;  %v2134_v23 = vpop.f32.mrf.mxu1 }
 0x237   :  { %v2136_v28 = vpop.f32.mrf.mxu1 }
 0x238   :  { %2167 = vrot.lane.b32.xlu0 %v2122_v61, %s3136_s27 }
 0x239   :  { %2169 = vrot.lane.b32.xlu1 %v2124_v9, %s3136_s27  ;;  %v1941_v29 = vpop.f32.mrf.mxu0 }
 0x23b   :  { %v1943_v44 = vpop.f32.mrf.mxu0 }
 0x23c   :  { %1972 = vrot.lane.b32.xlu0 %v1929_v15, %s3135_s26 }
 0x23d   :  { %1974 = vrot.lane.b32.xlu1 %v1931_v25, %s3135_s26 }
 0x23e   :  { %v4503_v34 = vpop.permute.xlu0 %1132 }
 0x23f   :  { %v4505_v50 = vpop.permute.xlu1 %1134  ;;  %v2140_v45 = vpop.f32.mrf.mxu1 }
 0x240   :  { %2171 = vrot.lane.b32.xlu0 %v2128_v33, %s3136_s27  ;;  %v1157_v53 = vsel %vm1156_vm14, %v4503_v34, %v4505_v50  ;;  %v1176_v7 = vsel %vm937_vm15, %v4505_v50, 0.0 }
 0x241   :  { %2173 = vrot.lane.b32.xlu1 %v2130_v58, %s3136_s27  ;;  %v2142_v1 = vpop.f32.mrf.mxu1 }
 0x242   :  { %v4511_v13 = vpop.permute.xlu0 %1343 }
 0x243   :  { %v4513_v14 = vpop.permute.xlu1 %1345  ;;  %v1947_v4 = vpop.f32.mrf.mxu0 }
 0x244   :  { %1976 = vrot.lane.b32.xlu0 %v1935_v59, %s3135_s26 }
 0x245   :  { %1978 = vrot.lane.b32.xlu1 %v1937_v19, %s3135_s26  ;;  %v1949_v16 = vpop.f32.mrf.mxu0 }
 0x246   :  { %v4517_v3 = vpop.permute.xlu0 %1136 }
 0x247   :  { %v4519_v20 = vpop.permute.xlu1 %1138 }
 0x248   :  { %2175 = vrot.lane.b32.xlu0 %v2134_v23, %s3136_s27 }
 0x249   :  { %2177 = vrot.lane.b32.xlu1 %v2136_v28, %s3136_s27  ;;  %v2146_v21 = vpop.f32.mrf.mxu1 }
 0x24a   :  { %v4523_v38 = vpop.permute.xlu0 %1347 }
 0x24b   :  { %v4525_v39 = vpop.permute.xlu1 %1349  ;;  %v2148_v31 = vpop.f32.mrf.mxu1 }
 0x24c   :  { %1980 = vrot.lane.b32.xlu0 %v1941_v29, %s3135_s26 }
 0x24d   :  { %1982 = vrot.lane.b32.xlu1 %v1943_v44, %s3135_s26 }
 0x24e   :  { %v4529_v63 = vpop.permute.xlu0 %1140 }
 0x24f   :  { %v4531_v0 = vpop.permute.xlu1 %1142  ;;  %v2327_v54 = vpop.f32.mrf.mxu0 }
 0x250   :  { %2179 = vrot.lane.b32.xlu0 %v2140_v45, %s3136_s27 }
 0x251   :  { %2181 = vrot.lane.b32.xlu1 %v2142_v1, %s3136_s27  ;;  %v2329_v37 = vpop.f32.mrf.mxu0  ;;  %v2538_v52 = vpop.f32.mrf.mxu1 }
 0x252   :  { %v1352_v6 = vpop.permute.xlu0 %1351 }
 0x253   :  { %v4535_v11 = vpop.permute.xlu1 %1353  ;;  %v2540_v62 = vpop.f32.mrf.mxu1 }
 0x254   :  { %v4539_v17 = vsel %vm1367_vm11, %v1352_v6, %v4535_v11  ;;  %1984 = vrot.lane.b32.xlu0 %v1947_v4, %s3135_s26  ;;  %v1368_v4 = vsel %vm1367_vm11, %v4511_v13, %v4513_v14 }
 0x255   :  { %1986 = vrot.lane.b32.xlu1 %v1949_v16, %s3135_s26 }
 0x256   :  { %v1145_v22 = vpop.permute.xlu0 %1144 }
 0x257   :  { %v1147_v26 = vpop.permute.xlu1 %1146  ;;  %v2333_v9 = vpop.f32.mrf.mxu0 }
 0x258   :  { %v1160_v32 = vsel %vm1156_vm14, %v1145_v22, %v1147_v26  ;;  %2183 = vrot.lane.b32.xlu0 %v2146_v21, %s3136_s27  ;;  %v1182_v41 = vsel %vm937_vm15, %v1147_v26, 0.0  ;;  %v1175_v22 = vsel %vm936_vm0, %v1157_v53, 0.0 }
 0x259   :  { %2185 = vrot.lane.b32.xlu1 %v2148_v31, %s3136_s27  ;;  %v1181_v46 = vsel %vm936_vm0, %v1160_v32, 0.0  ;;  %v2335_v33 = vpop.f32.mrf.mxu0  ;;  %v1386_v50 = vadd.f32 %v1368_v4, %v1175_v22  ;;  %v55_v22 = vld [vmem:[%s6533_s0 + $0x28] sm:$0xff] }
 0x25a   :  { %v1356_v36 = vpop.permute.xlu0 %1355  ;;  %152 = vst.msk [vmem:[%s6534_s15 + $0x28] sm:$0xff] %vm147_vm5, %v55_v22 }
 0x25b   :  { %v1358_v42 = vpop.permute.xlu1 %1357 }
 0x25c   :  { %v1371_v47 = vsel %vm1367_vm11, %v1356_v36, %v1358_v42  ;;  %v4557_v51 = vadd.f32 %v1358_v42, %v1182_v41  ;;  %2374 = vrot.lane.b32.xlu0 %v2327_v54, %s3138_s28  ;;  %v1387_v54 = vadd.f32 %v4513_v14, %v1176_v7 }
 0x25d   :  { %v4560_v56 = vadd.f32 %v1371_v47, %v1181_v46  ;;  %2376 = vrot.lane.b32.xlu1 %v2329_v37, %s3138_s28  ;;  %v2544_v49 = vpop.f32.mrf.mxu1 }
 0x25e   :  { %v1149_v57 = vpop.permute.xlu0 %1148 }
 0x25f   :  { %v1151_v61 = vpop.permute.xlu1 %1150  ;;  %v2546_v10 = vpop.f32.mrf.mxu1 }
 0x260   :  { %v1161_v8 = vsel %vm1156_vm14, %v1149_v57, %v1151_v61  ;;  %2585 = vrot.lane.b32.xlu0 %v2538_v52, %s3139_s29  ;;  %v1184_v18 = vsel %vm937_vm15, %v1151_v61, 0.0  ;;  %v1158_v52 = vsel %vm1156_vm14, %v4517_v3, %v4519_v20 }
 0x261   :  { %2587 = vrot.lane.b32.xlu1 %v2540_v62, %s3139_s29  ;;  %v1183_v25 = vsel %vm936_vm0, %v1161_v8, 0.0  ;;  %v2339_v23 = vpop.f32.mrf.mxu0  ;;  %v1369_v62 = vsel %vm1367_vm11, %v4523_v38, %v4525_v39 }
 0x262   :  { %v1360_v15 = vpop.permute.xlu0 %1359 }
 0x263   :  { %v1362_v24 = vpop.permute.xlu1 %1361  ;;  %v2341_v30 = vpop.f32.mrf.mxu0 }
 0x264   :  { %v1372_v40 = vsel %vm1367_vm11, %v1360_v15, %v1362_v24  ;;  %v4571_v43 = vadd.f32 %v1362_v24, %v1184_v18  ;;  %2378 = vrot.lane.b32.xlu0 %v2333_v9, %s3138_s28  ;;  %v1178_v9 = vsel %vm937_vm15, %v4519_v20, 0.0 }
 0x265   :  { %v4574_v58 = vadd.f32 %v1372_v40, %v1183_v25  ;;  %2380 = vrot.lane.b32.xlu1 %v2335_v33, %s3138_s28  ;;  %v1177_v25 = vsel %vm936_vm0, %v1158_v52, 0.0  ;;  %v1389_v33 = vadd.f32 %v4525_v39, %v1178_v9 }
 0x266   :  { %v1153_v59 = vpop.permute.xlu0 %1152  ;;  %v1388_v20 = vadd.f32 %v1369_v62, %v1177_v25  ;;  %v71_v62 = vld [vmem:[%s6533_s0 + $0xa8] sm:$0xff] }
 0x267   :  { %v1155_v5 = vpop.permute.xlu1 %1154  ;;  %v2550_v45 = vpop.f32.mrf.mxu1  ;;  %168 = vst.msk [vmem:[%s6534_s15 + $0xa8] sm:$0xff] %vm147_vm5, %v71_v62 }
 0x268   :  { %v1162_v19 = vsel %vm1156_vm14, %v1153_v59, %v1155_v5  ;;  %2589 = vrot.lane.b32.xlu0 %v2544_v49, %s3139_s29  ;;  %v1186_v2 = vsel %vm937_vm15, %v1155_v5, 0.0  ;;  %v1159_v5 = vsel %vm1156_vm14, %v4529_v63, %v4531_v0  ;;  %v1180_v63 = vsel %vm937_vm15, %v4531_v0, 0.0 }
 0x269   :  { %2591 = vrot.lane.b32.xlu1 %v2546_v10, %s3139_s29  ;;  %v1185_v29 = vsel %vm936_vm0, %v1162_v19, 0.0  ;;  %v2552_v12 = vpop.f32.mrf.mxu1 }
 0x26a   :  { %v1364_v60 = vpop.permute.xlu0 %1363 }
 0x26b   :  { %v1366_v28 = vpop.permute.xlu1 %1365  ;;  %v2345_v34 = vpop.f32.mrf.mxu0 }
 0x26c   :  { %v1373_v35 = vsel %vm1367_vm11, %v1364_v60, %v1366_v28  ;;  %v4585_v44 = vadd.f32 %v1366_v28, %v1186_v2  ;;  %2382 = vrot.lane.b32.xlu0 %v2339_v23, %s3138_s28 }
 0x26d   :  { %v4588_v48 = vadd.f32 %v1373_v35, %v1185_v29  ;;  %2384 = vrot.lane.b32.xlu1 %v2341_v30, %s3138_s28  ;;  %v2347_v37 = vpop.f32.mrf.mxu0  ;;  %v1179_v35 = vsel %vm936_vm0, %v1159_v5, 0.0  ;;  %v87_v5 = vld [vmem:[%s6533_s0 + $0x128] sm:$0xff] }
 0x26e   :  { %v1543_v1 = vpop.permute.xlu0 %1542  ;;  %184 = vst.msk [vmem:[%s6534_s15 + $0x128] sm:$0xff] %vm147_vm5, %v87_v5  ;;  %v244_v5 = vld [vmem:[%s6535_s1 + $0x8] sm:$0xff] }
 0x26f   :  { %v1545_v6 = vpop.permute.xlu1 %1544  ;;  %256 = vst.msk [vmem:[%s6534_s15 + $0x308] sm:$0xff] %vm147_vm5, %v244_v5 }
 0x270   :  { %v1567_v16 = vsel %vm1566_vm2, %v1543_v1, %v1545_v6  ;;  %v1586_v21 = vsel %vm939_vm1, %v1545_v6, 0.0  ;;  %2593 = vrot.lane.b32.xlu0 %v2550_v45, %s3139_s29  ;;  %v1391_v45 = vadd.f32 %v4535_v11, %v1180_v63  ;;  %v1390_v1 = vadd.f32 %v4539_v17, %v1179_v35  ;;  %v51_v17 = vld [vmem:[%s6533_s0 + $0x8] sm:$0xff]  ;;  %v97_v63 = vld [vmem:[%s6533_s0 + $0x178] sm:$0xff] }
 0x271   :  { %v1585_v13 = vsel %vm938_vm3, %v1567_v16, 0.0  ;;  %2595 = vrot.lane.b32.xlu1 %v2552_v12, %s3139_s29  ;;  %v1598_v31 = vadd.f32 %v1586_v21, %v1387_v54  ;;  %v2556_v14 = vpop.f32.mrf.mxu1  ;;  %148 = vst.msk [vmem:[%s6534_s15 + $0x8] sm:$0xff] %vm147_vm5, %v51_v17  ;;  %v99_v35 = vld [vmem:[%s6533_s0 + $0x188] sm:$0xff]  ;;  %194 = vst.msk [vmem:[%s6534_s15 + $0x178] sm:$0xff] %vm147_vm5, %v97_v63 }
 0x272   :  { %v1754_v26 = vpop.permute.xlu0 %1753  ;;  %v1597_v36 = vadd.f32 %v1585_v13, %v1386_v50  ;;  %v57_v13 = vld [vmem:[%s6533_s0 + $0x38] sm:$0xff]  ;;  %v59_v50 = vld [vmem:[%s6533_s0 + $0x48] sm:$0xff]  ;;  %196 = vst.msk [vmem:[%s6534_s15 + $0x188] sm:$0xff] %vm147_vm5, %v99_v35  ;;  %v251_v35 = vld [vmem:[%s6535_s1 + $0x40] sm:$0xff] }
 0x273   :  { %v1756_v32 = vpop.permute.xlu1 %1755  ;;  %v2558_v15 = vpop.f32.mrf.mxu1  ;;  %154 = vst.msk [vmem:[%s6534_s15 + $0x38] sm:$0xff] %vm147_vm5, %v57_v13  ;;  %156 = vst.msk [vmem:[%s6534_s15 + $0x48] sm:$0xff] %vm147_vm5, %v59_v50  ;;  %v119_v13 = vld [vmem:[%s6533_s0 + $0x228] sm:$0xff]  ;;  %v121_v50 = vld [vmem:[%s6533_s0 + $0x238] sm:$0xff] }
 0x274   :  { %v1778_v41 = vsel %vm1777_vm4, %v1754_v26, %v1756_v32  ;;  %v1797_v42 = vsel %vm937_vm15, %v1756_v32, 0.0  ;;  %2386 = vrot.lane.b32.xlu0 %v2345_v34, %s3138_s28  ;;  %v53_v34 = vld [vmem:[%s6533_s0 + $0x18] sm:$0xff]  ;;  %216 = vst.msk [vmem:[%s6534_s15 + $0x228] sm:$0xff] %vm147_vm5, %v119_v13  ;;  %218 = vst.msk [vmem:[%s6534_s15 + $0x238] sm:$0xff] %vm147_vm5, %v121_v50 }
 0x275   :  { %v1796_v46 = vsel %vm936_vm0, %v1778_v41, 0.0  ;;  %v4618_v47 = vadd.f32 %v1797_v42, %v1598_v31  ;;  %2388 = vrot.lane.b32.xlu1 %v2347_v37, %s3138_s28  ;;  %v2351_v3 = vpop.f32.mrf.mxu0  ;;  %v61_v26 = vld [vmem:[%s6533_s0 + $0x58] sm:$0xff]  ;;  %150 = vst.msk [vmem:[%s6534_s15 + $0x18] sm:$0xff] %vm147_vm5, %v53_v34  ;;  %v63_v37 = vld [vmem:[%s6533_s0 + $0x68] sm:$0xff] }
 0x276   :  { %v4624_v57 = vadd.f32 %v1796_v46, %v1597_v36  ;;  %v1547_v61 = vpop.permute.xlu0 %1546  ;;  %v65_v41 = vld [vmem:[%s6533_s0 + $0x78] sm:$0xff]  ;;  %v67_v42 = vld [vmem:[%s6533_s0 + $0x88] sm:$0xff]  ;;  %158 = vst.msk [vmem:[%s6534_s15 + $0x58] sm:$0xff] %vm147_vm5, %v61_v26  ;;  %160 = vst.msk [vmem:[%s6534_s15 + $0x68] sm:$0xff] %vm147_vm5, %v63_v37 }
 0x277   :  { %v1549_v8 = vpop.permute.xlu1 %1548  ;;  %v2353_v19 = vpop.f32.mrf.mxu0  ;;  %162 = vst.msk [vmem:[%s6534_s15 + $0x78] sm:$0xff] %vm147_vm5, %v65_v41  ;;  %164 = vst.msk [vmem:[%s6534_s15 + $0x88] sm:$0xff] %vm147_vm5, %v67_v42  ;;  %v125_v37 = vld [vmem:[%s6533_s0 + $0x258] sm:$0xff]  ;;  %v127_v41 = vld [vmem:[%s6533_s0 + $0x268] sm:$0xff] }
 0x278   :  { %v1568_v18 = vsel %vm1566_vm2, %v1547_v61, %v1549_v8  ;;  %v1588_v24 = vsel %vm939_vm1, %v1549_v8, 0.0  ;;  %2597 = vrot.lane.b32.xlu0 %v2556_v14, %s3139_s29  ;;  %v69_v61 = vld [vmem:[%s6533_s0 + $0x98] sm:$0xff]  ;;  %222 = vst.msk [vmem:[%s6534_s15 + $0x258] sm:$0xff] %vm147_vm5, %v125_v37  ;;  %224 = vst.msk [vmem:[%s6534_s15 + $0x268] sm:$0xff] %vm147_vm5, %v127_v41 }
 0x279   :  { %v1587_v38 = vsel %vm938_vm3, %v1568_v18, 0.0  ;;  %2599 = vrot.lane.b32.xlu1 %v2558_v15, %s3139_s29  ;;  %v1600_v49 = vadd.f32 %v1588_v24, %v1389_v33  ;;  %v73_v8 = vld [vmem:[%s6533_s0 + $0xb8] sm:$0xff]  ;;  %v75_v18 = vld [vmem:[%s6533_s0 + $0xc8] sm:$0xff]  ;;  %166 = vst.msk [vmem:[%s6534_s15 + $0x98] sm:$0xff] %vm147_vm5, %v69_v61 }
 0x27a   :  { %v1758_v40 = vpop.permute.xlu0 %1757  ;;  %v1599_v10 = vadd.f32 %v1587_v38, %v1388_v20  ;;  %v77_v24 = vld [vmem:[%s6533_s0 + $0xd8] sm:$0xff]  ;;  %170 = vst.msk [vmem:[%s6534_s15 + $0xb8] sm:$0xff] %vm147_vm5, %v73_v8  ;;  %v83_v38 = vld [vmem:[%s6533_s0 + $0x108] sm:$0xff]  ;;  %172 = vst.msk [vmem:[%s6534_s15 + $0xc8] sm:$0xff] %vm147_vm5, %v75_v18 }
 0x27b   :  { %v1760_v59 = vpop.permute.xlu1 %1759  ;;  %v2562_v60 = vpop.f32.mrf.mxu1  ;;  %v81_v33 = vld [vmem:[%s6533_s0 + $0xf8] sm:$0xff]  ;;  %174 = vst.msk [vmem:[%s6534_s15 + $0xd8] sm:$0xff] %vm147_vm5, %v77_v24  ;;  %180 = vst.msk [vmem:[%s6534_s15 + $0x108] sm:$0xff] %vm147_vm5, %v83_v38  ;;  %v139_v24 = vld [vmem:[%s6533_s0 + $0x2c8] sm:$0xff] }
 0x27c   :  { %v1779_v23 = vsel %vm1777_vm4, %v1758_v40, %v1760_v59  ;;  %v1799_v39 = vsel %vm937_vm15, %v1760_v59, 0.0  ;;  %2390 = vrot.lane.b32.xlu0 %v2351_v3, %s3138_s28  ;;  %v79_v3 = vld [vmem:[%s6533_s0 + $0xe8] sm:$0xff]  ;;  %v85_v20 = vld [vmem:[%s6533_s0 + $0x118] sm:$0xff]  ;;  %178 = vst.msk [vmem:[%s6534_s15 + $0xf8] sm:$0xff] %vm147_vm5, %v81_v33 }
 0x27d   :  { %v1798_v2 = vsel %vm936_vm0, %v1779_v23, 0.0  ;;  %v4651_v28 = vadd.f32 %v1799_v39, %v1600_v49  ;;  %2392 = vrot.lane.b32.xlu1 %v2353_v19, %s3138_s28  ;;  %v2564_v4 = vpop.f32.mrf.mxu1  ;;  %176 = vst.msk [vmem:[%s6534_s15 + $0xe8] sm:$0xff] %vm147_vm5, %v79_v3  ;;  %v91_v19 = vld [vmem:[%s6533_s0 + $0x148] sm:$0xff]  ;;  %182 = vst.msk [vmem:[%s6534_s15 + $0x118] sm:$0xff] %vm147_vm5, %v85_v20 }
 0x27e   :  { %v4657_v29 = vadd.f32 %v1798_v2, %v1599_v10  ;;  %v1551_v30 = vpop.permute.xlu0 %1550  ;;  %v89_v10 = vld [vmem:[%s6533_s0 + $0x138] sm:$0xff]  ;;  %v95_v2 = vld [vmem:[%s6533_s0 + $0x168] sm:$0xff]  ;;  %188 = vst.msk [vmem:[%s6534_s15 + $0x148] sm:$0xff] %vm147_vm5, %v91_v19  ;;  %236 = vst.msk [vmem:[%s6534_s15 + $0x2c8] sm:$0xff] %vm147_vm5, %v139_v24 }
 0x27f   :  { %v1553_v53 = vpop.permute.xlu1 %1552  ;;  %v2357_v0 = vpop.f32.mrf.mxu0  ;;  %186 = vst.msk [vmem:[%s6534_s15 + $0x138] sm:$0xff] %vm147_vm5, %v89_v10  ;;  %192 = vst.msk [vmem:[%s6534_s15 + $0x168] sm:$0xff] %vm147_vm5, %v95_v2  ;;  %v133_v61 = vld [vmem:[%s6533_s0 + $0x298] sm:$0xff]  ;;  %v143_v20 = vld [vmem:[%s6533_s0 + $0x2e8] sm:$0xff] }
 0x280   :  { %v1569_v6 = vsel %vm1566_vm2, %v1551_v30, %v1553_v53  ;;  %v1590_v7 = vsel %vm939_vm1, %v1553_v53, 0.0  ;;  %2601 = vrot.lane.b32.xlu0 %v2562_v60, %s3139_s29  ;;  %v93_v60 = vld [vmem:[%s6533_s0 + $0x158] sm:$0xff]  ;;  %v103_v53 = vld [vmem:[%s6533_s0 + $0x1a8] sm:$0xff]  ;;  %230 = vst.msk [vmem:[%s6534_s15 + $0x298] sm:$0xff] %vm147_vm5, %v133_v61 }
 0x281   :  { %v1589_v12 = vsel %vm938_vm3, %v1569_v6, 0.0  ;;  %v1602_v16 = vadd.f32 %v1590_v7, %v1391_v45  ;;  %2603 = vrot.lane.b32.xlu1 %v2564_v4, %s3139_s29  ;;  %v2359_v31 = vpop.f32.mrf.mxu0  ;;  %v101_v45 = vld [vmem:[%s6533_s0 + $0x198] sm:$0xff]  ;;  %190 = vst.msk [vmem:[%s6534_s15 + $0x158] sm:$0xff] %vm147_vm5, %v93_v60  ;;  %v107_v4 = vld [vmem:[%s6533_s0 + $0x1c8] sm:$0xff] }
 0x282   :  { %v1601_v21 = vadd.f32 %v1589_v12, %v1390_v1  ;;  %v1762_v11 = vpop.permute.xlu0 %1761  ;;  %v105_v1 = vld [vmem:[%s6533_s0 + $0x1b8] sm:$0xff]  ;;  %198 = vst.msk [vmem:[%s6534_s15 + $0x198] sm:$0xff] %vm147_vm5, %v101_v45  ;;  %200 = vst.msk [vmem:[%s6534_s15 + $0x1a8] sm:$0xff] %vm147_vm5, %v103_v53  ;;  %v245_v10 = vld [vmem:[%s6535_s1 + $0x10] sm:$0xff] }
 0x283   :  { %v1764_v54 = vpop.permute.xlu1 %1763  ;;  %v109_v6 = vld [vmem:[%s6533_s0 + $0x1d8] sm:$0xff]  ;;  %202 = vst.msk [vmem:[%s6534_s15 + $0x1b8] sm:$0xff] %vm147_vm5, %v105_v1  ;;  %204 = vst.msk [vmem:[%s6534_s15 + $0x1c8] sm:$0xff] %vm147_vm5, %v107_v4  ;;  %v248_v60 = vld [vmem:[%s6535_s1 + $0x28] sm:$0xff] }
 0x284   :  { %v1780_v32 = vsel %vm1777_vm4, %v1762_v11, %v1764_v54  ;;  %v1801_v36 = vsel %vm937_vm15, %v1764_v54, 0.0  ;;  %2394 = vrot.lane.b32.xlu0 %v2357_v0, %s3138_s28  ;;  %v115_v11 = vld [vmem:[%s6533_s0 + $0x208] sm:$0xff]  ;;  %206 = vst.msk [vmem:[%s6534_s15 + $0x1d8] sm:$0xff] %vm147_vm5, %v109_v6  ;;  %v117_v54 = vld [vmem:[%s6533_s0 + $0x218] sm:$0xff] }
 0x285   :  { %v1800_v14 = vsel %vm936_vm0, %v1780_v32, 0.0  ;;  %v4727_v46 = vadd.f32 %v1801_v36, %v1602_v16  ;;  %v2568_v52 = vpop.f32.mrf.mxu1  ;;  %2396 = vrot.lane.b32.xlu1 %v2359_v31, %s3138_s28  ;;  %v111_v16 = vld [vmem:[%s6533_s0 + $0x1e8] sm:$0xff]  ;;  %212 = vst.msk [vmem:[%s6534_s15 + $0x208] sm:$0xff] %vm147_vm5, %v115_v11  ;;  %214 = vst.msk [vmem:[%s6534_s15 + $0x218] sm:$0xff] %vm147_vm5, %v117_v54 }
 0x286   :  { %v4751_v9 = vadd.f32 %v1800_v14, %v1601_v21  ;;  %v1555_v15 = vpop.permute.xlu0 %1554  ;;  %v113_v21 = vld [vmem:[%s6533_s0 + $0x1f8] sm:$0xff]  ;;  %208 = vst.msk [vmem:[%s6534_s15 + $0x1e8] sm:$0xff] %vm147_vm5, %v111_v16  ;;  %v123_v36 = vld [vmem:[%s6533_s0 + $0x248] sm:$0xff]  ;;  %240 = vst.msk [vmem:[%s6534_s15 + $0x2e8] sm:$0xff] %vm147_vm5, %v143_v20 }
 0x287   :  { %v1557_v25 = vpop.permute.xlu1 %1556  ;;  %v2570_v40 = vpop.f32.mrf.mxu1  ;;  %210 = vst.msk [vmem:[%s6534_s15 + $0x1f8] sm:$0xff] %vm147_vm5, %v113_v21  ;;  %v129_v14 = vld [vmem:[%s6533_s0 + $0x278] sm:$0xff]  ;;  %220 = vst.msk [vmem:[%s6534_s15 + $0x248] sm:$0xff] %vm147_vm5, %v123_v36  ;;  %v252_v1 = vld [vmem:[%s6535_s1 + $0x48] sm:$0xff] }
 0x288   :  { %v1570_v49 = vsel %vm1566_vm2, %v1555_v15, %v1557_v25  ;;  %v1592_v59 = vsel %vm939_vm1, %v1557_v25, 0.0  ;;  %2605 = vrot.lane.b32.xlu0 %v2568_v52, %s3139_s29  ;;  %v131_v52 = vld [vmem:[%s6533_s0 + $0x288] sm:$0xff]  ;;  %v137_v18 = vld [vmem:[%s6533_s0 + $0x2b8] sm:$0xff]  ;;  %226 = vst.msk [vmem:[%s6534_s15 + $0x278] sm:$0xff] %vm147_vm5, %v129_v14 }
 0x289   :  { %v1591_v23 = vsel %vm938_vm3, %v1570_v49, 0.0  ;;  %v1604_v39 = vadd.f32 %v1592_v59, %v4557_v51  ;;  %2607 = vrot.lane.b32.xlu1 %v2570_v40, %s3139_s29  ;;  %v135_v15 = vld [vmem:[%s6533_s0 + $0x2a8] sm:$0xff]  ;;  %228 = vst.msk [vmem:[%s6534_s15 + $0x288] sm:$0xff] %vm147_vm5, %v131_v52  ;;  %v141_v38 = vld [vmem:[%s6533_s0 + $0x2d8] sm:$0xff] }
 0x28a   :  { %v1603_v51 = vadd.f32 %v1591_v23, %v4560_v56  ;;  %v1766_v30 = vpop.permute.xlu0 %1765  ;;  %v145_v40 = vld [vmem:[%s6533_s0 + $0x2f8] sm:$0xff]  ;;  %232 = vst.msk [vmem:[%s6534_s15 + $0x2a8] sm:$0xff] %vm147_vm5, %v135_v15  ;;  %234 = vst.msk [vmem:[%s6534_s15 + $0x2b8] sm:$0xff] %vm147_vm5, %v137_v18  ;;  %v253_v4 = vld [vmem:[%s6535_s1 + $0x50] sm:$0xff] }
 0x28b   :  { %v1768_v56 = vpop.permute.xlu1 %1767  ;;  %238 = vst.msk [vmem:[%s6534_s15 + $0x2d8] sm:$0xff] %vm147_vm5, %v141_v38  ;;  %242 = vst.msk [vmem:[%s6534_s15 + $0x2f8] sm:$0xff] %vm147_vm5, %v145_v40  ;;  %v246_v23 = vld [vmem:[%s6535_s1 + $0x18] sm:$0xff]  ;;  %v267_v16 = vld [vmem:[%s6536_s2] sm:$0xff] }
 0x28c   :  { %v2737_v7 = vpop.f32.mrf.mxu0  ;;  %v1781_v0 = vsel %vm1777_vm4, %v1766_v30, %v1768_v56  ;;  %v1803_v12 = vsel %vm937_vm15, %v1768_v56, 0.0  ;;  %257 = vst [vmem:[%s6534_s15 + $0x310] sm:$0xff] %v245_v10  ;;  %v250_v30 = vld [vmem:[%s6535_s1 + $0x38] sm:$0xff]  ;;  %258 = vst.msk [vmem:[%s6534_s15 + $0x318] sm:$0xff] %vm147_vm5, %v246_v23  ;;  %v268_v21 = vld [vmem:[%s6536_s2 + $0x8] sm:$0xff] }
 0x28d   :  { %v1802_v17 = vsel %vm936_vm0, %v1781_v0, 0.0  ;;  %v4914_v34 = vadd.f32 %v1803_v12, %v1604_v39  ;;  %2784 = vrot.lane.b32.xlu0 %v2737_v7, %s3140_s25  ;;  %v2755_v22 = vpop.f32.mrf.mxu1  ;;  %v247_v39 = vld [vmem:[%s6535_s1 + $0x20] sm:$0xff]  ;;  %260 = vst.msk [vmem:[%s6534_s15 + $0x328] sm:$0xff] %vm147_vm5, %v248_v60  ;;  %v254_v6 = vld [vmem:[%s6535_s1 + $0x58] sm:$0xff] }
 0x28e   :  { %v4938_v26 = vadd.f32 %v1802_v17, %v1603_v51  ;;  %v2739_v31 = vpop.f32.mrf.mxu0  ;;  %v1559_v32 = vpop.permute.xlu0 %1558  ;;  %v249_v51 = vld [vmem:[%s6535_s1 + $0x30] sm:$0xff]  ;;  %259 = vst [vmem:[%s6534_s15 + $0x320] sm:$0xff] %v247_v39  ;;  %262 = vst.msk [vmem:[%s6534_s15 + $0x338] sm:$0xff] %vm147_vm5, %v250_v30  ;;  %v271_v54 = vld [vmem:[%s6536_s2 + $0x20] sm:$0xff] }
 0x28f   :  { %2786 = vrot.lane.b32.xlu1 %v2739_v31, %s3140_s25  ;;  %v1561_v42 = vpop.permute.xlu1 %1560  ;;  %v2757_v3 = vpop.f32.mrf.mxu1  ;;  %261 = vst [vmem:[%s6534_s15 + $0x330] sm:$0xff] %v249_v51  ;;  %263 = vst [vmem:[%s6534_s15 + $0x340] sm:$0xff] %v251_v35  ;;  %v269_v11 = vld [vmem:[%s6536_s2 + $0x10] sm:$0xff] }
 0x290   :  { %v1571_v62 = vsel %vm1566_vm2, %v1559_v32, %v1561_v42  ;;  %v1594_v8 = vsel %vm939_vm1, %v1561_v42, 0.0  ;;  %v2743_v49 = vpop.f32.mrf.mxu0  ;;  %264 = vst.msk [vmem:[%s6534_s15 + $0x348] sm:$0xff] %vm147_vm5, %v252_v1  ;;  %265 = vst [vmem:[%s6534_s15 + $0x350] sm:$0xff] %v253_v4  ;;  %v272_v13 = vld [vmem:[%s6536_s2 + $0x28] sm:$0xff]  ;;  %v273_v32 = vld [vmem:[%s6536_s2 + $0x30] sm:$0xff] }
 0x291   :  { %v1593_v25 = vsel %vm938_vm3, %v1571_v62, 0.0  ;;  %v1606_v33 = vadd.f32 %v1594_v8, %v4571_v43  ;;  %2796 = vrot.lane.b32.xlu0 %v2755_v22, %s3140_s25  ;;  %v2761_v56 = vpop.f32.mrf.mxu1  ;;  %266 = vst.msk [vmem:[%s6534_s15 + $0x358] sm:$0xff] %vm147_vm5, %v254_v6  ;;  %v270_v22 = vld [vmem:[%s6536_s2 + $0x18] sm:$0xff]  ;;  %279 = vst [vmem:[%s6534_s15 + $0x360] sm:$0xff] %v267_v16 }
 0x292   :  { %v1605_v43 = vadd.f32 %v1593_v25, %v4574_v58  ;;  %v1770_v59 = vpop.permute.xlu0 %1769  ;;  %v243_v58 = vld [vmem:[%s6535_s1] sm:$0xff]  ;;  %v2745_v7 = vpop.f32.mrf.mxu0  ;;  %280 = vst.msk [vmem:[%s6534_s15 + $0x368] sm:$0xff] %vm147_vm5, %v268_v21  ;;  %281 = vst [vmem:[%s6534_s15 + $0x370] sm:$0xff] %v269_v11  ;;  %v274_v36 = vld [vmem:[%s6536_s2 + $0x38] sm:$0xff] }
 0x293   :  { %2798 = vrot.lane.b32.xlu1 %v2757_v3, %s3140_s25  ;;  %v1772_v19 = vpop.permute.xlu1 %1771  ;;  %255 = vst [vmem:[%s6534_s15 + $0x300] sm:$0xff] %v243_v58  ;;  %v275_v37 = vld [vmem:[%s6536_s2 + $0x40] sm:$0xff]  ;;  %282 = vst.msk [vmem:[%s6534_s15 + $0x378] sm:$0xff] %vm147_vm5, %v270_v22  ;;  %v2763_v41 = vpop.f32.mrf.mxu1 }
 0x294   :  { %v1782_v2 = vsel %vm1777_vm4, %v1770_v59, %v1772_v19  ;;  %v1805_v63 = vsel %vm937_vm15, %v1772_v19, 0.0  ;;  %283 = vst [vmem:[%s6534_s15 + $0x380] sm:$0xff] %v271_v54  ;;  %284 = vst.msk [vmem:[%s6534_s15 + $0x388] sm:$0xff] %vm147_vm5, %v272_v13  ;;  %v276_v52 = vld [vmem:[%s6536_s2 + $0x48] sm:$0xff]  ;;  %v277_v61 = vld [vmem:[%s6536_s2 + $0x50] sm:$0xff]  ;;  %v2749_v8 = vpop.f32.mrf.mxu0 }
 0x295   :  { %v1804_v45 = vsel %vm936_vm0, %v1782_v2, 0.0  ;;  %v5099_v53 = vadd.f32 %v1805_v63, %v1606_v33  ;;  %2788 = vrot.lane.b32.xlu0 %v2743_v49, %s3140_s25  ;;  %v278_v62 = vld [vmem:[%s6536_s2 + $0x58] sm:$0xff]  ;;  %285 = vst [vmem:[%s6534_s15 + $0x390] sm:$0xff] %v273_v32  ;;  %286 = vst.msk [vmem:[%s6534_s15 + $0x398] sm:$0xff] %vm147_vm5, %v274_v36  ;;  %v2767_v10 = vpop.f32.mrf.mxu1 }
 0x296   :  { %v5121_v0 = vadd.f32 %v1804_v45, %v1605_v43  ;;  %v1563_v12 = vpop.permute.xlu0 %1562  ;;  %287 = vst [vmem:[%s6534_s15 + $0x3a0] sm:$0xff] %v275_v37  ;;  %288 = vst.msk [vmem:[%s6534_s15 + $0x3a8] sm:$0xff] %vm147_vm5, %v276_v52  ;;  %v292_v18 = vld [vmem:[%s6537_s3 + $0x8] sm:$0xff]  ;;  %v293_v24 = vld [vmem:[%s6537_s3 + $0x10] sm:$0xff]  ;;  %v2751_v60 = vpop.f32.mrf.mxu0 }
 0x297   :  { %2790 = vrot.lane.b32.xlu1 %v2745_v7, %s3140_s25  ;;  %v1565_v17 = vpop.permute.xlu1 %1564  ;;  %289 = vst [vmem:[%s6534_s15 + $0x3b0] sm:$0xff] %v277_v61  ;;  %290 = vst.msk [vmem:[%s6534_s15 + $0x3b8] sm:$0xff] %vm147_vm5, %v278_v62  ;;  %v294_v25 = vld [vmem:[%s6537_s3 + $0x18] sm:$0xff] }
 0x298   :  { %v1572_v50 = vsel %vm1566_vm2, %v1563_v12, %v1565_v17  ;;  %v1596_v31 = vsel %vm939_vm1, %v1565_v17, 0.0  ;;  %v295_v33 = vld [vmem:[%s6537_s3 + $0x20] sm:$0xff]  ;;  %v296_v38 = vld [vmem:[%s6537_s3 + $0x28] sm:$0xff]  ;;  %304 = vst.msk [vmem:[%s6534_s15 + $0x3c8] sm:$0xff] %vm147_vm5, %v292_v18  ;;  %305 = vst [vmem:[%s6534_s15 + $0x3d0] sm:$0xff] %v293_v24 }
 0x299   :  { %v1595_v42 = vsel %vm938_vm3, %v1572_v50, 0.0  ;;  %v1608_v14 = vadd.f32 %v1596_v31, %v4585_v44  ;;  %2800 = vrot.lane.b32.xlu0 %v2761_v56, %s3140_s25  ;;  %v297_v43 = vld [vmem:[%s6537_s3 + $0x30] sm:$0xff]  ;;  %v298_v49 = vld [vmem:[%s6537_s3 + $0x38] sm:$0xff]  ;;  %v299_v59 = vld [vmem:[%s6537_s3 + $0x40] sm:$0xff] }
 0x29a   :  { %v1607_v44 = vadd.f32 %v1595_v42, %v4588_v48  ;;  %v1774_v15 = vpop.permute.xlu0 %1773  ;;  %v291_v48 = vld [vmem:[%s6537_s3] sm:$0xff]  ;;  %306 = vst.msk [vmem:[%s6534_s15 + $0x3d8] sm:$0xff] %vm147_vm5, %v294_v25  ;;  %307 = vst [vmem:[%s6534_s15 + $0x3e0] sm:$0xff] %v295_v33  ;;  %v300_v19 = vld [vmem:[%s6537_s3 + $0x48] sm:$0xff] }
 0x29b   :  { %2802 = vrot.lane.b32.xlu1 %v2763_v41, %s3140_s25  ;;  %v1776_v3 = vpop.permute.xlu1 %1775  ;;  %303 = vst [vmem:[%s6534_s15 + $0x3c0] sm:$0xff] %v291_v48  ;;  %308 = vst.msk [vmem:[%s6534_s15 + $0x3e8] sm:$0xff] %vm147_vm5, %v296_v38  ;;  %v301_v23 = vld [vmem:[%s6537_s3 + $0x50] sm:$0xff] }
 0x29c   :  { %v1783_v20 = vsel %vm1777_vm4, %v1774_v15, %v1776_v3  ;;  %v1807_v40 = vsel %vm937_vm15, %v1776_v3, 0.0  ;;  %v302_v39 = vld [vmem:[%s6537_s3 + $0x58] sm:$0xff]  ;;  %309 = vst [vmem:[%s6534_s15 + $0x3f0] sm:$0xff] %v297_v43  ;;  %310 = vst.msk [vmem:[%s6534_s15 + $0x3f8] sm:$0xff] %vm147_vm5, %v298_v49  ;;  %v315_v51 = vld [vmem:[%s6538_s4] sm:$0xff] }
 0x29d   :  { %v1806_v58 = vsel %vm936_vm0, %v1783_v20, 0.0  ;;  %v5275_v5 = vadd.f32 %v1807_v40, %v1608_v14  ;;  %2792 = vrot.lane.b32.xlu0 %v2749_v8, %s3140_s25  ;;  %311 = vst [vmem:[%s6534_s15 + $0x400] sm:$0xff] %v299_v59  ;;  %312 = vst.msk [vmem:[%s6534_s15 + $0x408] sm:$0xff] %vm147_vm5, %v300_v19  ;;  %v316_v30 = vld [vmem:[%s6538_s4 + $0x8] sm:$0xff] }
 0x29e   :  { %v5297_v2 = vadd.f32 %v1806_v58, %v1607_v44  ;;  %v1965_v63 = vpop.permute.xlu0 %1964  ;;  %313 = vst [vmem:[%s6534_s15 + $0x410] sm:$0xff] %v301_v23  ;;  %314 = vst.msk [vmem:[%s6534_s15 + $0x418] sm:$0xff] %vm147_vm5, %v302_v39  ;;  %v317_v35 = vld [vmem:[%s6538_s4 + $0x10] sm:$0xff]  ;;  %v318_v56 = vld [vmem:[%s6538_s4 + $0x18] sm:$0xff] }
 0x29f   :  { %2794 = vrot.lane.b32.xlu1 %v2751_v60, %s3140_s25  ;;  %v1967_v45 = vpop.permute.xlu1 %1966  ;;  %v319_v1 = vld [vmem:[%s6538_s4 + $0x20] sm:$0xff]  ;;  %v320_v4 = vld [vmem:[%s6538_s4 + $0x28] sm:$0xff]  ;;  %327 = vst [vmem:[%s6534_s15 + $0x420] sm:$0xff] %v315_v51 }
 0x2a0   :  { %328 = vst.msk [vmem:[%s6534_s15 + $0x428] sm:$0xff] %vm147_vm5, %v316_v30  ;;  %329 = vst [vmem:[%s6534_s15 + $0x430] sm:$0xff] %v317_v35  ;;  %v1989_v6 = vsel %vm1988_vm6, %v1965_v63, %v1967_v45  ;;  %v2008_v7 = vadd.f32 %v1967_v45, %v4618_v47  ;;  %v321_v12 = vld [vmem:[%s6538_s4 + $0x30] sm:$0xff]  ;;  %v322_v16 = vld [vmem:[%s6538_s4 + $0x38] sm:$0xff] }
 0x2a1   :  { %v323_v21 = vld [vmem:[%s6538_s4 + $0x40] sm:$0xff]  ;;  %330 = vst.msk [vmem:[%s6534_s15 + $0x438] sm:$0xff] %vm147_vm5, %v318_v56  ;;  %331 = vst [vmem:[%s6534_s15 + $0x440] sm:$0xff] %v319_v1  ;;  %v2007_v47 = vadd.f32 %v1989_v6, %v4624_v57  ;;  %2804 = vrot.lane.b32.xlu0 %v2767_v10, %s3140_s25  ;;  %v2769_v57 = vpop.f32.mrf.mxu1 }
 0x2a2   :  { %332 = vst.msk [vmem:[%s6534_s15 + $0x448] sm:$0xff] %vm147_vm5, %v320_v4  ;;  %v324_v11 = vld [vmem:[%s6538_s4 + $0x48] sm:$0xff]  ;;  %v325_v17 = vld [vmem:[%s6538_s4 + $0x50] sm:$0xff]  ;;  %v326_v22 = vld [vmem:[%s6538_s4 + $0x58] sm:$0xff]  ;;  %v2164_v54 = vpop.permute.xlu0 %2163 }
 0x2a3   :  { %333 = vst [vmem:[%s6534_s15 + $0x450] sm:$0xff] %v321_v12  ;;  %334 = vst.msk [vmem:[%s6534_s15 + $0x458] sm:$0xff] %vm147_vm5, %v322_v16  ;;  %v339_v13 = vld [vmem:[%s6539_s5] sm:$0xff]  ;;  %v340_v50 = vld [vmem:[%s6539_s5 + $0x8] sm:$0xff]  ;;  %v2166_v32 = vpop.permute.xlu1 %2165 }
 0x2a4   :  { %335 = vst [vmem:[%s6534_s15 + $0x460] sm:$0xff] %v323_v21  ;;  %336 = vst.msk [vmem:[%s6534_s15 + $0x468] sm:$0xff] %vm147_vm5, %v324_v11  ;;  %v341_v31 = vld [vmem:[%s6539_s5 + $0x10] sm:$0xff]  ;;  %2806 = vrot.lane.b32.xlu1 %v2769_v57, %s3140_s25  ;;  %v2188_v42 = vsel %vm2187_vm7, %v2164_v54, %v2166_v32  ;;  %v2207_v14 = vsel %vm939_vm1, %v2166_v32, 0.0 }
 0x2a5   :  { %337 = vst [vmem:[%s6534_s15 + $0x470] sm:$0xff] %v325_v17  ;;  %338 = vst.msk [vmem:[%s6534_s15 + $0x478] sm:$0xff] %vm147_vm5, %v326_v22  ;;  %v342_v36 = vld [vmem:[%s6539_s5 + $0x18] sm:$0xff]  ;;  %v343_v37 = vld [vmem:[%s6539_s5 + $0x20] sm:$0xff]  ;;  %v2206_v44 = vsel %vm938_vm3, %v2188_v42, 0.0  ;;  %v5447_v8 = vadd.f32 %v2207_v14, %v2008_v7 }
 0x2a6   :  { %v344_v41 = vld [vmem:[%s6539_s5 + $0x28] sm:$0xff]  ;;  %351 = vst [vmem:[%s6534_s15 + $0x480] sm:$0xff] %v339_v13  ;;  %352 = vst.msk [vmem:[%s6534_s15 + $0x488] sm:$0xff] %vm147_vm5, %v340_v50  ;;  %v345_v52 = vld [vmem:[%s6539_s5 + $0x30] sm:$0xff]  ;;  %v5468_v24 = vadd.f32 %v2206_v44, %v2007_v47  ;;  %v1969_v3 = vpop.permute.xlu0 %1968 }
 0x2a7   :  { %353 = vst [vmem:[%s6534_s15 + $0x490] sm:$0xff] %v341_v31  ;;  %v346_v61 = vld [vmem:[%s6539_s5 + $0x38] sm:$0xff]  ;;  %v347_v62 = vld [vmem:[%s6539_s5 + $0x40] sm:$0xff]  ;;  %354 = vst.msk [vmem:[%s6534_s15 + $0x498] sm:$0xff] %vm147_vm5, %v342_v36  ;;  %v1971_v20 = vpop.permute.xlu1 %1970 }
 0x2a8   :  { %355 = vst [vmem:[%s6534_s15 + $0x4a0] sm:$0xff] %v343_v37  ;;  %356 = vst.msk [vmem:[%s6534_s15 + $0x4a8] sm:$0xff] %vm147_vm5, %v344_v41  ;;  %v348_v15 = vld [vmem:[%s6539_s5 + $0x48] sm:$0xff]  ;;  %v349_v48 = vld [vmem:[%s6539_s5 + $0x50] sm:$0xff]  ;;  %v1990_v59 = vsel %vm1988_vm6, %v1969_v3, %v1971_v20  ;;  %v2010_v58 = vadd.f32 %v1971_v20, %v4651_v28 }
 0x2a9   :  { %v350_v18 = vld [vmem:[%s6539_s5 + $0x58] sm:$0xff]  ;;  %357 = vst [vmem:[%s6534_s15 + $0x4b0] sm:$0xff] %v345_v52  ;;  %358 = vst.msk [vmem:[%s6534_s15 + $0x4b8] sm:$0xff] %vm147_vm5, %v346_v61  ;;  %v363_v25 = vld [vmem:[%s6540_s6] sm:$0xff]  ;;  %v2009_v28 = vadd.f32 %v1990_v59, %v4657_v29 }
 0x2aa   :  { %359 = vst [vmem:[%s6534_s15 + $0x4c0] sm:$0xff] %v347_v62  ;;  %360 = vst.msk [vmem:[%s6534_s15 + $0x4c8] sm:$0xff] %vm147_vm5, %v348_v15  ;;  %v364_v33 = vld [vmem:[%s6540_s6 + $0x8] sm:$0xff]  ;;  %v365_v38 = vld [vmem:[%s6540_s6 + $0x10] sm:$0xff]  ;;  %v2168_v29 = vpop.permute.xlu0 %2167 }
 0x2ab   :  { %361 = vst [vmem:[%s6534_s15 + $0x4d0] sm:$0xff] %v349_v48  ;;  %362 = vst.msk [vmem:[%s6534_s15 + $0x4d8] sm:$0xff] %vm147_vm5, %v350_v18  ;;  %v366_v40 = vld [vmem:[%s6540_s6 + $0x18] sm:$0xff]  ;;  %v367_v43 = vld [vmem:[%s6540_s6 + $0x20] sm:$0xff]  ;;  %v2170_v45 = vpop.permute.xlu1 %2169 }
 0x2ac   :  { %v368_v49 = vld [vmem:[%s6540_s6 + $0x28] sm:$0xff]  ;;  %375 = vst [vmem:[%s6534_s15 + $0x4e0] sm:$0xff] %v363_v25  ;;  %376 = vst.msk [vmem:[%s6534_s15 + $0x4e8] sm:$0xff] %vm147_vm5, %v364_v33  ;;  %v369_v10 = vld [vmem:[%s6540_s6 + $0x30] sm:$0xff]  ;;  %v2189_v6 = vsel %vm2187_vm7, %v2168_v29, %v2170_v45  ;;  %v2209_v7 = vsel %vm939_vm1, %v2170_v45, 0.0 }
 0x2ad   :  { %377 = vst [vmem:[%s6534_s15 + $0x4f0] sm:$0xff] %v365_v38  ;;  %v370_v19 = vld [vmem:[%s6540_s6 + $0x38] sm:$0xff]  ;;  %v371_v23 = vld [vmem:[%s6540_s6 + $0x40] sm:$0xff]  ;;  %378 = vst.msk [vmem:[%s6534_s15 + $0x4f8] sm:$0xff] %vm147_vm5, %v366_v40  ;;  %v2208_v47 = vsel %vm938_vm3, %v2189_v6, 0.0  ;;  %v5615_v11 = vadd.f32 %v2209_v7, %v2010_v58 }
 0x2ae   :  { %379 = vst [vmem:[%s6534_s15 + $0x500] sm:$0xff] %v367_v43  ;;  %380 = vst.msk [vmem:[%s6534_s15 + $0x508] sm:$0xff] %vm147_vm5, %v368_v49  ;;  %v372_v39 = vld [vmem:[%s6540_s6 + $0x48] sm:$0xff]  ;;  %v373_v60 = vld [vmem:[%s6540_s6 + $0x50] sm:$0xff]  ;;  %v5636_v54 = vadd.f32 %v2208_v47, %v2009_v28  ;;  %v1973_v13 = vpop.permute.xlu0 %1972 }
 0x2af   :  { %v374_v63 = vld [vmem:[%s6540_s6 + $0x58] sm:$0xff]  ;;  %381 = vst [vmem:[%s6534_s15 + $0x510] sm:$0xff] %v369_v10  ;;  %382 = vst.msk [vmem:[%s6534_s15 + $0x518] sm:$0xff] %vm147_vm5, %v370_v19  ;;  %v387_v51 = vld [vmem:[%s6541_s7] sm:$0xff]  ;;  %v1975_v36 = vpop.permute.xlu1 %1974 }
 0x2b0   :  { %383 = vst [vmem:[%s6534_s15 + $0x520] sm:$0xff] %v371_v23  ;;  %384 = vst.msk [vmem:[%s6534_s15 + $0x528] sm:$0xff] %vm147_vm5, %v372_v39  ;;  %v388_v30 = vld [vmem:[%s6541_s7 + $0x8] sm:$0xff]  ;;  %v389_v35 = vld [vmem:[%s6541_s7 + $0x10] sm:$0xff]  ;;  %v1991_v14 = vsel %vm1988_vm6, %v1973_v13, %v1975_v36  ;;  %v2012_v52 = vadd.f32 %v1975_v36, %v4727_v46 }
 0x2b1   :  { %385 = vst [vmem:[%s6534_s15 + $0x530] sm:$0xff] %v373_v60  ;;  %386 = vst.msk [vmem:[%s6534_s15 + $0x538] sm:$0xff] %vm147_vm5, %v374_v63  ;;  %v390_v56 = vld [vmem:[%s6541_s7 + $0x18] sm:$0xff]  ;;  %v391_v1 = vld [vmem:[%s6541_s7 + $0x20] sm:$0xff]  ;;  %v2011_v46 = vadd.f32 %v1991_v14, %v4751_v9 }
 0x2b2   :  { %v392_v4 = vld [vmem:[%s6541_s7 + $0x28] sm:$0xff]  ;;  %399 = vst [vmem:[%s6534_s15 + $0x540] sm:$0xff] %v387_v51  ;;  %400 = vst.msk [vmem:[%s6534_s15 + $0x548] sm:$0xff] %vm147_vm5, %v388_v30  ;;  %v393_v12 = vld [vmem:[%s6541_s7 + $0x30] sm:$0xff]  ;;  %v2172_v9 = vpop.permute.xlu0 %2171 }
 0x2b3   :  { %401 = vst [vmem:[%s6534_s15 + $0x550] sm:$0xff] %v389_v35  ;;  %v394_v16 = vld [vmem:[%s6541_s7 + $0x38] sm:$0xff]  ;;  %v395_v21 = vld [vmem:[%s6541_s7 + $0x40] sm:$0xff]  ;;  %402 = vst.msk [vmem:[%s6534_s15 + $0x558] sm:$0xff] %vm147_vm5, %v390_v56  ;;  %v2174_v38 = vpop.permute.xlu1 %2173 }
 0x2b4   :  { %403 = vst [vmem:[%s6534_s15 + $0x560] sm:$0xff] %v391_v1  ;;  %404 = vst.msk [vmem:[%s6534_s15 + $0x568] sm:$0xff] %vm147_vm5, %v392_v4  ;;  %v396_v17 = vld [vmem:[%s6541_s7 + $0x48] sm:$0xff]  ;;  %v397_v22 = vld [vmem:[%s6541_s7 + $0x50] sm:$0xff]  ;;  %v2190_v49 = vsel %vm2187_vm7, %v2172_v9, %v2174_v38  ;;  %v2211_v59 = vsel %vm939_vm1, %v2174_v38, 0.0 }
 0x2b5   :  { %v398_v57 = vld [vmem:[%s6541_s7 + $0x58] sm:$0xff]  ;;  %405 = vst [vmem:[%s6534_s15 + $0x570] sm:$0xff] %v393_v12  ;;  %406 = vst.msk [vmem:[%s6534_s15 + $0x578] sm:$0xff] %vm147_vm5, %v394_v16  ;;  %v411_v50 = vld [vmem:[%s6542_s8] sm:$0xff]  ;;  %v2210_v23 = vsel %vm938_vm3, %v2190_v49, 0.0  ;;  %v5783_v28 = vadd.f32 %v2211_v59, %v2012_v52 }
 0x2b6   :  { %407 = vst [vmem:[%s6534_s15 + $0x580] sm:$0xff] %v395_v21  ;;  %408 = vst.msk [vmem:[%s6534_s15 + $0x588] sm:$0xff] %vm147_vm5, %v396_v17  ;;  %v412_v31 = vld [vmem:[%s6542_s8 + $0x8] sm:$0xff]  ;;  %v413_v32 = vld [vmem:[%s6542_s8 + $0x10] sm:$0xff]  ;;  %v5804_v29 = vadd.f32 %v2210_v23, %v2011_v46  ;;  %v1977_v51 = vpop.permute.xlu0 %1976 }
 0x2b7   :  { %409 = vst [vmem:[%s6534_s15 + $0x590] sm:$0xff] %v397_v22  ;;  %410 = vst.msk [vmem:[%s6534_s15 + $0x598] sm:$0xff] %vm147_vm5, %v398_v57  ;;  %v414_v37 = vld [vmem:[%s6542_s8 + $0x18] sm:$0xff]  ;;  %v415_v41 = vld [vmem:[%s6542_s8 + $0x20] sm:$0xff]  ;;  %v1979_v56 = vpop.permute.xlu1 %1978 }
 0x2b8   :  { %v416_v42 = vld [vmem:[%s6542_s8 + $0x28] sm:$0xff]  ;;  %423 = vst [vmem:[%s6534_s15 + $0x5a0] sm:$0xff] %v411_v50  ;;  %424 = vst.msk [vmem:[%s6534_s15 + $0x5a8] sm:$0xff] %vm147_vm5, %v412_v31  ;;  %v417_v61 = vld [vmem:[%s6542_s8 + $0x30] sm:$0xff]  ;;  %v1992_v7 = vsel %vm1988_vm6, %v1977_v51, %v1979_v56  ;;  %v2014_v12 = vadd.f32 %v1979_v56, %v4914_v34 }
 0x2b9   :  { %425 = vst [vmem:[%s6534_s15 + $0x5b0] sm:$0xff] %v413_v32  ;;  %v418_v62 = vld [vmem:[%s6542_s8 + $0x38] sm:$0xff]  ;;  %v419_v44 = vld [vmem:[%s6542_s8 + $0x40] sm:$0xff]  ;;  %426 = vst.msk [vmem:[%s6534_s15 + $0x5b8] sm:$0xff] %vm147_vm5, %v414_v37  ;;  %v2013_v34 = vadd.f32 %v1992_v7, %v4938_v26 }
 0x2ba   :  { %427 = vst [vmem:[%s6534_s15 + $0x5c0] sm:$0xff] %v415_v41  ;;  %428 = vst.msk [vmem:[%s6534_s15 + $0x5c8] sm:$0xff] %vm147_vm5, %v416_v42  ;;  %v420_v15 = vld [vmem:[%s6542_s8 + $0x48] sm:$0xff]  ;;  %v421_v48 = vld [vmem:[%s6542_s8 + $0x50] sm:$0xff]  ;;  %v2176_v26 = vpop.permute.xlu0 %2175 }
 0x2bb   :  { %v422_v18 = vld [vmem:[%s6542_s8 + $0x58] sm:$0xff]  ;;  %429 = vst [vmem:[%s6534_s15 + $0x5d0] sm:$0xff] %v417_v61  ;;  %430 = vst.msk [vmem:[%s6534_s15 + $0x5d8] sm:$0xff] %vm147_vm5, %v418_v62  ;;  %v435_v3 = vld [vmem:[%s6543_s9] sm:$0xff]  ;;  %v2178_v32 = vpop.permute.xlu1 %2177 }
 0x2bc   :  { %431 = vst [vmem:[%s6534_s15 + $0x5e0] sm:$0xff] %v419_v44  ;;  %432 = vst.msk [vmem:[%s6534_s15 + $0x5e8] sm:$0xff] %vm147_vm5, %v420_v15  ;;  %v436_v25 = vld [vmem:[%s6543_s9 + $0x8] sm:$0xff]  ;;  %v437_v33 = vld [vmem:[%s6543_s9 + $0x10] sm:$0xff]  ;;  %v2191_v42 = vsel %vm2187_vm7, %v2176_v26, %v2178_v32  ;;  %v2213_v14 = vsel %vm939_vm1, %v2178_v32, 0.0 }
 0x2bd   :  { %433 = vst [vmem:[%s6534_s15 + $0x5f0] sm:$0xff] %v421_v48  ;;  %434 = vst.msk [vmem:[%s6534_s15 + $0x5f8] sm:$0xff] %vm147_vm5, %v422_v18  ;;  %v438_v20 = vld [vmem:[%s6543_s9 + $0x18] sm:$0xff]  ;;  %v439_v40 = vld [vmem:[%s6543_s9 + $0x20] sm:$0xff]  ;;  %v2212_v44 = vsel %vm938_vm3, %v2191_v42, 0.0  ;;  %v5951_v46 = vadd.f32 %v2213_v14, %v2014_v12 }
 0x2be   :  { %v440_v43 = vld [vmem:[%s6543_s9 + $0x28] sm:$0xff]  ;;  %447 = vst [vmem:[%s6534_s15 + $0x600] sm:$0xff] %v435_v3  ;;  %448 = vst.msk [vmem:[%s6534_s15 + $0x608] sm:$0xff] %vm147_vm5, %v436_v25  ;;  %v441_v58 = vld [vmem:[%s6543_s9 + $0x30] sm:$0xff]  ;;  %v5972_v9 = vadd.f32 %v2212_v44, %v2013_v34  ;;  %v1981_v3 = vpop.permute.xlu0 %1980 }
 0x2bf   :  { %449 = vst [vmem:[%s6534_s15 + $0x610] sm:$0xff] %v437_v33  ;;  %v442_v10 = vld [vmem:[%s6543_s9 + $0x38] sm:$0xff]  ;;  %v443_v19 = vld [vmem:[%s6543_s9 + $0x40] sm:$0xff]  ;;  %450 = vst.msk [vmem:[%s6534_s15 + $0x618] sm:$0xff] %vm147_vm5, %v438_v20  ;;  %v1983_v20 = vpop.permute.xlu1 %1982 }
 0x2c0   :  { %451 = vst [vmem:[%s6534_s15 + $0x620] sm:$0xff] %v439_v40  ;;  %452 = vst.msk [vmem:[%s6534_s15 + $0x628] sm:$0xff] %vm147_vm5, %v440_v43  ;;  %v444_v39 = vld [vmem:[%s6543_s9 + $0x48] sm:$0xff]  ;;  %v445_v60 = vld [vmem:[%s6543_s9 + $0x50] sm:$0xff]  ;;  %v1993_v59 = vsel %vm1988_vm6, %v1981_v3, %v1983_v20 }
 0x2c1   :  { %v446_v63 = vld [vmem:[%s6543_s9 + $0x58] sm:$0xff]  ;;  %453 = vst [vmem:[%s6534_s15 + $0x630] sm:$0xff] %v441_v58  ;;  %454 = vst.msk [vmem:[%s6534_s15 + $0x638] sm:$0xff] %vm147_vm5, %v442_v10  ;;  %v459_v30 = vld [vmem:[%s6544_s10] sm:$0xff]  ;;  %v2016_v58 = vadd.f32 %v1983_v20, %v5099_v53  ;;  %v2015_v53 = vadd.f32 %v1993_v59, %v5121_v0 }
 0x2c2   :  { %455 = vst [vmem:[%s6534_s15 + $0x640] sm:$0xff] %v443_v19  ;;  %456 = vst.msk [vmem:[%s6534_s15 + $0x648] sm:$0xff] %vm147_vm5, %v444_v39  ;;  %v460_v35 = vld [vmem:[%s6544_s10 + $0x8] sm:$0xff]  ;;  %v461_v45 = vld [vmem:[%s6544_s10 + $0x10] sm:$0xff]  ;;  %v2180_v0 = vpop.permute.xlu0 %2179 }
 0x2c3   :  { %457 = vst [vmem:[%s6534_s15 + $0x650] sm:$0xff] %v445_v60  ;;  %458 = vst.msk [vmem:[%s6534_s15 + $0x658] sm:$0xff] %vm147_vm5, %v446_v63  ;;  %v462_v1 = vld [vmem:[%s6544_s10 + $0x18] sm:$0xff]  ;;  %v463_v4 = vld [vmem:[%s6544_s10 + $0x20] sm:$0xff] }
 0x2c4   :  { %v464_v6 = vld [vmem:[%s6544_s10 + $0x28] sm:$0xff]  ;;  %471 = vst [vmem:[%s6534_s15 + $0x660] sm:$0xff] %v459_v30  ;;  %472 = vst.msk [vmem:[%s6534_s15 + $0x668] sm:$0xff] %vm147_vm5, %v460_v35  ;;  %v465_v16 = vld [vmem:[%s6544_s10 + $0x30] sm:$0xff] }
 0x2c5   :  { %473 = vst [vmem:[%s6534_s15 + $0x670] sm:$0xff] %v461_v45  ;;  %v466_v21 = vld [vmem:[%s6544_s10 + $0x38] sm:$0xff]  ;;  %v467_v47 = vld [vmem:[%s6544_s10 + $0x40] sm:$0xff]  ;;  %474 = vst.msk [vmem:[%s6534_s15 + $0x678] sm:$0xff] %vm147_vm5, %v462_v1  ;;  %v2182_v45 = vpop.permute.xlu1 %2181 }
 0x2c6   :  { %475 = vst [vmem:[%s6534_s15 + $0x680] sm:$0xff] %v463_v4  ;;  %476 = vst.msk [vmem:[%s6534_s15 + $0x688] sm:$0xff] %vm147_vm5, %v464_v6  ;;  %v468_v17 = vld [vmem:[%s6544_s10 + $0x48] sm:$0xff]  ;;  %v469_v22 = vld [vmem:[%s6544_s10 + $0x50] sm:$0xff]  ;;  %v2192_v6 = vsel %vm2187_vm7, %v2180_v0, %v2182_v45  ;;  %v2215_v7 = vsel %vm939_vm1, %v2182_v45, 0.0 }
 0x2c7   :  { %v470_v57 = vld [vmem:[%s6544_s10 + $0x58] sm:$0xff]  ;;  %477 = vst [vmem:[%s6534_s15 + $0x690] sm:$0xff] %v465_v16  ;;  %478 = vst.msk [vmem:[%s6534_s15 + $0x698] sm:$0xff] %vm147_vm5, %v466_v21  ;;  %v483_v13 = vld [vmem:[%s6545_s11] sm:$0xff]  ;;  %v6116_v34 = vadd.f32 %v2215_v7, %v2016_v58 }
 0x2c8   :  { %479 = vst [vmem:[%s6534_s15 + $0x6a0] sm:$0xff] %v467_v47  ;;  %480 = vst.msk [vmem:[%s6534_s15 + $0x6a8] sm:$0xff] %vm147_vm5, %v468_v17  ;;  %v484_v50 = vld [vmem:[%s6545_s11 + $0x8] sm:$0xff]  ;;  %v485_v31 = vld [vmem:[%s6545_s11 + $0x10] sm:$0xff]  ;;  %v2214_v47 = vsel %vm938_vm3, %v2192_v6, 0.0 }
 0x2c9   :  { %481 = vst [vmem:[%s6534_s15 + $0x6b0] sm:$0xff] %v469_v22  ;;  %482 = vst.msk [vmem:[%s6534_s15 + $0x6b8] sm:$0xff] %vm147_vm5, %v470_v57  ;;  %v486_v36 = vld [vmem:[%s6545_s11 + $0x18] sm:$0xff]  ;;  %v487_v37 = vld [vmem:[%s6545_s11 + $0x20] sm:$0xff]  ;;  %v6136_v26 = vadd.f32 %v2214_v47, %v2015_v53 }
 0x2ca   :  { %v488_v41 = vld [vmem:[%s6545_s11 + $0x28] sm:$0xff]  ;;  %495 = vst [vmem:[%s6534_s15 + $0x6c0] sm:$0xff] %v483_v13  ;;  %496 = vst.msk [vmem:[%s6534_s15 + $0x6c8] sm:$0xff] %vm147_vm5, %v484_v50  ;;  %v489_v52 = vld [vmem:[%s6545_s11 + $0x30] sm:$0xff]  ;;  %v1985_v13 = vpop.permute.xlu0 %1984 }
 0x2cb   :  { %497 = vst [vmem:[%s6534_s15 + $0x6d0] sm:$0xff] %v485_v31  ;;  %v490_v61 = vld [vmem:[%s6545_s11 + $0x38] sm:$0xff]  ;;  %v491_v62 = vld [vmem:[%s6545_s11 + $0x40] sm:$0xff]  ;;  %498 = vst.msk [vmem:[%s6534_s15 + $0x6d8] sm:$0xff] %vm147_vm5, %v486_v36  ;;  %v1987_v36 = vpop.permute.xlu1 %1986 }
 0x2cc   :  { %499 = vst [vmem:[%s6534_s15 + $0x6e0] sm:$0xff] %v487_v37  ;;  %500 = vst.msk [vmem:[%s6534_s15 + $0x6e8] sm:$0xff] %vm147_vm5, %v488_v41  ;;  %v492_v15 = vld [vmem:[%s6545_s11 + $0x48] sm:$0xff]  ;;  %v493_v48 = vld [vmem:[%s6545_s11 + $0x50] sm:$0xff]  ;;  %v1994_v14 = vsel %vm1988_vm6, %v1985_v13, %v1987_v36 }
 0x2cd   :  { %v494_v18 = vld [vmem:[%s6545_s11 + $0x58] sm:$0xff]  ;;  %501 = vst [vmem:[%s6534_s15 + $0x6f0] sm:$0xff] %v489_v52  ;;  %502 = vst.msk [vmem:[%s6534_s15 + $0x6f8] sm:$0xff] %vm147_vm5, %v490_v61  ;;  %v507_v25 = vld [vmem:[%s6546_s12] sm:$0xff]  ;;  %v2018_v52 = vadd.f32 %v1987_v36, %v5275_v5  ;;  %v2017_v5 = vadd.f32 %v1994_v14, %v5297_v2 }
 0x2ce   :  { %503 = vst [vmem:[%s6534_s15 + $0x700] sm:$0xff] %v491_v62  ;;  %504 = vst.msk [vmem:[%s6534_s15 + $0x708] sm:$0xff] %vm147_vm5, %v492_v15  ;;  %v508_v33 = vld [vmem:[%s6546_s12 + $0x8] sm:$0xff]  ;;  %v509_v38 = vld [vmem:[%s6546_s12 + $0x10] sm:$0xff]  ;;  %v2184_v2 = vpop.permute.xlu0 %2183 }
 0x2cf   :  { %505 = vst [vmem:[%s6534_s15 + $0x710] sm:$0xff] %v493_v48  ;;  %506 = vst.msk [vmem:[%s6534_s15 + $0x718] sm:$0xff] %vm147_vm5, %v494_v18  ;;  %v510_v40 = vld [vmem:[%s6546_s12 + $0x18] sm:$0xff]  ;;  %v511_v43 = vld [vmem:[%s6546_s12 + $0x20] sm:$0xff] }
 0x2d0   :  { %v512_v49 = vld [vmem:[%s6546_s12 + $0x28] sm:$0xff]  ;;  %519 = vst [vmem:[%s6534_s15 + $0x780] sm:$0xff] %v507_v25  ;;  %520 = vst.msk [vmem:[%s6534_s15 + $0x788] sm:$0xff] %vm147_vm5, %v508_v33  ;;  %v513_v10 = vld [vmem:[%s6546_s12 + $0x30] sm:$0xff] }
 0x2d1   :  { %521 = vst [vmem:[%s6534_s15 + $0x790] sm:$0xff] %v509_v38  ;;  %v514_v19 = vld [vmem:[%s6546_s12 + $0x38] sm:$0xff]  ;;  %v515_v23 = vld [vmem:[%s6546_s12 + $0x40] sm:$0xff]  ;;  %522 = vst.msk [vmem:[%s6534_s15 + $0x798] sm:$0xff] %vm147_vm5, %v510_v40  ;;  %v2186_v38 = vpop.permute.xlu1 %2185 }
 0x2d2   :  { %523 = vst [vmem:[%s6534_s15 + $0x7a0] sm:$0xff] %v511_v43  ;;  %524 = vst.msk [vmem:[%s6534_s15 + $0x7a8] sm:$0xff] %vm147_vm5, %v512_v49  ;;  %v516_v39 = vld [vmem:[%s6546_s12 + $0x48] sm:$0xff]  ;;  %v517_v60 = vld [vmem:[%s6546_s12 + $0x50] sm:$0xff]  ;;  %v2193_v49 = vsel %vm2187_vm7, %v2184_v2, %v2186_v38  ;;  %v2217_v59 = vsel %vm939_vm1, %v2186_v38, 0.0 }
 0x2d3   :  { %v518_v63 = vld [vmem:[%s6546_s12 + $0x58] sm:$0xff]  ;;  %525 = vst [vmem:[%s6534_s15 + $0x7b0] sm:$0xff] %v513_v10  ;;  %526 = vst.msk [vmem:[%s6534_s15 + $0x7b8] sm:$0xff] %vm147_vm5, %v514_v19  ;;  %v50_v51 = vld [vmem:[%s6533_s0] sm:$0xff]  ;;  %v6272_v53 = vadd.f32 %v2217_v59, %v2018_v52 }
 0x2d4   :  { %527 = vst [vmem:[%s6534_s15 + $0x7c0] sm:$0xff] %v515_v23  ;;  %528 = vst.msk [vmem:[%s6534_s15 + $0x7c8] sm:$0xff] %vm147_vm5, %v516_v39  ;;  %v52_v30 = vld [vmem:[%s6533_s0 + $0x10] sm:$0xff]  ;;  %v54_v35 = vld [vmem:[%s6533_s0 + $0x20] sm:$0xff]  ;;  %v2216_v23 = vsel %vm938_vm3, %v2193_v49, 0.0 }
 0x2d5   :  { %529 = vst [vmem:[%s6534_s15 + $0x7d0] sm:$0xff] %v517_v60  ;;  %530 = vst.msk [vmem:[%s6534_s15 + $0x7d8] sm:$0xff] %vm147_vm5, %v518_v63  ;;  %v56_v56 = vld [vmem:[%s6533_s0 + $0x30] sm:$0xff]  ;;  %v58_v1 = vld [vmem:[%s6533_s0 + $0x40] sm:$0xff]  ;;  %v6292_v0 = vadd.f32 %v2216_v23, %v2017_v5 }
 0x2d6   :  { %v60_v4 = vld [vmem:[%s6533_s0 + $0x50] sm:$0xff]  ;;  %146 = vst [vmem:[%s6534_s15] sm:$0xff] %v50_v51  ;;  %149 = vst [vmem:[%s6534_s15 + $0x10] sm:$0xff] %v52_v30  ;;  %v62_v12 = vld [vmem:[%s6533_s0 + $0x60] sm:$0xff]  ;;  %v2375_v51 = vpop.permute.xlu0 %2374 }
 0x2d7   :  { %151 = vst [vmem:[%s6534_s15 + $0x20] sm:$0xff] %v54_v35  ;;  %v64_v16 = vld [vmem:[%s6533_s0 + $0x70] sm:$0xff]  ;;  %v66_v21 = vld [vmem:[%s6533_s0 + $0x80] sm:$0xff]  ;;  %153 = vst [vmem:[%s6534_s15 + $0x30] sm:$0xff] %v56_v56  ;;  %v2377_v56 = vpop.permute.xlu1 %2376 }
 0x2d8   :  { %155 = vst [vmem:[%s6534_s15 + $0x40] sm:$0xff] %v58_v1  ;;  %157 = vst [vmem:[%s6534_s15 + $0x50] sm:$0xff] %v60_v4  ;;  %v68_v17 = vld [vmem:[%s6533_s0 + $0x90] sm:$0xff]  ;;  %v70_v22 = vld [vmem:[%s6533_s0 + $0xa0] sm:$0xff]  ;;  %v2399_v2 = vsel %vm2398_vm8, %v2375_v51, %v2377_v56 }
 0x2d9   :  { %v72_v57 = vld [vmem:[%s6533_s0 + $0xb0] sm:$0xff]  ;;  %159 = vst [vmem:[%s6534_s15 + $0x60] sm:$0xff] %v62_v12  ;;  %161 = vst [vmem:[%s6534_s15 + $0x70] sm:$0xff] %v64_v16  ;;  %v74_v50 = vld [vmem:[%s6533_s0 + $0xc0] sm:$0xff] }
 0x2da   :  { %163 = vst [vmem:[%s6534_s15 + $0x80] sm:$0xff] %v66_v21  ;;  %v76_v31 = vld [vmem:[%s6533_s0 + $0xd0] sm:$0xff]  ;;  %v78_v32 = vld [vmem:[%s6533_s0 + $0xe0] sm:$0xff]  ;;  %165 = vst [vmem:[%s6534_s15 + $0x90] sm:$0xff] %v68_v17 }
 0x2db   :  { %167 = vst [vmem:[%s6534_s15 + $0xa0] sm:$0xff] %v70_v22  ;;  %169 = vst [vmem:[%s6534_s15 + $0xb0] sm:$0xff] %v72_v57  ;;  %v80_v37 = vld [vmem:[%s6533_s0 + $0xf0] sm:$0xff]  ;;  %v82_v41 = vld [vmem:[%s6533_s0 + $0x100] sm:$0xff]  ;;  %v2586_v22 = vpop.permute.xlu0 %2585  ;;  %v2588_v57 = vpop.permute.xlu1 %2587 }
 0x2dc   :  { %v84_v42 = vld [vmem:[%s6533_s0 + $0x110] sm:$0xff]  ;;  %171 = vst [vmem:[%s6534_s15 + $0xc0] sm:$0xff] %v74_v50  ;;  %173 = vst [vmem:[%s6534_s15 + $0xd0] sm:$0xff] %v76_v31  ;;  %v86_v61 = vld [vmem:[%s6533_s0 + $0x120] sm:$0xff]  ;;  %v2610_v59 = vsel %vm2609_vm9, %v2586_v22, %v2588_v57 }
 0x2dd   :  { %175 = vst [vmem:[%s6534_s15 + $0xe0] sm:$0xff] %v78_v32  ;;  %v88_v62 = vld [vmem:[%s6533_s0 + $0x130] sm:$0xff]  ;;  %v90_v44 = vld [vmem:[%s6533_s0 + $0x140] sm:$0xff]  ;;  %177 = vst [vmem:[%s6534_s15 + $0xf0] sm:$0xff] %v80_v37 }
 0x2de   :  { %179 = vst [vmem:[%s6534_s15 + $0x100] sm:$0xff] %v82_v41  ;;  %181 = vst [vmem:[%s6534_s15 + $0x110] sm:$0xff] %v84_v42  ;;  %v92_v15 = vld [vmem:[%s6533_s0 + $0x150] sm:$0xff]  ;;  %v94_v48 = vld [vmem:[%s6533_s0 + $0x160] sm:$0xff] }
 0x2df   :  { %v96_v18 = vld [vmem:[%s6533_s0 + $0x170] sm:$0xff]  ;;  %183 = vst [vmem:[%s6534_s15 + $0x120] sm:$0xff] %v86_v61  ;;  %185 = vst [vmem:[%s6534_s15 + $0x130] sm:$0xff] %v88_v62  ;;  %v98_v3 = vld [vmem:[%s6533_s0 + $0x180] sm:$0xff]  ;;  %v2379_v13 = vpop.permute.xlu0 %2378  ;;  %v2381_v50 = vpop.permute.xlu1 %2380 }
 0x2e0   :  { %187 = vst [vmem:[%s6534_s15 + $0x140] sm:$0xff] %v90_v44  ;;  %v100_v25 = vld [vmem:[%s6533_s0 + $0x190] sm:$0xff]  ;;  %v102_v33 = vld [vmem:[%s6533_s0 + $0x1a0] sm:$0xff]  ;;  %189 = vst [vmem:[%s6534_s15 + $0x150] sm:$0xff] %v92_v15 }
 0x2e1   :  { %191 = vst [vmem:[%s6534_s15 + $0x160] sm:$0xff] %v94_v48  ;;  %193 = vst [vmem:[%s6534_s15 + $0x170] sm:$0xff] %v96_v18  ;;  %v104_v20 = vld [vmem:[%s6533_s0 + $0x1b0] sm:$0xff]  ;;  %v106_v40 = vld [vmem:[%s6533_s0 + $0x1c0] sm:$0xff] }
 0x2e2   :  { %v108_v43 = vld [vmem:[%s6533_s0 + $0x1d0] sm:$0xff]  ;;  %195 = vst [vmem:[%s6534_s15 + $0x180] sm:$0xff] %v98_v3  ;;  %197 = vst [vmem:[%s6534_s15 + $0x190] sm:$0xff] %v100_v25  ;;  %v110_v58 = vld [vmem:[%s6533_s0 + $0x1e0] sm:$0xff]  ;;  %v2417_v25 = vsel %vm936_vm0, %v2399_v2, 0.0 }
 0x2e3   :  { %199 = vst [vmem:[%s6534_s15 + $0x1a0] sm:$0xff] %v102_v33  ;;  %v112_v10 = vld [vmem:[%s6533_s0 + $0x1f0] sm:$0xff]  ;;  %v114_v19 = vld [vmem:[%s6533_s0 + $0x200] sm:$0xff]  ;;  %201 = vst [vmem:[%s6534_s15 + $0x1b0] sm:$0xff] %v104_v20  ;;  %v2590_v31 = vpop.permute.xlu0 %2589  ;;  %v6375_v32 = vpop.permute.xlu1 %2591  ;;  %v2418_v33 = vsel %vm937_vm15, %v2377_v56, 0.0 }
 0x2e4   :  { %203 = vst [vmem:[%s6534_s15 + $0x1c0] sm:$0xff] %v106_v40  ;;  %205 = vst [vmem:[%s6534_s15 + $0x1d0] sm:$0xff] %v108_v43  ;;  %v116_v39 = vld [vmem:[%s6533_s0 + $0x210] sm:$0xff]  ;;  %v118_v60 = vld [vmem:[%s6533_s0 + $0x220] sm:$0xff]  ;;  %v2429_v43 = vadd.f32 %v2417_v25, %v5468_v24  ;;  %v2430_v49 = vadd.f32 %v2418_v33, %v5447_v8 }
 0x2e5   :  { %v120_v63 = vld [vmem:[%s6533_s0 + $0x230] sm:$0xff]  ;;  %207 = vst [vmem:[%s6534_s15 + $0x1e0] sm:$0xff] %v110_v58  ;;  %209 = vst [vmem:[%s6534_s15 + $0x1f0] sm:$0xff] %v112_v10  ;;  %v122_v30 = vld [vmem:[%s6533_s0 + $0x240] sm:$0xff]  ;;  %v2400_v10 = vsel %vm2398_vm8, %v2379_v13, %v2381_v50 }
 0x2e6   :  { %211 = vst [vmem:[%s6534_s15 + $0x200] sm:$0xff] %v114_v19  ;;  %v124_v35 = vld [vmem:[%s6533_s0 + $0x250] sm:$0xff]  ;;  %v126_v45 = vld [vmem:[%s6533_s0 + $0x260] sm:$0xff]  ;;  %213 = vst [vmem:[%s6534_s15 + $0x210] sm:$0xff] %v116_v39  ;;  %v2628_v39 = vadd.f32 %v2610_v59, %v2429_v43  ;;  %v2419_v51 = vsel %vm936_vm0, %v2400_v10, 0.0 }
 0x2e7   :  { %215 = vst [vmem:[%s6534_s15 + $0x220] sm:$0xff] %v118_v60  ;;  %217 = vst [vmem:[%s6534_s15 + $0x230] sm:$0xff] %v120_v63  ;;  %v128_v1 = vld [vmem:[%s6533_s0 + $0x270] sm:$0xff]  ;;  %v130_v4 = vld [vmem:[%s6533_s0 + $0x280] sm:$0xff]  ;;  %v2383_v36 = vpop.permute.xlu0 %2382  ;;  %v6377_v37 = vpop.permute.xlu1 %2384  ;;  %v2629_v60 = vadd.f32 %v2588_v57, %v2430_v49  ;;  %v2420_v63 = vsel %vm937_vm15, %v2381_v50, 0.0 }
 0x2e8   :  { %v132_v6 = vld [vmem:[%s6533_s0 + $0x290] sm:$0xff]  ;;  %219 = vst [vmem:[%s6534_s15 + $0x240] sm:$0xff] %v122_v30  ;;  %221 = vst [vmem:[%s6534_s15 + $0x250] sm:$0xff] %v124_v35  ;;  %v134_v7 = vld [vmem:[%s6533_s0 + $0x2a0] sm:$0xff]  ;;  %v2401_v57 = vsel %vm2398_vm8, %v2383_v36, %v6377_v37 }
 0x2e9   :  { %223 = vst [vmem:[%s6534_s15 + $0x260] sm:$0xff] %v126_v45  ;;  %v136_v12 = vld [vmem:[%s6533_s0 + $0x2b0] sm:$0xff]  ;;  %v138_v16 = vld [vmem:[%s6533_s0 + $0x2c0] sm:$0xff]  ;;  %225 = vst [vmem:[%s6534_s15 + $0x270] sm:$0xff] %v128_v1  ;;  %v2421_v2 = vsel %vm936_vm0, %v2401_v57, 0.0 }
 0x2ea   :  { %227 = vst [vmem:[%s6534_s15 + $0x280] sm:$0xff] %v130_v4  ;;  %229 = vst [vmem:[%s6534_s15 + $0x290] sm:$0xff] %v132_v6  ;;  %v140_v21 = vld [vmem:[%s6533_s0 + $0x2d0] sm:$0xff]  ;;  %v142_v47 = vld [vmem:[%s6533_s0 + $0x2e0] sm:$0xff]  ;;  %v2433_v59 = vadd.f32 %v2421_v2, %v5804_v29 }
 0x2eb   :  { %v144_v17 = vld [vmem:[%s6533_s0 + $0x2f0] sm:$0xff]  ;;  %231 = vst [vmem:[%s6534_s15 + $0x2a0] sm:$0xff] %v134_v7  ;;  %233 = vst [vmem:[%s6534_s15 + $0x2b0] sm:$0xff] %v136_v12  ;;  %v6379_v41 = vpop.permute.xlu0 %2593  ;;  %v6381_v42 = vpop.permute.xlu1 %2595  ;;  %v2431_v12 = vadd.f32 %v2419_v51, %v5636_v54 }
 0x2ec   :  { %235 = vst [vmem:[%s6534_s15 + $0x2c0] sm:$0xff] %v138_v16  ;;  %237 = vst [vmem:[%s6534_s15 + $0x2d0] sm:$0xff] %v140_v21  ;;  %v2432_v16 = vadd.f32 %v2420_v63, %v5615_v11 }
 0x2ed   :  { %239 = vst [vmem:[%s6534_s15 + $0x2e0] sm:$0xff] %v142_v47  ;;  %241 = vst [vmem:[%s6534_s15 + $0x2f0] sm:$0xff] %v144_v17 }
 0x2ef   :  { %v2387_v14 = vpop.permute.xlu0 %2386  ;;  %v2389_v52 = vpop.permute.xlu1 %2388 }
 0x2f0   :  { %v2402_v40 = vsel %vm2398_vm8, %v2387_v14, %v2389_v52  ;;  %v2424_v58 = vsel %vm937_vm15, %v2389_v52, 0.0 }
 0x2f1   :  { %v2423_v19 = vsel %vm936_vm0, %v2402_v40, 0.0  ;;  %v2436_v24 = vadd.f32 %v2424_v58, %v5951_v46 }
 0x2f2   :  { %v2435_v30 = vadd.f32 %v2423_v19, %v5972_v9  ;;  %v2611_v9 = vsel %vm2609_vm9, %v2590_v31, %v6375_v32 }
 0x2f3   :  { %v2598_v61 = vpop.permute.xlu0 %2597  ;;  %v2600_v62 = vpop.permute.xlu1 %2599 }
 0x2f4   :  { %v2613_v56 = vsel %vm2609_vm9, %v2598_v61, %v2600_v62  ;;  %v2635_v21 = vadd.f32 %v2600_v62, %v2436_v24  ;;  %v2630_v61 = vadd.f32 %v2611_v9, %v2431_v12  ;;  %v2631_v62 = vadd.f32 %v6375_v32, %v2432_v16 }
 0x2f5   :  { %v2634_v17 = vadd.f32 %v2613_v56, %v2435_v30 }
 0x2f7   :  { %v2391_v44 = vpop.permute.xlu0 %2390  ;;  %v2393_v5 = vpop.permute.xlu1 %2392 }
 0x2f8   :  { %v2403_v46 = vsel %vm2398_vm8, %v2391_v44, %v2393_v5  ;;  %v2426_v22 = vsel %vm937_vm15, %v2393_v5, 0.0  ;;  %v2422_v44 = vsel %vm937_vm15, %v6377_v37, 0.0 }
 0x2f9   :  { %v2425_v13 = vsel %vm936_vm0, %v2403_v46, 0.0  ;;  %v2438_v5 = vadd.f32 %v2426_v22, %v6116_v34  ;;  %v2434_v58 = vadd.f32 %v2422_v44, %v5783_v28 }
 0x2fa   :  { %v2437_v25 = vadd.f32 %v2425_v13, %v6136_v26 }
 0x2fb   :  { %v6383_v15 = vpop.permute.xlu0 %2601  ;;  %v6385_v48 = vpop.permute.xlu1 %2603  ;;  %v2633_v24 = vadd.f32 %v6381_v42, %v2434_v58 }
 0x2fc   :  { %v2614_v37 = vsel %vm2609_vm9, %v6383_v15, %v6385_v48  ;;  %v2637_v10 = vadd.f32 %v6385_v48, %v2438_v5  ;;  %v2612_v48 = vsel %vm2609_vm9, %v6379_v41, %v6381_v42 }
 0x2fd   :  { %v2636_v19 = vadd.f32 %v2614_v37, %v2437_v25  ;;  %v2632_v41 = vadd.f32 %v2612_v48, %v2433_v59 }
 0x2ff   :  { %v6387_v18 = vpop.permute.xlu0 %2394  ;;  %v6390_v3 = vpop.permute.xlu1 %2396 }
 0x300   :  { %v2404_v26 = vsel %vm2398_vm8, %v6387_v18, %v6390_v3 }
 0x301   :  { %v2427_v18 = vsel %vm936_vm0, %v2404_v26, 0.0 }
 0x302   :  { %v2439_v30 = vadd.f32 %v2427_v18, %v6292_v0 }
 0x303   :  { %v6396_v38 = vpop.permute.xlu0 %2605  ;;  %v6398_v20 = vpop.permute.xlu1 %2607 }
 0x307   :  { %v2785_v23 = vpop.permute.xlu0 %2784  ;;  %v2787_v8 = vpop.permute.xlu1 %2786 }
 0x308   :  { %v2809_v35 = vsel %vm2808_vm10, %v2785_v23, %v2787_v8  ;;  %v2828_v45 = vsel %vm939_vm1, %v2787_v8, 0.0  ;;  %v2428_v23 = vsel %vm937_vm15, %v6390_v3, 0.0 }
 0x309   :  { %v2827_v1 = vsel %vm938_vm3, %v2809_v35, 0.0  ;;  %v2840_v4 = vadd.f32 %v2828_v45, %v2629_v60  ;;  %v2440_v8 = vadd.f32 %v2428_v23, %v6272_v53  ;;  %v2615_v53 = vsel %vm2609_vm9, %v6396_v38, %v6398_v20 }
 0x30a   :  { %v2839_v7 = vadd.f32 %v2827_v1, %v2628_v39  ;;  %v2638_v46 = vadd.f32 %v2615_v53, %v2439_v30 }
 0x30b   :  { %v2797_v6 = vpop.permute.xlu0 %2796  ;;  %2852 = vst.msk [vmem:[%s6534_s15 + $0x728] sm:$0xff] %vm147_vm5, %v2840_v4  ;;  %v2799_v47 = vpop.permute.xlu1 %2798  ;;  %v2639_v0 = vadd.f32 %v6398_v20, %v2440_v8 }
 0x30c   :  { %2851 = vst [vmem:[%s6534_s15 + $0x720] sm:$0xff] %v2839_v7  ;;  %v2812_v11 = vsel %vm2808_vm10, %v2797_v6, %v2799_v47  ;;  %v2834_v54 = vsel %vm939_vm1, %v2799_v47, 0.0 }
 0x30d   :  { %v2833_v50 = vsel %vm938_vm3, %v2812_v11, 0.0  ;;  %v2846_v31 = vadd.f32 %v2834_v54, %v2635_v21 }
 0x30e   :  { %v2845_v52 = vadd.f32 %v2833_v50, %v2634_v17 }
 0x30f   :  { %v2789_v14 = vpop.permute.xlu0 %2788  ;;  %2858 = vst.msk [vmem:[%s6534_s15 + $0x758] sm:$0xff] %vm147_vm5, %v2846_v31  ;;  %v2791_v36 = vpop.permute.xlu1 %2790 }
 0x310   :  { %2857 = vst [vmem:[%s6534_s15 + $0x750] sm:$0xff] %v2845_v52  ;;  %v2810_v32 = vsel %vm2808_vm10, %v2789_v14, %v2791_v36  ;;  %v2830_v34 = vsel %vm939_vm1, %v2791_v36, 0.0 }
 0x311   :  { %v2829_v33 = vsel %vm938_vm3, %v2810_v32, 0.0  ;;  %v2842_v40 = vadd.f32 %v2830_v34, %v2631_v62 }
 0x312   :  { %v2841_v49 = vadd.f32 %v2829_v33, %v2630_v61 }
 0x313   :  { %v2801_v43 = vpop.permute.xlu0 %2800  ;;  %2854 = vst.msk [vmem:[%s6534_s15 + $0x738] sm:$0xff] %vm147_vm5, %v2842_v40  ;;  %v2803_v15 = vpop.permute.xlu1 %2802 }
 0x314   :  { %2853 = vst [vmem:[%s6534_s15 + $0x730] sm:$0xff] %v2841_v49  ;;  %v2813_v29 = vsel %vm2808_vm10, %v2801_v43, %v2803_v15  ;;  %v2836_v28 = vsel %vm939_vm1, %v2803_v15, 0.0 }
 0x315   :  { %v2835_v39 = vsel %vm938_vm3, %v2813_v29, 0.0  ;;  %v2848_v3 = vadd.f32 %v2836_v28, %v2637_v10 }
 0x316   :  { %v2847_v63 = vadd.f32 %v2835_v39, %v2636_v19 }
 0x317   :  { %v2793_v60 = vpop.permute.xlu0 %2792  ;;  %2860 = vst.msk [vmem:[%s6534_s15 + $0x768] sm:$0xff] %vm147_vm5, %v2848_v3  ;;  %v2795_v51 = vpop.permute.xlu1 %2794 }
 0x318   :  { %2859 = vst [vmem:[%s6534_s15 + $0x760] sm:$0xff] %v2847_v63  ;;  %v2811_v35 = vsel %vm2808_vm10, %v2793_v60, %v2795_v51  ;;  %v2832_v42 = vsel %vm939_vm1, %v2795_v51, 0.0 }
 0x319   :  { %v2831_v45 = vsel %vm938_vm3, %v2811_v35, 0.0  ;;  %v2844_v56 = vadd.f32 %v2832_v42, %v2633_v24 }
 0x31a   :  { %v2843_v1 = vadd.f32 %v2831_v45, %v2632_v41 }
 0x31b   :  { %2856 = vst.msk [vmem:[%s6534_s15 + $0x748] sm:$0xff] %vm147_vm5, %v2844_v56  ;;  %v2805_v4 = vpop.permute.xlu0 %2804  ;;  %v2807_v6 = vpop.permute.xlu1 %2806 }
 0x31c   :  { %2855 = vst [vmem:[%s6534_s15 + $0x740] sm:$0xff] %v2843_v1  ;;  %v2814_v38 = vsel %vm2808_vm10, %v2805_v4, %v2807_v6  ;;  %v2838_v7 = vsel %vm939_vm1, %v2807_v6, 0.0 }
 0x31d   :  { %v2837_v20 = vsel %vm938_vm3, %v2814_v38, 0.0  ;;  %v2850_v12 = vadd.f32 %v2838_v7, %v2639_v0 }
 0x31e   :  { %v2849_v16 = vadd.f32 %v2837_v20, %v2638_v46 }
 0x31f   :  { %2862 = vst.msk [vmem:[%s6534_s15 + $0x778] sm:$0xff] %vm147_vm5, %v2850_v12 }
 0x320   :  { %2861 = vst [vmem:[%s6534_s15 + $0x770] sm:$0xff] %v2849_v16 }

</bundles_post_ra>
